<compile_context>
chip_gen: v6e
topology: v6e:2x2x1
jax: 0.10.0
libtpu: 0.0.40
codegen_flags: <defaults>
</compile_context>

<pallas_src>
import functools

import jax
import jax.numpy as jnp
from jax.experimental import pallas as pl
from jax.experimental.pallas import tpu as pltpu


def _vmem_spec():
    # Whole array resident in VMEM (everything here is tiny).
    return pl.BlockSpec(memory_space=pltpu.MemorySpace.VMEM)


def _want_conv1_split():
    """Only v7x has 2 TensorCores; elsewhere a 2-way grid is pure overhead."""
    try:
        kind = jax.devices()[0].device_kind.lower()
    except Exception:
        return False
    return ("v7" in kind) or ("7x" in kind)


# ---------------------------------------------------------------------------
# Conv GEMM kernel: relu(a @ b + bias), bf16 MXU operands, bf16 output
# ---------------------------------------------------------------------------
def _gemm_bias_relu_kernel(a_ref, b_ref, bias_ref, o_ref):
    out = jnp.dot(a_ref[...], b_ref[...], preferred_element_type=jnp.float32)
    out = jnp.maximum(out + bias_ref[...], 0.0)
    o_ref[...] = out.astype(o_ref.dtype)


def gemm_bias_relu(a, b, bias, *, out_dtype=jnp.bfloat16, m_block=None):
    """relu(a @ b + bias); a:(M,K) bf16, b:(K,N) bf16, bias:(N,) f32."""
    M, K = a.shape
    K2, N = b.shape
    assert K == K2
    bias2 = bias.reshape(1, N).astype(jnp.float32)

    if m_block is None or m_block >= M:
        return pl.pallas_call(
            _gemm_bias_relu_kernel,
            out_shape=jax.ShapeDtypeStruct((M, N), out_dtype),
            in_specs=[_vmem_spec()] * 3,
            out_specs=_vmem_spec(),
        )(a, b, bias2)

    assert M % m_block == 0 and m_block % 8 == 0
    return pl.pallas_call(
        _gemm_bias_relu_kernel,
        out_shape=jax.ShapeDtypeStruct((M, N), out_dtype),
        grid=(M // m_block,),
        in_specs=[pl.BlockSpec((m_block, K), lambda i: (i, 0)),
                  pl.BlockSpec((K, N), lambda i: (0, 0)),
                  pl.BlockSpec((1, N), lambda i: (0, 0))],
        out_specs=pl.BlockSpec((m_block, N), lambda i: (i, 0)),
        compiler_params=pltpu.CompilerParams(
            dimension_semantics=("parallel",)),   # 2 TCs on v7x
    )(a, b, bias2)


# ---------------------------------------------------------------------------
# Fused head kernel: conv3 -> fc1 -> multi-layer LSTM over T steps -> fc2
# ---------------------------------------------------------------------------
def _head_kernel(p3_ref, w3_ref, b3_ref, fc1w_ref, fc1b_ref,
                 wih0_ref, wihh_ref, whh_ref, lb_ref, fc2w_ref, fc2b_ref,
                 out_ref, *, T, B_pad, hidden, num_layers, n_pos, c3_out):
    Hh = hidden
    TB = T * B_pad

    # ---- conv3 (+ReLU) folded into fc1:  fc1(feat) = sum_p relu(conv3_p)@W1_p
    # p3_ref[p] holds the im2col patches of output position p for all (t, b)
    # rows (time-major, padded batch).  No scratch: everything stays in vregs.
    w3 = w3_ref[...]
    b3 = b3_ref[...]
    acc = jnp.zeros((TB, fc1w_ref.shape[1]), jnp.float32)
    for p in range(n_pos):                                   # static unroll (9)
        c3 = jnp.dot(p3_ref[p], w3, preferred_element_type=jnp.float32) + b3
        c3 = jnp.maximum(c3, 0.0).astype(jnp.bfloat16)       # (TB, 64)
        w1_p = fc1w_ref[p * c3_out:(p + 1) * c3_out, :]      # (64, 128) bf16
        acc = acc + jnp.dot(c3, w1_p, preferred_element_type=jnp.float32)
    x_in = jnp.maximum(acc + fc1b_ref[...], 0.0).astype(jnp.bfloat16)  # (TB,128)

    # ---- multi-layer LSTM, time-major rows (t*B_pad + b), state in vregs.
    h = None
    for layer in range(num_layers):                          # static unroll
        wih = wih0_ref[...] if layer == 0 else wihh_ref[layer - 1]
        whh = whh_ref[layer]
        bias = lb_ref[layer]
        # Hoisted input projection for all T steps (off the recurrence path).
        xproj = jnp.dot(x_in, wih, preferred_element_type=jnp.float32) + bias
        h = jnp.zeros((B_pad, Hh), jnp.float32)
        c = jnp.zeros((B_pad, Hh), jnp.float32)
        h_steps = []
        for t in range(T):                                   # static unroll
            gates = (xproj[t * B_pad:(t + 1) * B_pad, :]
                     + jnp.dot(h.astype(jnp.bfloat16), whh,
                               preferred_element_type=jnp.float32))
            # g-gate columns of wih/whh/bias were pre-scaled by 2, so one
            # sigmoid pass covers all 4 gates; tanh(g) = 2*sigmoid(2g) - 1.
            s = jax.nn.sigmoid(gates)
            i_g = s[:, 0:Hh]
            f_g = s[:, Hh:2 * Hh]
            g_g = 2.0 * s[:, 2 * Hh:3 * Hh] - 1.0
            o_g = s[:, 3 * Hh:4 * Hh]
            c = f_g * c + i_g * g_g
            h = o_g * jnp.tanh(c)
            h_steps.append(h)
        if layer + 1 < num_layers:
            # Next layer's inputs stay in vregs (no masked VMEM stores);
            # layers > 0 use an unpadded (H, 4H) wih.
            x_in = jnp.concatenate(h_steps, axis=0).astype(jnp.bfloat16)

    out = (jnp.dot(h.astype(jnp.bfloat16), fc2w_ref[...],
                   preferred_element_type=jnp.float32) + fc2b_ref[...])
    out_ref[...] = out


def lstm_head(patches3, w3, b3, fc1_w, fc1_b, wih0, wih_hi, whh, lstm_b,
              fc2_w, fc2_b, *, T, B_pad, hidden, num_layers):
    n_pos = patches3.shape[0]
    c3_out = w3.shape[1]
    kernel = functools.partial(_head_kernel, T=T, B_pad=B_pad, hidden=hidden,
                               num_layers=num_layers, n_pos=n_pos,
                               c3_out=c3_out)
    return pl.pallas_call(
        kernel,
        out_shape=jax.ShapeDtypeStruct((B_pad, fc2_w.shape[1]), jnp.float32),
        in_specs=[_vmem_spec()] * 11,
        out_specs=_vmem_spec(),
    )(patches3, w3, b3, fc1_w, fc1_b, wih0, wih_hi, whh, lstm_b, fc2_w, fc2_b)


# ---------------------------------------------------------------------------
# Glue (im2col, pooling, parameter setup)
# ---------------------------------------------------------------------------
def conv2d_relu(x, w, b, *, allow_split=False):
    """Valid 3x3 conv + ReLU via im2col + one Pallas GEMM (bf16 NHWC output).

    When possible, `pack = 128 // Cout` output pixels are packed into a single
    128-lane output row via a block-diagonal weight, so stores are lane-dense
    and MXU row-group issues drop by `pack`x.
    """
    N, H, W, Cin = x.shape
    kh, kw, _, Cout = w.shape
    Ho, Wo = H - kh + 1, W - kw + 1
    cols = [x[:, i:i + Ho, j:j + Wo, :] for i in range(kh) for j in range(kw)]
    patches = jnp.concatenate(cols, axis=-1).reshape(N * Ho * Wo, kh * kw * Cin)
    M, K = patches.shape
    w2d = w.reshape(K, Cout)

    pack = max(1, 128 // Cout)
    if pack > 1 and M % pack == 0:
        # Row m' of `a` holds `pack` consecutive pixels' patches (free reshape).
        a = patches.reshape(M // pack, pack * K).astype(jnp.bfloat16)
        eye = jnp.eye(pack, dtype=w2d.dtype)
        wbd = (eye[:, None, :, None] * w2d[None, :, None, :]
               ).reshape(pack * K, pack * Cout).astype(jnp.bfloat16)
        bias = jnp.tile(b, pack)
        out = gemm_bias_relu(a, wbd, bias)            # (M//pack, pack*Cout)
    else:
        # Fallback: plain GEMM; 2-way M split only where 2 TCs exist (v7x).
        a = patches.astype(jnp.bfloat16)
        m_block = None
        if allow_split and M >= 2048 and M % 2 == 0 and (M // 2) % 8 == 0:
            m_block = M // 2
        out = gemm_bias_relu(a, w2d.astype(jnp.bfloat16), b, m_block=m_block)
    return out.reshape(N, Ho, Wo, Cout)


def maxpool2(x):
    """2x2 max pool, stride 2, floor (matches nn.MaxPool2d(2,2)). x:(N,H,W,C)."""
    N, H, W, C = x.shape
    Ho, Wo = H // 2, W // 2
    x = x[:, :Ho * 2, :Wo * 2, :]
    x = x.reshape(N, Ho, 2, Wo, 2, C)
    return jnp.max(x, axis=(2, 4))


def init_params(key, lstm_hidden, num_layers, lstm_in=128):
    ks = jax.random.split(key, 8 + 3 * num_layers + 2)

    def u(k, shape, fan_in):
        bound = 1.0 / float(fan_in) ** 0.5
        return jax.random.uniform(k, shape, jnp.float32, -bound, bound)

    p = {
        "conv1_w": u(ks[0], (3, 3, 1, 16), 9),
        "conv1_b": u(ks[1], (16,), 9),
        "conv2_w": u(ks[2], (3, 3, 16, 32), 16 * 9),
        "conv2_b": u(ks[3], (32,), 16 * 9),
        "conv3_w": u(ks[4], (3, 3, 32, 64), 32 * 9),
        "conv3_b": u(ks[5], (64,), 32 * 9),
        "fc1_w": u(ks[6], (64 * 3 * 3, lstm_in), 64 * 3 * 3),
        "fc1_b": u(ks[7], (lstm_in,), 64 * 3 * 3),
    }
    wih_l, whh_l, b_l = [], [], []
    kidx = 8
    for layer in range(num_layers):
        in_sz = lstm_in if layer == 0 else lstm_hidden
        wih_l.append(u(ks[kidx], (in_sz, 4 * lstm_hidden), lstm_hidden)); kidx += 1
        whh_l.append(u(ks[kidx], (lstm_hidden, 4 * lstm_hidden), lstm_hidden)); kidx += 1
        # combined bias (b_ih + b_hh in PyTorch)
        b_l.append(u(ks[kidx], (1, 4 * lstm_hidden), lstm_hidden)); kidx += 1
    p["lstm_wih"] = wih_l                      # per-layer, UNPADDED (in, 4H)
    p["lstm_whh"] = jnp.stack(whh_l)           # (L, H, 4H)
    p["lstm_b"] = jnp.stack(b_l)               # (L, 1, 4H)
    p["fc2_w"] = u(ks[kidx], (lstm_hidden, 2), lstm_hidden); kidx += 1
    p["fc2_b"] = u(ks[kidx], (2,), lstm_hidden)
    return p


def forward(params, x, *, lstm_hidden, num_layers, conv1_split=False):
    B, T, H, W = x.shape
    Hh = lstm_hidden
    xc = x.reshape(B * T, H, W, 1)             # PyTorch: view(B*T, 1, H, W)

    # ---- conv stack: 2 Pallas GEMMs; pooling is tiny XLA glue on bf16 ----
    xc = maxpool2(conv2d_relu(xc, params["conv1_w"], params["conv1_b"],
                              allow_split=conv1_split))      # (B*T,13,13,16)
    xc = maxpool2(conv2d_relu(xc, params["conv2_w"], params["conv2_b"]))
    # xc: (B*T, 5, 5, 32) bf16

    # ---- conv3 im2col patches, relaid out time-major with padded batch ----
    kh, kw, Cin3, C3 = params["conv3_w"].shape
    Ho = xc.shape[1] - kh + 1
    Wo = xc.shape[2] - kw + 1
    n_pos = Ho * Wo
    Kc3 = kh * kw * Cin3
    assert params["fc1_w"].shape[0] == n_pos * C3
    cols = [xc[:, i:i + Ho, j:j + Wo, :] for i in range(kh) for j in range(kw)]
    patches = jnp.concatenate(cols, axis=-1)                 # (B*T,Ho,Wo,Kc3)
    B_pad = max(8, ((B + 7) // 8) * 8)
    patches = patches.reshape(B, T, n_pos, Kc3)
    patches = jnp.transpose(patches, (2, 1, 0, 3))           # (n_pos,T,B,Kc3)
    patches = jnp.pad(patches, ((0, 0), (0, 0), (0, B_pad - B), (0, 0)))
    patches = patches.reshape(n_pos, T * B_pad, Kc3).astype(jnp.bfloat16)

    # ---- head weights: bf16 MXU operands, g-gate columns pre-scaled by 2 ----
    def scale_g(a):                                          # a: (..., 4H)
        s = jnp.concatenate([jnp.ones((2 * Hh,), a.dtype),
                             jnp.full((Hh,), 2.0, a.dtype),
                             jnp.ones((Hh,), a.dtype)])
        return a * s

    wih_list = params["lstm_wih"]
    wih0 = scale_g(wih_list[0]).astype(jnp.bfloat16)         # (128, 4H)
    if num_layers > 1:
        wih_hi = jnp.stack([scale_g(w) for w in wih_list[1:]]
                           ).astype(jnp.bfloat16)            # (L-1, H, 4H)
    else:
        wih_hi = jnp.zeros((1, Hh, 4 * Hh), jnp.bfloat16)    # unused dummy
    whh = scale_g(params["lstm_whh"]).astype(jnp.bfloat16)   # (L, H, 4H)
    lb = scale_g(params["lstm_b"]).astype(jnp.float32)       # (L, 1, 4H)

    out = lstm_head(
        patches,
        params["conv3_w"].reshape(Kc3, C3).astype(jnp.bfloat16),
        params["conv3_b"].reshape(1, C3).astype(jnp.float32),
        params["fc1_w"].astype(jnp.bfloat16),
        params["fc1_b"].reshape(1, -1).astype(jnp.float32),
        wih0, wih_hi, whh, lb,
        params["fc2_w"].astype(jnp.bfloat16),
        params["fc2_b"].reshape(1, -1).astype(jnp.float32),
        T=T, B_pad=B_pad, hidden=Hh, num_layers=num_layers)
    return out[:B]                                           # (B, 2)


if __name__ == "__main__":
    B, T, H, W = 2, 4, 28, 28          # 28x28 input implied by fc1 = 64*3*3
    lstm_hidden, num_layers = 32, 2

    x = jax.random.normal(jax.random.PRNGKey(0), (B, T, H, W), jnp.float32)
    params = init_params(jax.random.PRNGKey(42), lstm_hidden, num_layers)

    fwd = jax.jit(functools.partial(forward, lstm_hidden=lstm_hidden,
                                    num_layers=num_layers,
                                    conv1_split=_want_conv1_split()))
    out = jax.block_until_ready(fwd(params, x))
    assert out.shape == (B, 2), out.shape
    print("KERNEL_OK")
</pallas_src>

<mosaic_0001>
module attributes {stable_mosaic.version = 11 : i64} {
  func.func @_gemm_bias_relu_kernel(%arg0: memref<676x72xbf16, #tpu.memory_space<vmem>>, %arg1: memref<72x128xbf16, #tpu.memory_space<vmem>>, %arg2: memref<1x128xf32, #tpu.memory_space<vmem>>, %arg3: memref<676x128xbf16, #tpu.memory_space<vmem>>) attributes {dimension_semantics = [], scalar_prefetch = 0 : i64, scratch_operands = 0 : i64, tpu.core_type = #tpu.core_type<tc>} {
    %c0 = arith.constant 0 : index
    %c0_0 = arith.constant 0 : index
    %0 = vector.load %arg0[%c0, %c0_0] : memref<676x72xbf16, #tpu.memory_space<vmem>>, vector<676x72xbf16>
    %c0_1 = arith.constant 0 : index
    %c0_2 = arith.constant 0 : index
    %1 = vector.load %arg1[%c0_1, %c0_2] : memref<72x128xbf16, #tpu.memory_space<vmem>>, vector<72x128xbf16>
    %cst = arith.constant dense<0.000000e+00> : vector<676x128xf32>
    %2 = tpu.matmul %0, %1, %cst {dimension_numbers = #tpu.dot_dimension_numbers<[1], [0], [0], [1], [0, 0, 1, 1], [], []>} : vector<676x72xbf16>, vector<72x128xbf16>, vector<676x128xf32> -> vector<676x128xf32>
    %c0_3 = arith.constant 0 : index
    %c0_4 = arith.constant 0 : index
    %3 = vector.load %arg2[%c0_3, %c0_4] : memref<1x128xf32, #tpu.memory_space<vmem>>, vector<1x128xf32>
    %4 = vector.broadcast %3 : vector<1x128xf32> to vector<676x128xf32>
    %5 = arith.addf %2, %4 : vector<676x128xf32>
    %cst_5 = arith.constant 0.000000e+00 : f32
    %6 = vector.broadcast %cst_5 : f32 to vector<676x128xf32>
    %7 = arith.maximumf %5, %6 : vector<676x128xf32>
    %8 = arith.truncf %7 : vector<676x128xf32> to vector<676x128xbf16>
    %c0_6 = arith.constant 0 : index
    %c0_7 = arith.constant 0 : index
    %9 = vector.load %arg3[%c0_6, %c0_7] : memref<676x128xbf16, #tpu.memory_space<vmem>>, vector<676x128xbf16>
    tpu.vector_store %arg3[%c0_6, %c0_7], %8 {strides = array<i32>} : memref<676x128xbf16, #tpu.memory_space<vmem>>, vector<676x128xbf16>,
    return
  }
}

module attributes {stable_mosaic.version = 11 : i64} {
  func.func @_gemm_bias_relu_kernel(%arg0: memref<242x576xbf16, #tpu.memory_space<vmem>>, %arg1: memref<576x128xbf16, #tpu.memory_space<vmem>>, %arg2: memref<1x128xf32, #tpu.memory_space<vmem>>, %arg3: memref<242x128xbf16, #tpu.memory_space<vmem>>) attributes {dimension_semantics = [], scalar_prefetch = 0 : i64, scratch_operands = 0 : i64, tpu.core_type = #tpu.core_type<tc>} {
    %c0 = arith.constant 0 : index
    %c0_0 = arith.constant 0 : index
    %0 = vector.load %arg0[%c0, %c0_0] : memref<242x576xbf16, #tpu.memory_space<vmem>>, vector<242x576xbf16>
    %c0_1 = arith.constant 0 : index
    %c0_2 = arith.constant 0 : index
    %1 = vector.load %arg1[%c0_1, %c0_2] : memref<576x128xbf16, #tpu.memory_space<vmem>>, vector<576x128xbf16>
    %cst = arith.constant dense<0.000000e+00> : vector<242x128xf32>
    %2 = tpu.matmul %0, %1, %cst {dimension_numbers = #tpu.dot_dimension_numbers<[1], [0], [0], [1], [0, 0, 1, 1], [], []>} : vector<242x576xbf16>, vector<576x128xbf16>, vector<242x128xf32> -> vector<242x128xf32>
    %c0_3 = arith.constant 0 : index
    %c0_4 = arith.constant 0 : index
    %3 = vector.load %arg2[%c0_3, %c0_4] : memref<1x128xf32, #tpu.memory_space<vmem>>, vector<1x128xf32>
    %4 = vector.broadcast %3 : vector<1x128xf32> to vector<242x128xf32>
    %5 = arith.addf %2, %4 : vector<242x128xf32>
    %cst_5 = arith.constant 0.000000e+00 : f32
    %6 = vector.broadcast %cst_5 : f32 to vector<242x128xf32>
    %7 = arith.maximumf %5, %6 : vector<242x128xf32>
    %8 = arith.truncf %7 : vector<242x128xf32> to vector<242x128xbf16>
    %c0_6 = arith.constant 0 : index
    %c0_7 = arith.constant 0 : index
    %9 = vector.load %arg3[%c0_6, %c0_7] : memref<242x128xbf16, #tpu.memory_space<vmem>>, vector<242x128xbf16>
    tpu.vector_store %arg3[%c0_6, %c0_7], %8 {strides = array<i32>} : memref<242x128xbf16, #tpu.memory_space<vmem>>, vector<242x128xbf16>,
    return
  }
}

module attributes {stable_mosaic.version = 11 : i64} {
  func.func @_head_kernel(%arg0: memref<9x32x288xbf16, #tpu.memory_space<vmem>>, %arg1: memref<288x64xbf16, #tpu.memory_space<vmem>>, %arg2: memref<1x64xf32, #tpu.memory_space<vmem>>, %arg3: memref<576x128xbf16, #tpu.memory_space<vmem>>, %arg4: memref<1x128xf32, #tpu.memory_space<vmem>>, %arg5: memref<128x128xbf16, #tpu.memory_space<vmem>>, %arg6: memref<1x32x128xbf16, #tpu.memory_space<vmem>>, %arg7: memref<2x32x128xbf16, #tpu.memory_space<vmem>>, %arg8: memref<2x1x128xf32, #tpu.memory_space<vmem>>, %arg9: memref<32x2xbf16, #tpu.memory_space<vmem>>, %arg10: memref<1x2xf32, #tpu.memory_space<vmem>>, %arg11: memref<8x2xf32, #tpu.memory_space<vmem>>) attributes {dimension_semantics = [], scalar_prefetch = 0 : i64, scratch_operands = 0 : i64, tpu.core_type = #tpu.core_type<tc>} {
    %c0 = arith.constant 0 : index
    %c0_0 = arith.constant 0 : index
    %0 = vector.load %arg1[%c0, %c0_0] : memref<288x64xbf16, #tpu.memory_space<vmem>>, vector<288x64xbf16>
    %c0_1 = arith.constant 0 : index
    %c0_2 = arith.constant 0 : index
    %1 = vector.load %arg2[%c0_1, %c0_2] : memref<1x64xf32, #tpu.memory_space<vmem>>, vector<1x64xf32>
    %cst = arith.constant 0.000000e+00 : f32
    %2 = vector.broadcast %cst : f32 to vector<32x128xf32>
    %c0_3 = arith.constant 0 : index
    %c0_4 = arith.constant 0 : index
    %c0_5 = arith.constant 0 : index
    %3 = vector.load %arg0[%c0_3, %c0_4, %c0_5] : memref<9x32x288xbf16, #tpu.memory_space<vmem>>, vector<1x32x288xbf16>
    %4 = vector.shape_cast %3 : vector<1x32x288xbf16> to vector<32x288xbf16>
    %cst_6 = arith.constant dense<0.000000e+00> : vector<32x64xf32>
    %5 = tpu.matmul %4, %0, %cst_6 {dimension_numbers = #tpu.dot_dimension_numbers<[1], [0], [0], [1], [0, 0, 1, 1], [], []>} : vector<32x288xbf16>, vector<288x64xbf16>, vector<32x64xf32> -> vector<32x64xf32>
    %6 = vector.broadcast %1 : vector<1x64xf32> to vector<32x64xf32>
    %7 = arith.addf %5, %6 : vector<32x64xf32>
    %cst_7 = arith.constant 0.000000e+00 : f32
    %8 = vector.broadcast %cst_7 : f32 to vector<32x64xf32>
    %9 = arith.maximumf %7, %8 : vector<32x64xf32>
    %10 = arith.truncf %9 : vector<32x64xf32> to vector<32x64xbf16>
    %c0_8 = arith.constant 0 : index
    %c0_9 = arith.constant 0 : index
    %11 = vector.load %arg3[%c0_8, %c0_9] : memref<576x128xbf16, #tpu.memory_space<vmem>>, vector<64x128xbf16>
    %cst_10 = arith.constant dense<0.000000e+00> : vector<32x128xf32>
    %12 = tpu.matmul %10, %11, %cst_10 {dimension_numbers = #tpu.dot_dimension_numbers<[1], [0], [0], [1], [0, 0, 1, 1], [], []>} : vector<32x64xbf16>, vector<64x128xbf16>, vector<32x128xf32> -> vector<32x128xf32>
    %13 = arith.addf %2, %12 : vector<32x128xf32>
    %c1 = arith.constant 1 : index
    %c0_11 = arith.constant 0 : index
    %c0_12 = arith.constant 0 : index
    %14 = vector.load %arg0[%c1, %c0_11, %c0_12] : memref<9x32x288xbf16, #tpu.memory_space<vmem>>, vector<1x32x288xbf16>
    %15 = vector.shape_cast %14 : vector<1x32x288xbf16> to vector<32x288xbf16>
    %cst_13 = arith.constant dense<0.000000e+00> : vector<32x64xf32>
    %16 = tpu.matmul %15, %0, %cst_13 {dimension_numbers = #tpu.dot_dimension_numbers<[1], [0], [0], [1], [0, 0, 1, 1], [], []>} : vector<32x288xbf16>, vector<288x64xbf16>, vector<32x64xf32> -> vector<32x64xf32>
    %17 = vector.broadcast %1 : vector<1x64xf32> to vector<32x64xf32>
    %18 = arith.addf %16, %17 : vector<32x64xf32>
    %cst_14 = arith.constant 0.000000e+00 : f32
    %19 = vector.broadcast %cst_14 : f32 to vector<32x64xf32>
    %20 = arith.maximumf %18, %19 : vector<32x64xf32>
    %21 = arith.truncf %20 : vector<32x64xf32> to vector<32x64xbf16>
    %c64 = arith.constant 64 : index
    %c0_15 = arith.constant 0 : index
    %22 = vector.load %arg3[%c64, %c0_15] : memref<576x128xbf16, #tpu.memory_space<vmem>>, vector<64x128xbf16>
    %cst_16 = arith.constant dense<0.000000e+00> : vector<32x128xf32>
    %23 = tpu.matmul %21, %22, %cst_16 {dimension_numbers = #tpu.dot_dimension_numbers<[1], [0], [0], [1], [0, 0, 1, 1], [], []>} : vector<32x64xbf16>, vector<64x128xbf16>, vector<32x128xf32> -> vector<32x128xf32>
    %24 = arith.addf %13, %23 : vector<32x128xf32>
    %c2 = arith.constant 2 : index
    %c0_17 = arith.constant 0 : index
    %c0_18 = arith.constant 0 : index
    %25 = vector.load %arg0[%c2, %c0_17, %c0_18] : memref<9x32x288xbf16, #tpu.memory_space<vmem>>, vector<1x32x288xbf16>
    %26 = vector.shape_cast %25 : vector<1x32x288xbf16> to vector<32x288xbf16>
    %cst_19 = arith.constant dense<0.000000e+00> : vector<32x64xf32>
    %27 = tpu.matmul %26, %0, %cst_19 {dimension_numbers = #tpu.dot_dimension_numbers<[1], [0], [0], [1], [0, 0, 1, 1], [], []>} : vector<32x288xbf16>, vector<288x64xbf16>, vector<32x64xf32> -> vector<32x64xf32>
    %28 = vector.broadcast %1 : vector<1x64xf32> to vector<32x64xf32>
    %29 = arith.addf %27, %28 : vector<32x64xf32>
    %cst_20 = arith.constant 0.000000e+00 : f32
    %30 = vector.broadcast %cst_20 : f32 to vector<32x64xf32>
    %31 = arith.maximumf %29, %30 : vector<32x64xf32>
    %32 = arith.truncf %31 : vector<32x64xf32> to vector<32x64xbf16>
    %c128 = arith.constant 128 : index
    %c0_21 = arith.constant 0 : index
    %33 = vector.load %arg3[%c128, %c0_21] : memref<576x128xbf16, #tpu.memory_space<vmem>>, vector<64x128xbf16>
    %cst_22 = arith.constant dense<0.000000e+00> : vector<32x128xf32>
    %34 = tpu.matmul %32, %33, %cst_22 {dimension_numbers = #tpu.dot_dimension_numbers<[1], [0], [0], [1], [0, 0, 1, 1], [], []>} : vector<32x64xbf16>, vector<64x128xbf16>, vector<32x128xf32> -> vector<32x128xf32>
    %35 = arith.addf %24, %34 : vector<32x128xf32>
    %c3 = arith.constant 3 : index
    %c0_23 = arith.constant 0 : index
    %c0_24 = arith.constant 0 : index
    %36 = vector.load %arg0[%c3, %c0_23, %c0_24] : memref<9x32x288xbf16, #tpu.memory_space<vmem>>, vector<1x32x288xbf16>
    %37 = vector.shape_cast %36 : vector<1x32x288xbf16> to vector<32x288xbf16>
    %cst_25 = arith.constant dense<0.000000e+00> : vector<32x64xf32>
    %38 = tpu.matmul %37, %0, %cst_25 {dimension_numbers = #tpu.dot_dimension_numbers<[1], [0], [0], [1], [0, 0, 1, 1], [], []>} : vector<32x288xbf16>, vector<288x64xbf16>, vector<32x64xf32> -> vector<32x64xf32>
    %39 = vector.broadcast %1 : vector<1x64xf32> to vector<32x64xf32>
    %40 = arith.addf %38, %39 : vector<32x64xf32>
    %cst_26 = arith.constant 0.000000e+00 : f32
    %41 = vector.broadcast %cst_26 : f32 to vector<32x64xf32>
    %42 = arith.maximumf %40, %41 : vector<32x64xf32>
    %43 = arith.truncf %42 : vector<32x64xf32> to vector<32x64xbf16>
    %c192 = arith.constant 192 : index
    %c0_27 = arith.constant 0 : index
    %44 = vector.load %arg3[%c192, %c0_27] : memref<576x128xbf16, #tpu.memory_space<vmem>>, vector<64x128xbf16>
    %cst_28 = arith.constant dense<0.000000e+00> : vector<32x128xf32>
    %45 = tpu.matmul %43, %44, %cst_28 {dimension_numbers = #tpu.dot_dimension_numbers<[1], [0], [0], [1], [0, 0, 1, 1], [], []>} : vector<32x64xbf16>, vector<64x128xbf16>, vector<32x128xf32> -> vector<32x128xf32>
    %46 = arith.addf %35, %45 : vector<32x128xf32>
    %c4 = arith.constant 4 : index
    %c0_29 = arith.constant 0 : index
    %c0_30 = arith.constant 0 : index
    %47 = vector.load %arg0[%c4, %c0_29, %c0_30] : memref<9x32x288xbf16, #tpu.memory_space<vmem>>, vector<1x32x288xbf16>
    %48 = vector.shape_cast %47 : vector<1x32x288xbf16> to vector<32x288xbf16>
    %cst_31 = arith.constant dense<0.000000e+00> : vector<32x64xf32>
    %49 = tpu.matmul %48, %0, %cst_31 {dimension_numbers = #tpu.dot_dimension_numbers<[1], [0], [0], [1], [0, 0, 1, 1], [], []>} : vector<32x288xbf16>, vector<288x64xbf16>, vector<32x64xf32> -> vector<32x64xf32>
    %50 = vector.broadcast %1 : vector<1x64xf32> to vector<32x64xf32>
    %51 = arith.addf %49, %50 : vector<32x64xf32>
    %cst_32 = arith.constant 0.000000e+00 : f32
    %52 = vector.broadcast %cst_32 : f32 to vector<32x64xf32>
    %53 = arith.maximumf %51, %52 : vector<32x64xf32>
    %54 = arith.truncf %53 : vector<32x64xf32> to vector<32x64xbf16>
    %c256 = arith.constant 256 : index
    %c0_33 = arith.constant 0 : index
    %55 = vector.load %arg3[%c256, %c0_33] : memref<576x128xbf16, #tpu.memory_space<vmem>>, vector<64x128xbf16>
    %cst_34 = arith.constant dense<0.000000e+00> : vector<32x128xf32>
    %56 = tpu.matmul %54, %55, %cst_34 {dimension_numbers = #tpu.dot_dimension_numbers<[1], [0], [0], [1], [0, 0, 1, 1], [], []>} : vector<32x64xbf16>, vector<64x128xbf16>, vector<32x128xf32> -> vector<32x128xf32>
    %57 = arith.addf %46, %56 : vector<32x128xf32>
    %c5 = arith.constant 5 : index
    %c0_35 = arith.constant 0 : index
    %c0_36 = arith.constant 0 : index
    %58 = vector.load %arg0[%c5, %c0_35, %c0_36] : memref<9x32x288xbf16, #tpu.memory_space<vmem>>, vector<1x32x288xbf16>
    %59 = vector.shape_cast %58 : vector<1x32x288xbf16> to vector<32x288xbf16>
    %cst_37 = arith.constant dense<0.000000e+00> : vector<32x64xf32>
    %60 = tpu.matmul %59, %0, %cst_37 {dimension_numbers = #tpu.dot_dimension_numbers<[1], [0], [0], [1], [0, 0, 1, 1], [], []>} : vector<32x288xbf16>, vector<288x64xbf16>, vector<32x64xf32> -> vector<32x64xf32>
    %61 = vector.broadcast %1 : vector<1x64xf32> to vector<32x64xf32>
    %62 = arith.addf %60, %61 : vector<32x64xf32>
    %cst_38 = arith.constant 0.000000e+00 : f32
    %63 = vector.broadcast %cst_38 : f32 to vector<32x64xf32>
    %64 = arith.maximumf %62, %63 : vector<32x64xf32>
    %65 = arith.truncf %64 : vector<32x64xf32> to vector<32x64xbf16>
    %c320 = arith.constant 320 : index
    %c0_39 = arith.constant 0 : index
    %66 = vector.load %arg3[%c320, %c0_39] : memref<576x128xbf16, #tpu.memory_space<vmem>>, vector<64x128xbf16>
    %cst_40 = arith.constant dense<0.000000e+00> : vector<32x128xf32>
    %67 = tpu.matmul %65, %66, %cst_40 {dimension_numbers = #tpu.dot_dimension_numbers<[1], [0], [0], [1], [0, 0, 1, 1], [], []>} : vector<32x64xbf16>, vector<64x128xbf16>, vector<32x128xf32> -> vector<32x128xf32>
    %68 = arith.addf %57, %67 : vector<32x128xf32>
    %c6 = arith.constant 6 : index
    %c0_41 = arith.constant 0 : index
    %c0_42 = arith.constant 0 : index
    %69 = vector.load %arg0[%c6, %c0_41, %c0_42] : memref<9x32x288xbf16, #tpu.memory_space<vmem>>, vector<1x32x288xbf16>
    %70 = vector.shape_cast %69 : vector<1x32x288xbf16> to vector<32x288xbf16>
    %cst_43 = arith.constant dense<0.000000e+00> : vector<32x64xf32>
    %71 = tpu.matmul %70, %0, %cst_43 {dimension_numbers = #tpu.dot_dimension_numbers<[1], [0], [0], [1], [0, 0, 1, 1], [], []>} : vector<32x288xbf16>, vector<288x64xbf16>, vector<32x64xf32> -> vector<32x64xf32>
    %72 = vector.broadcast %1 : vector<1x64xf32> to vector<32x64xf32>
    %73 = arith.addf %71, %72 : vector<32x64xf32>
    %cst_44 = arith.constant 0.000000e+00 : f32
    %74 = vector.broadcast %cst_44 : f32 to vector<32x64xf32>
    %75 = arith.maximumf %73, %74 : vector<32x64xf32>
    %76 = arith.truncf %75 : vector<32x64xf32> to vector<32x64xbf16>
    %c384 = arith.constant 384 : index
    %c0_45 = arith.constant 0 : index
    %77 = vector.load %arg3[%c384, %c0_45] : memref<576x128xbf16, #tpu.memory_space<vmem>>, vector<64x128xbf16>
    %cst_46 = arith.constant dense<0.000000e+00> : vector<32x128xf32>
    %78 = tpu.matmul %76, %77, %cst_46 {dimension_numbers = #tpu.dot_dimension_numbers<[1], [0], [0], [1], [0, 0, 1, 1], [], []>} : vector<32x64xbf16>, vector<64x128xbf16>, vector<32x128xf32> -> vector<32x128xf32>
    %79 = arith.addf %68, %78 : vector<32x128xf32>
    %c7 = arith.constant 7 : index
    %c0_47 = arith.constant 0 : index
    %c0_48 = arith.constant 0 : index
    %80 = vector.load %arg0[%c7, %c0_47, %c0_48] : memref<9x32x288xbf16, #tpu.memory_space<vmem>>, vector<1x32x288xbf16>
    %81 = vector.shape_cast %80 : vector<1x32x288xbf16> to vector<32x288xbf16>
    %cst_49 = arith.constant dense<0.000000e+00> : vector<32x64xf32>
    %82 = tpu.matmul %81, %0, %cst_49 {dimension_numbers = #tpu.dot_dimension_numbers<[1], [0], [0], [1], [0, 0, 1, 1], [], []>} : vector<32x288xbf16>, vector<288x64xbf16>, vector<32x64xf32> -> vector<32x64xf32>
    %83 = vector.broadcast %1 : vector<1x64xf32> to vector<32x64xf32>
    %84 = arith.addf %82, %83 : vector<32x64xf32>
    %cst_50 = arith.constant 0.000000e+00 : f32
    %85 = vector.broadcast %cst_50 : f32 to vector<32x64xf32>
    %86 = arith.maximumf %84, %85 : vector<32x64xf32>
    %87 = arith.truncf %86 : vector<32x64xf32> to vector<32x64xbf16>
    %c448 = arith.constant 448 : index
    %c0_51 = arith.constant 0 : index
    %88 = vector.load %arg3[%c448, %c0_51] : memref<576x128xbf16, #tpu.memory_space<vmem>>, vector<64x128xbf16>
    %cst_52 = arith.constant dense<0.000000e+00> : vector<32x128xf32>
    %89 = tpu.matmul %87, %88, %cst_52 {dimension_numbers = #tpu.dot_dimension_numbers<[1], [0], [0], [1], [0, 0, 1, 1], [], []>} : vector<32x64xbf16>, vector<64x128xbf16>, vector<32x128xf32> -> vector<32x128xf32>
    %90 = arith.addf %79, %89 : vector<32x128xf32>
    %c8 = arith.constant 8 : index
    %c0_53 = arith.constant 0 : index
    %c0_54 = arith.constant 0 : index
    %91 = vector.load %arg0[%c8, %c0_53, %c0_54] : memref<9x32x288xbf16, #tpu.memory_space<vmem>>, vector<1x32x288xbf16>
    %92 = vector.shape_cast %91 : vector<1x32x288xbf16> to vector<32x288xbf16>
    %cst_55 = arith.constant dense<0.000000e+00> : vector<32x64xf32>
    %93 = tpu.matmul %92, %0, %cst_55 {dimension_numbers = #tpu.dot_dimension_numbers<[1], [0], [0], [1], [0, 0, 1, 1], [], []>} : vector<32x288xbf16>, vector<288x64xbf16>, vector<32x64xf32> -> vector<32x64xf32>
    %94 = vector.broadcast %1 : vector<1x64xf32> to vector<32x64xf32>
    %95 = arith.addf %93, %94 : vector<32x64xf32>
    %cst_56 = arith.constant 0.000000e+00 : f32
    %96 = vector.broadcast %cst_56 : f32 to vector<32x64xf32>
    %97 = arith.maximumf %95, %96 : vector<32x64xf32>
    %98 = arith.truncf %97 : vector<32x64xf32> to vector<32x64xbf16>
    %c512 = arith.constant 512 : index
    %c0_57 = arith.constant 0 : index
    %99 = vector.load %arg3[%c512, %c0_57] : memref<576x128xbf16, #tpu.memory_space<vmem>>, vector<64x128xbf16>
    %cst_58 = arith.constant dense<0.000000e+00> : vector<32x128xf32>
    %100 = tpu.matmul %98, %99, %cst_58 {dimension_numbers = #tpu.dot_dimension_numbers<[1], [0], [0], [1], [0, 0, 1, 1], [], []>} : vector<32x64xbf16>, vector<64x128xbf16>, vector<32x128xf32> -> vector<32x128xf32>
    %101 = arith.addf %90, %100 : vector<32x128xf32>
    %c0_59 = arith.constant 0 : index
    %c0_60 = arith.constant 0 : index
    %102 = vector.load %arg4[%c0_59, %c0_60] : memref<1x128xf32, #tpu.memory_space<vmem>>, vector<1x128xf32>
    %103 = vector.broadcast %102 : vector<1x128xf32> to vector<32x128xf32>
    %104 = arith.addf %101, %103 : vector<32x128xf32>
    %cst_61 = arith.constant 0.000000e+00 : f32
    %105 = vector.broadcast %cst_61 : f32 to vector<32x128xf32>
    %106 = arith.maximumf %104, %105 : vector<32x128xf32>
    %107 = arith.truncf %106 : vector<32x128xf32> to vector<32x128xbf16>
    %c0_62 = arith.constant 0 : index
    %c0_63 = arith.constant 0 : index
    %108 = vector.load %arg5[%c0_62, %c0_63] : memref<128x128xbf16, #tpu.memory_space<vmem>>, vector<128x128xbf16>
    %c0_64 = arith.constant 0 : index
    %c0_65 = arith.constant 0 : index
    %c0_66 = arith.constant 0 : index
    %109 = vector.load %arg7[%c0_64, %c0_65, %c0_66] : memref<2x32x128xbf16, #tpu.memory_space<vmem>>, vector<1x32x128xbf16>
    %110 = vector.shape_cast %109 : vector<1x32x128xbf16> to vector<32x128xbf16>
    %c0_67 = arith.constant 0 : index
    %c0_68 = arith.constant 0 : index
    %c0_69 = arith.constant 0 : index
    %111 = vector.load %arg8[%c0_67, %c0_68, %c0_69] : memref<2x1x128xf32, #tpu.memory_space<vmem>>, vector<1x1x128xf32>
    %112 = vector.shape_cast %111 : vector<1x1x128xf32> to vector<1x128xf32>
    %cst_70 = arith.constant dense<0.000000e+00> : vector<32x128xf32>
    %113 = tpu.matmul %107, %108, %cst_70 {dimension_numbers = #tpu.dot_dimension_numbers<[1], [0], [0], [1], [0, 0, 1, 1], [], []>} : vector<32x128xbf16>, vector<128x128xbf16>, vector<32x128xf32> -> vector<32x128xf32>
    %114 = vector.broadcast %112 : vector<1x128xf32> to vector<32x128xf32>
    %115 = arith.addf %113, %114 : vector<32x128xf32>
    %cst_71 = arith.constant 0.000000e+00 : f32
    %116 = vector.broadcast %cst_71 : f32 to vector<8x32xf32>
    %cst_72 = arith.constant 0.000000e+00 : f32
    %117 = vector.broadcast %cst_72 : f32 to vector<8x32xf32>
    %118 = vector.extract_strided_slice %115 {offsets = [0, 0], sizes = [8, 128], strides = [1, 1]} : vector<32x128xf32> to vector<8x128xf32>
    %119 = arith.truncf %116 : vector<8x32xf32> to vector<8x32xbf16>
    %cst_73 = arith.constant dense<0.000000e+00> : vector<8x128xf32>
    %120 = tpu.matmul %119, %110, %cst_73 {dimension_numbers = #tpu.dot_dimension_numbers<[1], [0], [0], [1], [0, 0, 1, 1], [], []>} : vector<8x32xbf16>, vector<32x128xbf16>, vector<8x128xf32> -> vector<8x128xf32>
    %121 = arith.addf %118, %120 : vector<8x128xf32>
    %122 = arith.negf %121 : vector<8x128xf32>
    %123 = math.exp %122 : vector<8x128xf32>
    %cst_74 = arith.constant 1.000000e+00 : f32
    %124 = vector.broadcast %cst_74 : f32 to vector<8x128xf32>
    %125 = arith.addf %124, %123 : vector<8x128xf32>
    %126 = arith.divf %124, %125 : vector<8x128xf32>
    %127 = vector.extract_strided_slice %126 {offsets = [0, 0], sizes = [8, 32], strides = [1, 1]} : vector<8x128xf32> to vector<8x32xf32>
    %128 = vector.extract_strided_slice %126 {offsets = [0, 32], sizes = [8, 32], strides = [1, 1]} : vector<8x128xf32> to vector<8x32xf32>
    %129 = vector.extract_strided_slice %126 {offsets = [0, 64], sizes = [8, 32], strides = [1, 1]} : vector<8x128xf32> to vector<8x32xf32>
    %cst_75 = arith.constant 2.000000e+00 : f32
    %130 = vector.broadcast %cst_75 : f32 to vector<8x32xf32>
    %131 = arith.mulf %130, %129 : vector<8x32xf32>
    %cst_76 = arith.constant 1.000000e+00 : f32
    %132 = vector.broadcast %cst_76 : f32 to vector<8x32xf32>
    %133 = arith.subf %131, %132 : vector<8x32xf32>
    %134 = vector.extract_strided_slice %126 {offsets = [0, 96], sizes = [8, 32], strides = [1, 1]} : vector<8x128xf32> to vector<8x32xf32>
    %135 = arith.mulf %128, %117 : vector<8x32xf32>
    %136 = arith.mulf %127, %133 : vector<8x32xf32>
    %137 = arith.addf %135, %136 : vector<8x32xf32>
    %138 = math.tanh %137 : vector<8x32xf32>
    %139 = arith.mulf %134, %138 : vector<8x32xf32>
    %140 = vector.extract_strided_slice %115 {offsets = [8, 0], sizes = [8, 128], strides = [1, 1]} : vector<32x128xf32> to vector<8x128xf32>
    %141 = arith.truncf %139 : vector<8x32xf32> to vector<8x32xbf16>
    %cst_77 = arith.constant dense<0.000000e+00> : vector<8x128xf32>
    %142 = tpu.matmul %141, %110, %cst_77 {dimension_numbers = #tpu.dot_dimension_numbers<[1], [0], [0], [1], [0, 0, 1, 1], [], []>} : vector<8x32xbf16>, vector<32x128xbf16>, vector<8x128xf32> -> vector<8x128xf32>
    %143 = arith.addf %140, %142 : vector<8x128xf32>
    %144 = arith.negf %143 : vector<8x128xf32>
    %145 = math.exp %144 : vector<8x128xf32>
    %cst_78 = arith.constant 1.000000e+00 : f32
    %146 = vector.broadcast %cst_78 : f32 to vector<8x128xf32>
    %147 = arith.addf %146, %145 : vector<8x128xf32>
    %148 = arith.divf %146, %147 : vector<8x128xf32>
    %149 = vector.extract_strided_slice %148 {offsets = [0, 0], sizes = [8, 32], strides = [1, 1]} : vector<8x128xf32> to vector<8x32xf32>
    %150 = vector.extract_strided_slice %148 {offsets = [0, 32], sizes = [8, 32], strides = [1, 1]} : vector<8x128xf32> to vector<8x32xf32>
    %151 = vector.extract_strided_slice %148 {offsets = [0, 64], sizes = [8, 32], strides = [1, 1]} : vector<8x128xf32> to vector<8x32xf32>
    %cst_79 = arith.constant 2.000000e+00 : f32
    %152 = vector.broadcast %cst_79 : f32 to vector<8x32xf32>
    %153 = arith.mulf %152, %151 : vector<8x32xf32>
    %cst_80 = arith.constant 1.000000e+00 : f32
    %154 = vector.broadcast %cst_80 : f32 to vector<8x32xf32>
    %155 = arith.subf %153, %154 : vector<8x32xf32>
    %156 = vector.extract_strided_slice %148 {offsets = [0, 96], sizes = [8, 32], strides = [1, 1]} : vector<8x128xf32> to vector<8x32xf32>
    %157 = arith.mulf %150, %137 : vector<8x32xf32>
    %158 = arith.mulf %149, %155 : vector<8x32xf32>
    %159 = arith.addf %157, %158 : vector<8x32xf32>
    %160 = math.tanh %159 : vector<8x32xf32>
    %161 = arith.mulf %156, %160 : vector<8x32xf32>
    %162 = vector.extract_strided_slice %115 {offsets = [16, 0], sizes = [8, 128], strides = [1, 1]} : vector<32x128xf32> to vector<8x128xf32>
    %163 = arith.truncf %161 : vector<8x32xf32> to vector<8x32xbf16>
    %cst_81 = arith.constant dense<0.000000e+00> : vector<8x128xf32>
    %164 = tpu.matmul %163, %110, %cst_81 {dimension_numbers = #tpu.dot_dimension_numbers<[1], [0], [0], [1], [0, 0, 1, 1], [], []>} : vector<8x32xbf16>, vector<32x128xbf16>, vector<8x128xf32> -> vector<8x128xf32>
    %165 = arith.addf %162, %164 : vector<8x128xf32>
    %166 = arith.negf %165 : vector<8x128xf32>
    %167 = math.exp %166 : vector<8x128xf32>
    %cst_82 = arith.constant 1.000000e+00 : f32
    %168 = vector.broadcast %cst_82 : f32 to vector<8x128xf32>
    %169 = arith.addf %168, %167 : vector<8x128xf32>
    %170 = arith.divf %168, %169 : vector<8x128xf32>
    %171 = vector.extract_strided_slice %170 {offsets = [0, 0], sizes = [8, 32], strides = [1, 1]} : vector<8x128xf32> to vector<8x32xf32>
    %172 = vector.extract_strided_slice %170 {offsets = [0, 32], sizes = [8, 32], strides = [1, 1]} : vector<8x128xf32> to vector<8x32xf32>
    %173 = vector.extract_strided_slice %170 {offsets = [0, 64], sizes = [8, 32], strides = [1, 1]} : vector<8x128xf32> to vector<8x32xf32>
    %cst_83 = arith.constant 2.000000e+00 : f32
    %174 = vector.broadcast %cst_83 : f32 to vector<8x32xf32>
    %175 = arith.mulf %174, %173 : vector<8x32xf32>
    %cst_84 = arith.constant 1.000000e+00 : f32
    %176 = vector.broadcast %cst_84 : f32 to vector<8x32xf32>
    %177 = arith.subf %175, %176 : vector<8x32xf32>
    %178 = vector.extract_strided_slice %170 {offsets = [0, 96], sizes = [8, 32], strides = [1, 1]} : vector<8x128xf32> to vector<8x32xf32>
    %179 = arith.mulf %172, %159 : vector<8x32xf32>
    %180 = arith.mulf %171, %177 : vector<8x32xf32>
    %181 = arith.addf %179, %180 : vector<8x32xf32>
    %182 = math.tanh %181 : vector<8x32xf32>
    %183 = arith.mulf %178, %182 : vector<8x32xf32>
    %184 = vector.extract_strided_slice %115 {offsets = [24, 0], sizes = [8, 128], strides = [1, 1]} : vector<32x128xf32> to vector<8x128xf32>
    %185 = arith.truncf %183 : vector<8x32xf32> to vector<8x32xbf16>
    %cst_85 = arith.constant dense<0.000000e+00> : vector<8x128xf32>
    %186 = tpu.matmul %185, %110, %cst_85 {dimension_numbers = #tpu.dot_dimension_numbers<[1], [0], [0], [1], [0, 0, 1, 1], [], []>} : vector<8x32xbf16>, vector<32x128xbf16>, vector<8x128xf32> -> vector<8x128xf32>
    %187 = arith.addf %184, %186 : vector<8x128xf32>
    %188 = arith.negf %187 : vector<8x128xf32>
    %189 = math.exp %188 : vector<8x128xf32>
    %cst_86 = arith.constant 1.000000e+00 : f32
    %190 = vector.broadcast %cst_86 : f32 to vector<8x128xf32>
    %191 = arith.addf %190, %189 : vector<8x128xf32>
    %192 = arith.divf %190, %191 : vector<8x128xf32>
    %193 = vector.extract_strided_slice %192 {offsets = [0, 0], sizes = [8, 32], strides = [1, 1]} : vector<8x128xf32> to vector<8x32xf32>
    %194 = vector.extract_strided_slice %192 {offsets = [0, 32], sizes = [8, 32], strides = [1, 1]} : vector<8x128xf32> to vector<8x32xf32>
    %195 = vector.extract_strided_slice %192 {offsets = [0, 64], sizes = [8, 32], strides = [1, 1]} : vector<8x128xf32> to vector<8x32xf32>
    %cst_87 = arith.constant 2.000000e+00 : f32
    %196 = vector.broadcast %cst_87 : f32 to vector<8x32xf32>
    %197 = arith.mulf %196, %195 : vector<8x32xf32>
    %cst_88 = arith.constant 1.000000e+00 : f32
    %198 = vector.broadcast %cst_88 : f32 to vector<8x32xf32>
    %199 = arith.subf %197, %198 : vector<8x32xf32>
    %200 = vector.extract_strided_slice %192 {offsets = [0, 96], sizes = [8, 32], strides = [1, 1]} : vector<8x128xf32> to vector<8x32xf32>
    %201 = arith.mulf %194, %181 : vector<8x32xf32>
    %202 = arith.mulf %193, %199 : vector<8x32xf32>
    %203 = arith.addf %201, %202 : vector<8x32xf32>
    %204 = math.tanh %203 : vector<8x32xf32>
    %205 = arith.mulf %200, %204 : vector<8x32xf32>
    %206 = tpu.concatenate %139, %161, %183, %205 in 0 : vector<8x32xf32>, vector<8x32xf32>, vector<8x32xf32>, vector<8x32xf32> -> vector<32x32xf32>
    %207 = arith.truncf %206 : vector<32x32xf32> to vector<32x32xbf16>
    %c0_89 = arith.constant 0 : index
    %c0_90 = arith.constant 0 : index
    %c0_91 = arith.constant 0 : index
    %208 = vector.load %arg6[%c0_89, %c0_90, %c0_91] : memref<1x32x128xbf16, #tpu.memory_space<vmem>>, vector<1x32x128xbf16>
    %209 = vector.shape_cast %208 : vector<1x32x128xbf16> to vector<32x128xbf16>
    %c1_92 = arith.constant 1 : index
    %c0_93 = arith.constant 0 : index
    %c0_94 = arith.constant 0 : index
    %210 = vector.load %arg7[%c1_92, %c0_93, %c0_94] : memref<2x32x128xbf16, #tpu.memory_space<vmem>>, vector<1x32x128xbf16>
    %211 = vector.shape_cast %210 : vector<1x32x128xbf16> to vector<32x128xbf16>
    %c1_95 = arith.constant 1 : index
    %c0_96 = arith.constant 0 : index
    %c0_97 = arith.constant 0 : index
    %212 = vector.load %arg8[%c1_95, %c0_96, %c0_97] : memref<2x1x128xf32, #tpu.memory_space<vmem>>, vector<1x1x128xf32>
    %213 = vector.shape_cast %212 : vector<1x1x128xf32> to vector<1x128xf32>
    %cst_98 = arith.constant dense<0.000000e+00> : vector<32x128xf32>
    %214 = tpu.matmul %207, %209, %cst_98 {dimension_numbers = #tpu.dot_dimension_numbers<[1], [0], [0], [1], [0, 0, 1, 1], [], []>} : vector<32x32xbf16>, vector<32x128xbf16>, vector<32x128xf32> -> vector<32x128xf32>
    %215 = vector.broadcast %213 : vector<1x128xf32> to vector<32x128xf32>
    %216 = arith.addf %214, %215 : vector<32x128xf32>
    %cst_99 = arith.constant 0.000000e+00 : f32
    %217 = vector.broadcast %cst_99 : f32 to vector<8x32xf32>
    %cst_100 = arith.constant 0.000000e+00 : f32
    %218 = vector.broadcast %cst_100 : f32 to vector<8x32xf32>
    %219 = vector.extract_strided_slice %216 {offsets = [0, 0], sizes = [8, 128], strides = [1, 1]} : vector<32x128xf32> to vector<8x128xf32>
    %220 = arith.truncf %217 : vector<8x32xf32> to vector<8x32xbf16>
    %cst_101 = arith.constant dense<0.000000e+00> : vector<8x128xf32>
    %221 = tpu.matmul %220, %211, %cst_101 {dimension_numbers = #tpu.dot_dimension_numbers<[1], [0], [0], [1], [0, 0, 1, 1], [], []>} : vector<8x32xbf16>, vector<32x128xbf16>, vector<8x128xf32> -> vector<8x128xf32>
    %222 = arith.addf %219, %221 : vector<8x128xf32>
    %223 = arith.negf %222 : vector<8x128xf32>
    %224 = math.exp %223 : vector<8x128xf32>
    %cst_102 = arith.constant 1.000000e+00 : f32
    %225 = vector.broadcast %cst_102 : f32 to vector<8x128xf32>
    %226 = arith.addf %225, %224 : vector<8x128xf32>
    %227 = arith.divf %225, %226 : vector<8x128xf32>
    %228 = vector.extract_strided_slice %227 {offsets = [0, 0], sizes = [8, 32], strides = [1, 1]} : vector<8x128xf32> to vector<8x32xf32>
    %229 = vector.extract_strided_slice %227 {offsets = [0, 32], sizes = [8, 32], strides = [1, 1]} : vector<8x128xf32> to vector<8x32xf32>
    %230 = vector.extract_strided_slice %227 {offsets = [0, 64], sizes = [8, 32], strides = [1, 1]} : vector<8x128xf32> to vector<8x32xf32>
    %cst_103 = arith.constant 2.000000e+00 : f32
    %231 = vector.broadcast %cst_103 : f32 to vector<8x32xf32>
    %232 = arith.mulf %231, %230 : vector<8x32xf32>
    %cst_104 = arith.constant 1.000000e+00 : f32
    %233 = vector.broadcast %cst_104 : f32 to vector<8x32xf32>
    %234 = arith.subf %232, %233 : vector<8x32xf32>
    %235 = vector.extract_strided_slice %227 {offsets = [0, 96], sizes = [8, 32], strides = [1, 1]} : vector<8x128xf32> to vector<8x32xf32>
    %236 = arith.mulf %229, %218 : vector<8x32xf32>
    %237 = arith.mulf %228, %234 : vector<8x32xf32>
    %238 = arith.addf %236, %237 : vector<8x32xf32>
    %239 = math.tanh %238 : vector<8x32xf32>
    %240 = arith.mulf %235, %239 : vector<8x32xf32>
    %241 = vector.extract_strided_slice %216 {offsets = [8, 0], sizes = [8, 128], strides = [1, 1]} : vector<32x128xf32> to vector<8x128xf32>
    %242 = arith.truncf %240 : vector<8x32xf32> to vector<8x32xbf16>
    %cst_105 = arith.constant dense<0.000000e+00> : vector<8x128xf32>
    %243 = tpu.matmul %242, %211, %cst_105 {dimension_numbers = #tpu.dot_dimension_numbers<[1], [0], [0], [1], [0, 0, 1, 1], [], []>} : vector<8x32xbf16>, vector<32x128xbf16>, vector<8x128xf32> -> vector<8x128xf32>
    %244 = arith.addf %241, %243 : vector<8x128xf32>
    %245 = arith.negf %244 : vector<8x128xf32>
    %246 = math.exp %245 : vector<8x128xf32>
    %cst_106 = arith.constant 1.000000e+00 : f32
    %247 = vector.broadcast %cst_106 : f32 to vector<8x128xf32>
    %248 = arith.addf %247, %246 : vector<8x128xf32>
    %249 = arith.divf %247, %248 : vector<8x128xf32>
    %250 = vector.extract_strided_slice %249 {offsets = [0, 0], sizes = [8, 32], strides = [1, 1]} : vector<8x128xf32> to vector<8x32xf32>
    %251 = vector.extract_strided_slice %249 {offsets = [0, 32], sizes = [8, 32], strides = [1, 1]} : vector<8x128xf32> to vector<8x32xf32>
    %252 = vector.extract_strided_slice %249 {offsets = [0, 64], sizes = [8, 32], strides = [1, 1]} : vector<8x128xf32> to vector<8x32xf32>
    %cst_107 = arith.constant 2.000000e+00 : f32
    %253 = vector.broadcast %cst_107 : f32 to vector<8x32xf32>
    %254 = arith.mulf %253, %252 : vector<8x32xf32>
    %cst_108 = arith.constant 1.000000e+00 : f32
    %255 = vector.broadcast %cst_108 : f32 to vector<8x32xf32>
    %256 = arith.subf %254, %255 : vector<8x32xf32>
    %257 = vector.extract_strided_slice %249 {offsets = [0, 96], sizes = [8, 32], strides = [1, 1]} : vector<8x128xf32> to vector<8x32xf32>
    %258 = arith.mulf %251, %238 : vector<8x32xf32>
    %259 = arith.mulf %250, %256 : vector<8x32xf32>
    %260 = arith.addf %258, %259 : vector<8x32xf32>
    %261 = math.tanh %260 : vector<8x32xf32>
    %262 = arith.mulf %257, %261 : vector<8x32xf32>
    %263 = vector.extract_strided_slice %216 {offsets = [16, 0], sizes = [8, 128], strides = [1, 1]} : vector<32x128xf32> to vector<8x128xf32>
    %264 = arith.truncf %262 : vector<8x32xf32> to vector<8x32xbf16>
    %cst_109 = arith.constant dense<0.000000e+00> : vector<8x128xf32>
    %265 = tpu.matmul %264, %211, %cst_109 {dimension_numbers = #tpu.dot_dimension_numbers<[1], [0], [0], [1], [0, 0, 1, 1], [], []>} : vector<8x32xbf16>, vector<32x128xbf16>, vector<8x128xf32> -> vector<8x128xf32>
    %266 = arith.addf %263, %265 : vector<8x128xf32>
    %267 = arith.negf %266 : vector<8x128xf32>
    %268 = math.exp %267 : vector<8x128xf32>
    %cst_110 = arith.constant 1.000000e+00 : f32
    %269 = vector.broadcast %cst_110 : f32 to vector<8x128xf32>
    %270 = arith.addf %269, %268 : vector<8x128xf32>
    %271 = arith.divf %269, %270 : vector<8x128xf32>
    %272 = vector.extract_strided_slice %271 {offsets = [0, 0], sizes = [8, 32], strides = [1, 1]} : vector<8x128xf32> to vector<8x32xf32>
    %273 = vector.extract_strided_slice %271 {offsets = [0, 32], sizes = [8, 32], strides = [1, 1]} : vector<8x128xf32> to vector<8x32xf32>
    %274 = vector.extract_strided_slice %271 {offsets = [0, 64], sizes = [8, 32], strides = [1, 1]} : vector<8x128xf32> to vector<8x32xf32>
    %cst_111 = arith.constant 2.000000e+00 : f32
    %275 = vector.broadcast %cst_111 : f32 to vector<8x32xf32>
    %276 = arith.mulf %275, %274 : vector<8x32xf32>
    %cst_112 = arith.constant 1.000000e+00 : f32
    %277 = vector.broadcast %cst_112 : f32 to vector<8x32xf32>
    %278 = arith.subf %276, %277 : vector<8x32xf32>
    %279 = vector.extract_strided_slice %271 {offsets = [0, 96], sizes = [8, 32], strides = [1, 1]} : vector<8x128xf32> to vector<8x32xf32>
    %280 = arith.mulf %273, %260 : vector<8x32xf32>
    %281 = arith.mulf %272, %278 : vector<8x32xf32>
    %282 = arith.addf %280, %281 : vector<8x32xf32>
    %283 = math.tanh %282 : vector<8x32xf32>
    %284 = arith.mulf %279, %283 : vector<8x32xf32>
    %285 = vector.extract_strided_slice %216 {offsets = [24, 0], sizes = [8, 128], strides = [1, 1]} : vector<32x128xf32> to vector<8x128xf32>
    %286 = arith.truncf %284 : vector<8x32xf32> to vector<8x32xbf16>
    %cst_113 = arith.constant dense<0.000000e+00> : vector<8x128xf32>
    %287 = tpu.matmul %286, %211, %cst_113 {dimension_numbers = #tpu.dot_dimension_numbers<[1], [0], [0], [1], [0, 0, 1, 1], [], []>} : vector<8x32xbf16>, vector<32x128xbf16>, vector<8x128xf32> -> vector<8x128xf32>
    %288 = arith.addf %285, %287 : vector<8x128xf32>
    %289 = arith.negf %288 : vector<8x128xf32>
    %290 = math.exp %289 : vector<8x128xf32>
    %cst_114 = arith.constant 1.000000e+00 : f32
    %291 = vector.broadcast %cst_114 : f32 to vector<8x128xf32>
    %292 = arith.addf %291, %290 : vector<8x128xf32>
    %293 = arith.divf %291, %292 : vector<8x128xf32>
    %294 = vector.extract_strided_slice %293 {offsets = [0, 0], sizes = [8, 32], strides = [1, 1]} : vector<8x128xf32> to vector<8x32xf32>
    %295 = vector.extract_strided_slice %293 {offsets = [0, 32], sizes = [8, 32], strides = [1, 1]} : vector<8x128xf32> to vector<8x32xf32>
    %296 = vector.extract_strided_slice %293 {offsets = [0, 64], sizes = [8, 32], strides = [1, 1]} : vector<8x128xf32> to vector<8x32xf32>
    %cst_115 = arith.constant 2.000000e+00 : f32
    %297 = vector.broadcast %cst_115 : f32 to vector<8x32xf32>
    %298 = arith.mulf %297, %296 : vector<8x32xf32>
    %cst_116 = arith.constant 1.000000e+00 : f32
    %299 = vector.broadcast %cst_116 : f32 to vector<8x32xf32>
    %300 = arith.subf %298, %299 : vector<8x32xf32>
    %301 = vector.extract_strided_slice %293 {offsets = [0, 96], sizes = [8, 32], strides = [1, 1]} : vector<8x128xf32> to vector<8x32xf32>
    %302 = arith.mulf %295, %282 : vector<8x32xf32>
    %303 = arith.mulf %294, %300 : vector<8x32xf32>
    %304 = arith.addf %302, %303 : vector<8x32xf32>
    %305 = math.tanh %304 : vector<8x32xf32>
    %306 = arith.mulf %301, %305 : vector<8x32xf32>
    %307 = arith.truncf %306 : vector<8x32xf32> to vector<8x32xbf16>
    %c0_117 = arith.constant 0 : index
    %c0_118 = arith.constant 0 : index
    %308 = vector.load %arg9[%c0_117, %c0_118] : memref<32x2xbf16, #tpu.memory_space<vmem>>, vector<32x2xbf16>
    %cst_119 = arith.constant dense<0.000000e+00> : vector<8x2xf32>
    %309 = tpu.matmul %307, %308, %cst_119 {dimension_numbers = #tpu.dot_dimension_numbers<[1], [0], [0], [1], [0, 0, 1, 1], [], []>} : vector<8x32xbf16>, vector<32x2xbf16>, vector<8x2xf32> -> vector<8x2xf32>
    %c0_120 = arith.constant 0 : index
    %c0_121 = arith.constant 0 : index
    %310 = vector.load %arg10[%c0_120, %c0_121] : memref<1x2xf32, #tpu.memory_space<vmem>>, vector<1x2xf32>
    %311 = vector.broadcast %310 : vector<1x2xf32> to vector<8x2xf32>
    %312 = arith.addf %309, %311 : vector<8x2xf32>
    %c0_122 = arith.constant 0 : index
    %c0_123 = arith.constant 0 : index
    %313 = vector.load %arg11[%c0_122, %c0_123] : memref<8x2xf32, #tpu.memory_space<vmem>>, vector<8x2xf32>
    tpu.vector_store %arg11[%c0_122, %c0_123], %312 {strides = array<i32>} : memref<8x2xf32, #tpu.memory_space<vmem>>, vector<8x2xf32>,
    return
  }
}

</mosaic_0001>

<bundles_post_ra>
// kernel: mul.34
= control target key start
LH: loop header
LB: loop body
LE: loop exit
PB: predicated region body
PF: predicated region fallthrough
CT: control target
= control target key end

     0   :  { %vm17_vm0 = vcmask 130048   ;;  %s62_s0 = inlined_call_operand.vmem [shape: f32[3,3,16], index: 0, kind: input, shape index: {}]   ;;  %s63_s1 = inlined_call_operand.vmem [shape: f32[9,16], index: 1, kind: output, shape index: {}]  }
   0x1   :  { %v30_v0 = vld [vmem:[%s62_s0 + $0x8] sm:$0xf]  ;;  %v31_v1 = vld [vmem:[%s62_s0 + $0x4] sm:$0xf]  ;;  %v14_v2 = vld [vmem:[%s62_s0] sm:$0xf] }
   0x2   :  { %9 = vst [vmem:[#allocation0] sm:$0xf] %v30_v0  ;;  %13 = vst [vmem:[#allocation0 + $0x10] sm:$0xf] %v31_v1 }
   0x3   :  { %15 = vst [vmem:[#allocation0 + $0x8] sm:$0xf] %v14_v2 }
   0x9   :  { %v20_v4 = vld [vmem:[#allocation0 + $0x10] sm:$0x7]   ;;  %v25_v5 = vld [vmem:[#allocation0] sm:$0x7]  }
   0xa   :  { %v16_v3 = vld [vmem:[#allocation0 + $0x8] sm:$0x7]   ;;  %32 = vst.msk [vmem:[%s63_s1 + $0x3] sm:$0x7] %vm17_vm0, %v20_v4   ;;  %33 = vst.msk [vmem:[%s63_s1 + $0x6] sm:$0x7] %vm17_vm0, %v25_v5  }
   0xb   :  { %18 = vst.msk [vmem:[%s63_s1] sm:$0x7] %vm17_vm0, %v16_v3  }

// kernel: tile.13
= control target key start
LH: loop header
LB: loop body
LE: loop exit
PB: predicated region body
PF: predicated region fallthrough
CT: control target
= control target key end

     0   :  { %s22_s0 = inlined_call_operand.vmem [shape: f32[16], index: 0, kind: input, shape index: {}]   ;;  %s23_s1 = inlined_call_operand.vmem [shape: f32[8,16], index: 1, kind: output, shape index: {}]  }
   0x1   :  { %v4_v0 = vld [vmem:[%s22_s0] ss:$0 sm:$0xff] }
   0x2   :  { %5 = vst [vmem:[%s23_s1] sm:$0xff] %v4_v0 }

// kernel: tile.14
= control target key start
LH: loop header
LB: loop body
LE: loop exit
PB: predicated region body
PF: predicated region fallthrough
CT: control target
= control target key end

     0   :  { %s69_s10 = smov 112   ;;  %s70_s11 = smov 80   ;;  %vm3_vm0 = vcmask 130048   ;;  %vm9_vm1 = vcmask 1048448   ;;  %vm15_vm2 = vcmask 917248   ;;  %vm21_vm3 = vcmask 786048   ;;  %s113_s0 = inlined_call_operand.vmem [shape: f32[8,16], index: 0, kind: input, shape index: {}]   ;;  %s114_s1 = inlined_call_operand.vmem [shape: f32[1,128], index: 1, kind: output, shape index: {}]  }
   0x1   :  { %v55_v0 = vld [vmem:[%s113_s0 + $0x7] sm:$0x1]   ;;  %v57_v1 = vld [vmem:[%s113_s0 + $0x5] sm:$0x1]   ;;  %v56_v2 = vld [vmem:[%s113_s0 + $0x6] sm:$0x1]  }
   0x2   :  { %7 = vrot.lane.b32.xlu0 %v55_v0, %s69_s10  ;;  %19 = vrot.lane.b32.xlu1 %v57_v1, %s70_s11  ;;  %v58_v3 = vld [vmem:[%s113_s0 + $0x4] sm:$0x1]   ;;  %v2_v4 = vld [vmem:[%s113_s0] sm:$0x1]   ;;  %s71_s18 = smov 96   ;;  %s72_s19 = smov 64  }
   0x3   :  { %4 = vst.msk [vmem:[#allocation0] sm:$0x1] %vm3_vm0, %v2_v4   ;;  %v59_v5 = vld [vmem:[%s113_s0 + $0x3] sm:$0x1]   ;;  %v60_v6 = vld [vmem:[%s113_s0 + $0x2] sm:$0x1]  }
   0x4   :  { %s73_s24 = smov 48   ;;  %s74_s25 = smov 32   ;;  %v61_v7 = vld [vmem:[%s113_s0 + $0x1] sm:$0x1]   ;;  %vm27_vm4 = vcmask 654848   ;;  %vm33_vm5 = vcmask 523648  }
   0x5   :  { %s75_s0 = smov 16   ;;  %vm39_vm6 = vcmask 392448   ;;  %vm45_vm7 = vcmask 261248  }
   0x6   :  { %13 = vrot.lane.b32.xlu0 %v56_v2, %s71_s18  ;;  %25 = vrot.lane.b32.xlu1 %v58_v3, %s72_s19 }
   0xa   :  { %31 = vrot.lane.b32.xlu0 %v59_v5, %s73_s24  ;;  %37 = vrot.lane.b32.xlu1 %v60_v6, %s74_s25 }
   0xe   :  { %43 = vrot.lane.b32.xlu0 %v61_v7, %s75_s0 }
  0x74   :  { %v8_v8 = vpop.permute.xlu0 %7   ;;  %v20_v9 = vpop.permute.xlu1 %19  }
  0x75   :  { %10 = vst.msk [vmem:[#allocation0] sm:$0x1] %vm9_vm1, %v8_v8  }
  0x78   :  { %v14_v10 = vpop.permute.xlu0 %13   ;;  %v26_v11 = vpop.permute.xlu1 %25  }
  0x79   :  { %16 = vst.msk [vmem:[#allocation0] sm:$0x1] %vm15_vm2, %v14_v10  }
  0x7a   :  { %22 = vst.msk [vmem:[#allocation0] sm:$0x1] %vm21_vm3, %v20_v9  }
  0x7b   :  { %28 = vst.msk [vmem:[#allocation0] sm:$0x1] %vm27_vm4, %v26_v11  }
  0x7c   :  { %v32_v12 = vpop.permute.xlu0 %31   ;;  %v38_v13 = vpop.permute.xlu1 %37  }
  0x7d   :  { %34 = vst.msk [vmem:[#allocation0] sm:$0x1] %vm33_vm5, %v32_v12  }
  0x7e   :  { %40 = vst.msk [vmem:[#allocation0] sm:$0x1] %vm39_vm6, %v38_v13  }
  0x80   :  { %v44_v14 = vpop.permute.xlu0 %43  }
  0x81   :  { %46 = vst.msk [vmem:[#allocation0] sm:$0x1] %vm45_vm7, %v44_v14  }
  0x88   :  { %v51_v15 = vld [vmem:[#allocation0] sm:$0x1] }
  0x89   :  { %54 = vst [vmem:[%s114_s1] sm:$0x1] %v51_v15 }

// kernel: forward.3
= control target key start
LH: loop header
LB: loop body
LE: loop exit
PB: predicated region body
PF: predicated region fallthrough
CT: control target
= control target key end

     0   :  { %vm486_vm0 = vcmask 1043456   ;;  %v2184_v0 = vmov 0.0   ;;  %vm2185_vm1 = vmmov 0   ;;  %vm356_vm2 = vcmask 588800   ;;  %s2708_s1 = inlined_call_operand.vmem [shape: bf16[72,128], index: 1, kind: input, shape index: {}]   ;;  %s2709_s0 = inlined_call_operand.vmem [shape: bf16[676,72], index: 0, kind: input, shape index: {}]   ;;  %s2710_s2 = inlined_call_operand.vmem [shape: f32[1,128], index: 2, kind: input, shape index: {}]   ;;  %s2711_s3 = inlined_call_operand.vmem [shape: bf16[676,128], index: 3, kind: output, shape index: {}]  }
   0x1   :  { %1942 = vmatprep.subr.bf16.mxu0 %v2184_v0  ;;  %v2136_v1 = vld [vmem:[%s2708_s1 + $0x20] ss:$0 sps:$4 sm:$0xff]   ;;  %2124 = vmatprep.subr.bf16.mxu1 %v2184_v0  ;;  %v2137_v3 = vld [vmem:[%s2708_s1 + $0x18] sm:$0xff]   ;;  %v2138_v4 = vld [vmem:[%s2708_s1 + $0x10] sm:$0xff]  }
   0x2   :  { %1952 = vmatprep.mubr.msk.bf16.mxu0 %vm2185_vm1, %v2184_v0  ;;  %2040 = vmatprep.mubr.msk.bf16.mxu1 %vm2185_vm1, %v2184_v0  ;;  %v488_v2 = vsel %vm486_vm0, %v2136_v1, 0  ;;  %v2139_v5 = vld [vmem:[%s2708_s1 + $0x8] sm:$0xff]   ;;  %v2140_v6 = vld [vmem:[%s2708_s1] sm:$0xff]   ;;  %v2142_v8 = vld [vmem:[%s2709_s0 + $0xb0] sm:$0xff]  }
   0x3   :  { %1943 = vmatpush3.bf16.msra.mxu0 %v488_v2  ;;  %2129 = vmatpush3.bf16.msra.mxu1 %v488_v2  ;;  %v2141_v7 = vld [vmem:[%s2709_s0] sm:$0xff]   ;;  %v2143_v9 = vld [vmem:[%s2709_s0 + $0x8] sm:$0xff]   ;;  %v2144_v10 = vld [vmem:[%s2709_s0 + $0xb8] sm:$0xff]  }
   0x4   :  { %1944 = vmatprep.subr.bf16.mxu0 %v2184_v0  ;;  %2125 = vmatprep.subr.bf16.mxu1 %v2184_v0  ;;  %v2145_v11 = vld [vmem:[%s2709_s0 + $0x10] sm:$0xff]   ;;  %v2146_v12 = vld [vmem:[%s2709_s0 + $0xc0] sm:$0xff]   ;;  %v2147_v13 = vld [vmem:[%s2709_s0 + $0x18] sm:$0xff]  }
   0x5   :  { %v2148_v14 = vld [vmem:[%s2709_s0 + $0xc8] sm:$0xff]   ;;  %v2149_v15 = vld [vmem:[%s2709_s0 + $0x20] sm:$0xff]   ;;  %v2150_v16 = vld [vmem:[%s2709_s0 + $0xd0] sm:$0xff]  }
   0x6   :  { %v2151_v17 = vld [vmem:[%s2709_s0 + $0x28] sm:$0xff]   ;;  %v2152_v18 = vld [vmem:[%s2709_s0 + $0xd8] sm:$0xff]   ;;  %v2153_v19 = vld [vmem:[%s2709_s0 + $0x30] sm:$0xff]  }
   0x7   :  { %1945 = vmatpush3.bf16.msra.mxu0 %v2137_v3  ;;  %2130 = vmatpush3.bf16.msra.mxu1 %v2137_v3  ;;  %v2154_v20 = vld [vmem:[%s2709_s0 + $0xe0] sm:$0xff]   ;;  %v2155_v21 = vld [vmem:[%s2709_s0 + $0x38] sm:$0xff]   ;;  %v2156_v22 = vld [vmem:[%s2709_s0 + $0xe8] sm:$0xff]  }
   0x8   :  { %1946 = vmatprep.subr.bf16.mxu0 %v2184_v0  ;;  %2126 = vmatprep.subr.bf16.mxu1 %v2184_v0  ;;  %v2157_v23 = vld [vmem:[%s2709_s0 + $0x40] sm:$0xff]   ;;  %v2158_v24 = vld [vmem:[%s2709_s0 + $0xf0] sm:$0xff]   ;;  %v2159_v25 = vld [vmem:[%s2709_s0 + $0x48] sm:$0xff]  }
   0x9   :  { %v2160_v26 = vld [vmem:[%s2709_s0 + $0xf8] sm:$0xff]   ;;  %v2161_v27 = vld [vmem:[%s2709_s0 + $0x50] sm:$0xff]   ;;  %v2162_v28 = vld [vmem:[%s2709_s0 + $0x100] sm:$0xff]  }
   0xa   :  { %v2163_v29 = vld [vmem:[%s2709_s0 + $0x58] sm:$0xff]   ;;  %v2164_v30 = vld [vmem:[%s2709_s0 + $0x108] sm:$0xff]   ;;  %v2165_v31 = vld [vmem:[%s2709_s0 + $0x60] sm:$0xff]  }
   0xb   :  { %1947 = vmatpush3.bf16.msra.mxu0 %v2138_v4  ;;  %2131 = vmatpush3.bf16.msra.mxu1 %v2138_v4  ;;  %v2166_v32 = vld [vmem:[%s2709_s0 + $0x110] sm:$0xff]   ;;  %v2167_v33 = vld [vmem:[%s2709_s0 + $0x68] sm:$0xff]   ;;  %v2168_v34 = vld [vmem:[%s2709_s0 + $0x118] sm:$0xff]  }
   0xc   :  { %1948 = vmatprep.subr.bf16.mxu0 %v2184_v0  ;;  %2127 = vmatprep.subr.bf16.mxu1 %v2184_v0  ;;  %v2169_v35 = vld [vmem:[%s2709_s0 + $0x70] sm:$0xff]   ;;  %v2170_v36 = vld [vmem:[%s2709_s0 + $0x120] sm:$0xff]   ;;  %v2171_v37 = vld [vmem:[%s2709_s0 + $0x78] sm:$0xff]  }
   0xd   :  { %v2172_v38 = vld [vmem:[%s2709_s0 + $0x128] sm:$0xff]   ;;  %v2173_v39 = vld [vmem:[%s2709_s0 + $0x80] sm:$0xff]   ;;  %v2174_v40 = vld [vmem:[%s2709_s0 + $0x130] sm:$0xff]  }
   0xe   :  { %v2175_v41 = vld [vmem:[%s2709_s0 + $0x88] sm:$0xff]   ;;  %v2176_v42 = vld [vmem:[%s2709_s0 + $0x138] sm:$0xff]   ;;  %v2177_v43 = vld [vmem:[%s2709_s0 + $0x90] sm:$0xff]  }
   0xf   :  { %1949 = vmatpush3.bf16.msra.mxu0 %v2139_v5  ;;  %2132 = vmatpush3.bf16.msra.mxu1 %v2139_v5  ;;  %v2178_v44 = vld [vmem:[%s2709_s0 + $0x140] sm:$0xff]   ;;  %v2179_v45 = vld [vmem:[%s2709_s0 + $0x98] sm:$0xff]   ;;  %v2180_v46 = vld [vmem:[%s2709_s0 + $0x148] sm:$0xff]  }
  0x10   :  { %1950 = vmatprep.subr.bf16.mxu0 %v2184_v0  ;;  %2128 = vmatprep.subr.bf16.mxu1 %v2184_v0  ;;  %v2181_v47 = vld [vmem:[%s2709_s0 + $0xa0] sm:$0xff]   ;;  %v2182_v48 = vld [vmem:[%s2709_s0 + $0x150] ss:$0 sps:$4 sm:$0x33]   ;;  %v2183_v49 = vld [vmem:[%s2709_s0 + $0xa8] sm:$0xff]  }
  0x11   :  { %v2492_v50 = vld [vmem:[%s2710_s2] ss:$0 sm:$0xff] }
  0x13   :  { %1951 = vmatpush3.bf16.msra.mxu0 %v2140_v6  ;;  %2133 = vmatpush3.bf16.msra.mxu1 %v2140_v6 }
  0x16   :  { %1953 = vmatmul.mubr.msk.bf16.vlgmr.msra.gmra.mxu0 %vm356_vm2, %v2141_v7  ;;  %2041 = vmatmul.mubr.msk.bf16.vlgmr.msra.gmra.mxu1 %vm356_vm2, %v2142_v8 }
  0x17   :  { %1956 = vmatprep.mubr.msk.bf16.mxu0 %vm2185_vm1, %v2184_v0  ;;  %2044 = vmatprep.mubr.msk.bf16.mxu1 %vm2185_vm1, %v2184_v0 }
  0x1e   :  { %1957 = vmatmul.mubr.msk.bf16.gmra.mxu0 %vm356_vm2, %v2143_v9  ;;  %2045 = vmatmul.mubr.msk.bf16.gmra.mxu1 %vm356_vm2, %v2144_v10 }
  0x1f   :  { %1960 = vmatprep.mubr.msk.bf16.mxu0 %vm2185_vm1, %v2184_v0  ;;  %2048 = vmatprep.mubr.msk.bf16.mxu1 %vm2185_vm1, %v2184_v0 }
  0x26   :  { %1961 = vmatmul.mubr.msk.bf16.gmra.mxu0 %vm356_vm2, %v2145_v11  ;;  %2049 = vmatmul.mubr.msk.bf16.gmra.mxu1 %vm356_vm2, %v2146_v12 }
  0x27   :  { %1964 = vmatprep.mubr.msk.bf16.mxu0 %vm2185_vm1, %v2184_v0  ;;  %2052 = vmatprep.mubr.msk.bf16.mxu1 %vm2185_vm1, %v2184_v0 }
  0x2e   :  { %1965 = vmatmul.mubr.msk.bf16.gmra.mxu0 %vm356_vm2, %v2147_v13  ;;  %2053 = vmatmul.mubr.msk.bf16.gmra.mxu1 %vm356_vm2, %v2148_v14 }
  0x2f   :  { %1968 = vmatprep.mubr.msk.bf16.mxu0 %vm2185_vm1, %v2184_v0  ;;  %2056 = vmatprep.mubr.msk.bf16.mxu1 %vm2185_vm1, %v2184_v0 }
  0x36   :  { %1969 = vmatmul.mubr.msk.bf16.gmra.mxu0 %vm356_vm2, %v2149_v15  ;;  %2057 = vmatmul.mubr.msk.bf16.gmra.mxu1 %vm356_vm2, %v2150_v16 }
  0x37   :  { %1972 = vmatprep.mubr.msk.bf16.mxu0 %vm2185_vm1, %v2184_v0  ;;  %2060 = vmatprep.mubr.msk.bf16.mxu1 %vm2185_vm1, %v2184_v0 }
  0x3e   :  { %1973 = vmatmul.mubr.msk.bf16.gmra.mxu0 %vm356_vm2, %v2151_v17  ;;  %2061 = vmatmul.mubr.msk.bf16.gmra.mxu1 %vm356_vm2, %v2152_v18 }
  0x3f   :  { %1976 = vmatprep.mubr.msk.bf16.mxu0 %vm2185_vm1, %v2184_v0  ;;  %2064 = vmatprep.mubr.msk.bf16.mxu1 %vm2185_vm1, %v2184_v0 }
  0x46   :  { %1977 = vmatmul.mubr.msk.bf16.gmra.mxu0 %vm356_vm2, %v2153_v19  ;;  %2065 = vmatmul.mubr.msk.bf16.gmra.mxu1 %vm356_vm2, %v2154_v20 }
  0x47   :  { %1980 = vmatprep.mubr.msk.bf16.mxu0 %vm2185_vm1, %v2184_v0  ;;  %2068 = vmatprep.mubr.msk.bf16.mxu1 %vm2185_vm1, %v2184_v0 }
  0x4e   :  { %1981 = vmatmul.mubr.msk.bf16.gmra.mxu0 %vm356_vm2, %v2155_v21  ;;  %2069 = vmatmul.mubr.msk.bf16.gmra.mxu1 %vm356_vm2, %v2156_v22 }
  0x4f   :  { %1984 = vmatprep.mubr.msk.bf16.mxu0 %vm2185_vm1, %v2184_v0  ;;  %2072 = vmatprep.mubr.msk.bf16.mxu1 %vm2185_vm1, %v2184_v0 }
  0x56   :  { %1985 = vmatmul.mubr.msk.bf16.gmra.mxu0 %vm356_vm2, %v2157_v23  ;;  %2073 = vmatmul.mubr.msk.bf16.gmra.mxu1 %vm356_vm2, %v2158_v24 }
  0x57   :  { %1988 = vmatprep.mubr.msk.bf16.mxu0 %vm2185_vm1, %v2184_v0  ;;  %2076 = vmatprep.mubr.msk.bf16.mxu1 %vm2185_vm1, %v2184_v0 }
  0x5e   :  { %1989 = vmatmul.mubr.msk.bf16.gmra.mxu0 %vm356_vm2, %v2159_v25  ;;  %2077 = vmatmul.mubr.msk.bf16.gmra.mxu1 %vm356_vm2, %v2160_v26 }
  0x5f   :  { %1992 = vmatprep.mubr.msk.bf16.mxu0 %vm2185_vm1, %v2184_v0  ;;  %2080 = vmatprep.mubr.msk.bf16.mxu1 %vm2185_vm1, %v2184_v0 }
  0x66   :  { %1993 = vmatmul.mubr.msk.bf16.gmra.mxu0 %vm356_vm2, %v2161_v27  ;;  %2081 = vmatmul.mubr.msk.bf16.gmra.mxu1 %vm356_vm2, %v2162_v28 }
  0x67   :  { %1996 = vmatprep.mubr.msk.bf16.mxu0 %vm2185_vm1, %v2184_v0  ;;  %2084 = vmatprep.mubr.msk.bf16.mxu1 %vm2185_vm1, %v2184_v0 }
  0x6e   :  { %1997 = vmatmul.mubr.msk.bf16.gmra.mxu0 %vm356_vm2, %v2163_v29  ;;  %2085 = vmatmul.mubr.msk.bf16.gmra.mxu1 %vm356_vm2, %v2164_v30 }
  0x6f   :  { %2000 = vmatprep.mubr.msk.bf16.mxu0 %vm2185_vm1, %v2184_v0  ;;  %2088 = vmatprep.mubr.msk.bf16.mxu1 %vm2185_vm1, %v2184_v0 }
  0x76   :  { %2001 = vmatmul.mubr.msk.bf16.gmra.mxu0 %vm356_vm2, %v2165_v31  ;;  %2089 = vmatmul.mubr.msk.bf16.gmra.mxu1 %vm356_vm2, %v2166_v32 }
  0x77   :  { %2004 = vmatprep.mubr.msk.bf16.mxu0 %vm2185_vm1, %v2184_v0  ;;  %2092 = vmatprep.mubr.msk.bf16.mxu1 %vm2185_vm1, %v2184_v0 }
  0x7e   :  { %2005 = vmatmul.mubr.msk.bf16.gmra.mxu0 %vm356_vm2, %v2167_v33  ;;  %2093 = vmatmul.mubr.msk.bf16.gmra.mxu1 %vm356_vm2, %v2168_v34 }
  0x7f   :  { %2008 = vmatprep.mubr.msk.bf16.mxu0 %vm2185_vm1, %v2184_v0  ;;  %2096 = vmatprep.mubr.msk.bf16.mxu1 %vm2185_vm1, %v2184_v0 }
  0x86   :  { %2009 = vmatmul.mubr.msk.bf16.gmra.mxu0 %vm356_vm2, %v2169_v35  ;;  %2097 = vmatmul.mubr.msk.bf16.gmra.mxu1 %vm356_vm2, %v2170_v36 }
  0x87   :  { %2012 = vmatprep.mubr.msk.bf16.mxu0 %vm2185_vm1, %v2184_v0  ;;  %2100 = vmatprep.mubr.msk.bf16.mxu1 %vm2185_vm1, %v2184_v0 }
  0x8e   :  { %2013 = vmatmul.mubr.msk.bf16.gmra.mxu0 %vm356_vm2, %v2171_v37  ;;  %2101 = vmatmul.mubr.msk.bf16.gmra.mxu1 %vm356_vm2, %v2172_v38 }
  0x8f   :  { %2016 = vmatprep.mubr.msk.bf16.mxu0 %vm2185_vm1, %v2184_v0  ;;  %2104 = vmatprep.mubr.msk.bf16.mxu1 %vm2185_vm1, %v2184_v0 }
  0x96   :  { %2017 = vmatmul.mubr.msk.bf16.gmra.mxu0 %vm356_vm2, %v2173_v39  ;;  %2105 = vmatmul.mubr.msk.bf16.gmra.mxu1 %vm356_vm2, %v2174_v40 }
  0x97   :  { %2020 = vmatprep.mubr.msk.bf16.mxu0 %vm2185_vm1, %v2184_v0  ;;  %2108 = vmatprep.mubr.msk.bf16.mxu1 %vm2185_vm1, %v2184_v0 }
  0x9e   :  { %2021 = vmatmul.mubr.msk.bf16.gmra.mxu0 %vm356_vm2, %v2175_v41  ;;  %2109 = vmatmul.mubr.msk.bf16.gmra.mxu1 %vm356_vm2, %v2176_v42 }
  0x9f   :  { %2024 = vmatprep.mubr.msk.bf16.mxu0 %vm2185_vm1, %v2184_v0  ;;  %2112 = vmatprep.mubr.msk.bf16.mxu1 %vm2185_vm1, %v2184_v0 }
  0xa6   :  { %2025 = vmatmul.mubr.msk.bf16.gmra.mxu0 %vm356_vm2, %v2177_v43  ;;  %2113 = vmatmul.mubr.msk.bf16.gmra.mxu1 %vm356_vm2, %v2178_v44 }
  0xa7   :  { %2028 = vmatprep.mubr.msk.bf16.mxu0 %vm2185_vm1, %v2184_v0  ;;  %2116 = vmatprep.mubr.msk.bf16.mxu1 %vm2185_vm1, %v2184_v0 }
  0xae   :  { %2029 = vmatmul.mubr.msk.bf16.gmra.mxu0 %vm356_vm2, %v2179_v45  ;;  %2117 = vmatmul.mubr.msk.bf16.gmra.mxu1 %vm356_vm2, %v2180_v46 }
  0xaf   :  { %2032 = vmatprep.mubr.msk.bf16.mxu0 %vm2185_vm1, %v2184_v0  ;;  %2120 = vmatprep.mubr.msk.bf16.mxu1 %vm2185_vm1, %v2184_v0 }
  0xb6   :  { %2033 = vmatmul.mubr.msk.bf16.gmra.mxu0 %vm356_vm2, %v2181_v47  ;;  %2121 = vmatmul.mubr.msk.bf16.gmra.mxu1 %vm356_vm2, %v2182_v48 }
  0xb7   :  { %2036 = vmatprep.mubr.msk.bf16.mxu0 %vm2185_vm1, %v2184_v0 }
  0xbe   :  { %2037 = vmatmul.mubr.msk.bf16.gmra.mxu0 %vm356_vm2, %v2183_v49 }
  0xd6   :  { %v524_v51 = vpop.f32.mrf.mxu0  ;;  %v700_v52 = vpop.f32.mrf.mxu1 }
  0xd7   :  { %v701_v53 = vadd.f32 %v2492_v50, %v700_v52  ;;  %v525_v56 = vadd.f32 %v2492_v50, %v524_v51 }
  0xd8   :  { %v1954_v54 = vpop.f32.mrf.mxu0  ;;  %v2042_v55 = vpop.f32.mrf.mxu1 }
  0xd9   :  { %v910_v60 = vmax.f32 %v701_v53, 0.0  ;;  %v866_v0 = vmax.f32 %v525_v56, 0.0 }
  0xda   :  { %v527_v57 = vpop.f32.mrf.mxu0  ;;  %v703_v58 = vpop.f32.mrf.mxu1 }
  0xdb   :  { %v528_v59 = vadd.f32 %v2492_v50, %v527_v57  ;;  %v704_v61 = vadd.f32 %v2492_v50, %v703_v58 }
  0xdc   :  { %v1955_v62 = vpop.f32.mrf.mxu0  ;;  %v2043_v63 = vpop.f32.mrf.mxu1 }
  0xdd   :  { %v867_v1 = vmax.f32 %v528_v59, 0.0  ;;  %v911_v2 = vmax.f32 %v704_v61, 0.0 }
  0xde   :  { %v532_v3 = vpop.f32.mrf.mxu0  ;;  %v708_v4 = vpop.f32.mrf.mxu1 }
  0xdf   :  { %v1646_v5 = vpack.c.bf16 %v867_v1, %v866_v0  ;;  %v1756_v6 = vpack.c.bf16 %v911_v2, %v910_v60  ;;  %v709_v7 = vadd.f32 %v2492_v50, %v708_v4  ;;  %v533_v10 = vadd.f32 %v2492_v50, %v532_v3 }
  0xe0   :  { %v1958_v8 = vpop.f32.mrf.mxu0  ;;  %v2046_v9 = vpop.f32.mrf.mxu1 }
  0xe1   :  { %1647 = vst [vmem:[%s2711_s3] sm:$0xff] %v1646_v5   ;;  %1874 = vst [vmem:[%s2711_s3 + $0xb0] sm:$0xff] %v1756_v6   ;;  %v912_v14 = vmax.f32 %v709_v7, 0.0  ;;  %v868_v18 = vmax.f32 %v533_v10, 0.0 }
  0xe2   :  { %v535_v11 = vpop.f32.mrf.mxu0  ;;  %v711_v12 = vpop.f32.mrf.mxu1 }
  0xe3   :  { %v536_v13 = vadd.f32 %v2492_v50, %v535_v11  ;;  %v712_v15 = vadd.f32 %v2492_v50, %v711_v12 }
  0xe4   :  { %v1959_v16 = vpop.f32.mrf.mxu0  ;;  %v2047_v17 = vpop.f32.mrf.mxu1 }
  0xe5   :  { %v869_v19 = vmax.f32 %v536_v13, 0.0  ;;  %v913_v20 = vmax.f32 %v712_v15, 0.0 }
  0xe6   :  { %v540_v21 = vpop.f32.mrf.mxu0  ;;  %v716_v22 = vpop.f32.mrf.mxu1 }
  0xe7   :  { %v1651_v23 = vpack.c.bf16 %v869_v19, %v868_v18  ;;  %v1761_v24 = vpack.c.bf16 %v913_v20, %v912_v14  ;;  %v717_v25 = vadd.f32 %v2492_v50, %v716_v22  ;;  %v541_v28 = vadd.f32 %v2492_v50, %v540_v21 }
  0xe8   :  { %v1962_v26 = vpop.f32.mrf.mxu0  ;;  %v2050_v27 = vpop.f32.mrf.mxu1 }
  0xe9   :  { %1853 = vst [vmem:[%s2711_s3 + $0x8] sm:$0xff] %v1651_v23   ;;  %1875 = vst [vmem:[%s2711_s3 + $0xb8] sm:$0xff] %v1761_v24   ;;  %v914_v32 = vmax.f32 %v717_v25, 0.0  ;;  %v870_v36 = vmax.f32 %v541_v28, 0.0 }
  0xea   :  { %v543_v29 = vpop.f32.mrf.mxu0  ;;  %v719_v30 = vpop.f32.mrf.mxu1 }
  0xeb   :  { %v544_v31 = vadd.f32 %v2492_v50, %v543_v29  ;;  %v720_v33 = vadd.f32 %v2492_v50, %v719_v30 }
  0xec   :  { %v1963_v34 = vpop.f32.mrf.mxu0  ;;  %v2051_v35 = vpop.f32.mrf.mxu1 }
  0xed   :  { %v871_v37 = vmax.f32 %v544_v31, 0.0  ;;  %v915_v38 = vmax.f32 %v720_v33, 0.0 }
  0xee   :  { %v548_v39 = vpop.f32.mrf.mxu0  ;;  %v724_v40 = vpop.f32.mrf.mxu1 }
  0xef   :  { %v1656_v41 = vpack.c.bf16 %v871_v37, %v870_v36  ;;  %v1766_v42 = vpack.c.bf16 %v915_v38, %v914_v32  ;;  %v725_v43 = vadd.f32 %v2492_v50, %v724_v40  ;;  %v549_v46 = vadd.f32 %v2492_v50, %v548_v39 }
  0xf0   :  { %v1966_v44 = vpop.f32.mrf.mxu0  ;;  %v2054_v45 = vpop.f32.mrf.mxu1 }
  0xf1   :  { %1854 = vst [vmem:[%s2711_s3 + $0x10] sm:$0xff] %v1656_v41   ;;  %1876 = vst [vmem:[%s2711_s3 + $0xc0] sm:$0xff] %v1766_v42   ;;  %v916_v51 = vmax.f32 %v725_v43, 0.0  ;;  %v872_v55 = vmax.f32 %v549_v46, 0.0 }
  0xf2   :  { %v551_v47 = vpop.f32.mrf.mxu0  ;;  %v727_v48 = vpop.f32.mrf.mxu1 }
  0xf3   :  { %v552_v49 = vadd.f32 %v2492_v50, %v551_v47  ;;  %v728_v52 = vadd.f32 %v2492_v50, %v727_v48 }
  0xf4   :  { %v1967_v53 = vpop.f32.mrf.mxu0  ;;  %v2055_v54 = vpop.f32.mrf.mxu1 }
  0xf5   :  { %v873_v56 = vmax.f32 %v552_v49, 0.0  ;;  %v917_v57 = vmax.f32 %v728_v52, 0.0 }
  0xf6   :  { %v556_v58 = vpop.f32.mrf.mxu0  ;;  %v732_v59 = vpop.f32.mrf.mxu1 }
  0xf7   :  { %v1661_v60 = vpack.c.bf16 %v873_v56, %v872_v55  ;;  %v1771_v61 = vpack.c.bf16 %v917_v57, %v916_v51  ;;  %v733_v62 = vadd.f32 %v2492_v50, %v732_v59  ;;  %v557_v1 = vadd.f32 %v2492_v50, %v556_v58 }
  0xf8   :  { %v1970_v63 = vpop.f32.mrf.mxu0  ;;  %v2058_v0 = vpop.f32.mrf.mxu1 }
  0xf9   :  { %1855 = vst [vmem:[%s2711_s3 + $0x18] sm:$0xff] %v1661_v60   ;;  %1877 = vst [vmem:[%s2711_s3 + $0xc8] sm:$0xff] %v1771_v61   ;;  %v918_v5 = vmax.f32 %v733_v62, 0.0  ;;  %v874_v9 = vmax.f32 %v557_v1, 0.0 }
  0xfa   :  { %v559_v2 = vpop.f32.mrf.mxu0  ;;  %v735_v3 = vpop.f32.mrf.mxu1 }
  0xfb   :  { %v560_v4 = vadd.f32 %v2492_v50, %v559_v2  ;;  %v736_v6 = vadd.f32 %v2492_v50, %v735_v3 }
  0xfc   :  { %v1971_v7 = vpop.f32.mrf.mxu0  ;;  %v2059_v8 = vpop.f32.mrf.mxu1 }
  0xfd   :  { %v875_v10 = vmax.f32 %v560_v4, 0.0  ;;  %v919_v11 = vmax.f32 %v736_v6, 0.0 }
  0xfe   :  { %v564_v12 = vpop.f32.mrf.mxu0  ;;  %v740_v13 = vpop.f32.mrf.mxu1 }
  0xff   :  { %v1666_v14 = vpack.c.bf16 %v875_v10, %v874_v9  ;;  %v1776_v15 = vpack.c.bf16 %v919_v11, %v918_v5  ;;  %v741_v16 = vadd.f32 %v2492_v50, %v740_v13  ;;  %v565_v19 = vadd.f32 %v2492_v50, %v564_v12 }
 0x100   :  { %v1974_v17 = vpop.f32.mrf.mxu0  ;;  %v2062_v18 = vpop.f32.mrf.mxu1 }
 0x101   :  { %1856 = vst [vmem:[%s2711_s3 + $0x20] sm:$0xff] %v1666_v14   ;;  %1878 = vst [vmem:[%s2711_s3 + $0xd0] sm:$0xff] %v1776_v15   ;;  %v920_v23 = vmax.f32 %v741_v16, 0.0  ;;  %v876_v27 = vmax.f32 %v565_v19, 0.0 }
 0x102   :  { %v567_v20 = vpop.f32.mrf.mxu0  ;;  %v743_v21 = vpop.f32.mrf.mxu1 }
 0x103   :  { %v568_v22 = vadd.f32 %v2492_v50, %v567_v20  ;;  %v744_v24 = vadd.f32 %v2492_v50, %v743_v21 }
 0x104   :  { %v1975_v25 = vpop.f32.mrf.mxu0  ;;  %v2063_v26 = vpop.f32.mrf.mxu1 }
 0x105   :  { %v877_v28 = vmax.f32 %v568_v22, 0.0  ;;  %v921_v29 = vmax.f32 %v744_v24, 0.0 }
 0x106   :  { %v572_v30 = vpop.f32.mrf.mxu0  ;;  %v748_v31 = vpop.f32.mrf.mxu1 }
 0x107   :  { %v1671_v32 = vpack.c.bf16 %v877_v28, %v876_v27  ;;  %v1781_v33 = vpack.c.bf16 %v921_v29, %v920_v23  ;;  %v749_v34 = vadd.f32 %v2492_v50, %v748_v31  ;;  %v573_v37 = vadd.f32 %v2492_v50, %v572_v30 }
 0x108   :  { %v1978_v35 = vpop.f32.mrf.mxu0  ;;  %v2066_v36 = vpop.f32.mrf.mxu1 }
 0x109   :  { %1857 = vst [vmem:[%s2711_s3 + $0x28] sm:$0xff] %v1671_v32   ;;  %1879 = vst [vmem:[%s2711_s3 + $0xd8] sm:$0xff] %v1781_v33   ;;  %v922_v41 = vmax.f32 %v749_v34, 0.0  ;;  %v878_v45 = vmax.f32 %v573_v37, 0.0 }
 0x10a   :  { %v575_v38 = vpop.f32.mrf.mxu0  ;;  %v751_v39 = vpop.f32.mrf.mxu1 }
 0x10b   :  { %v576_v40 = vadd.f32 %v2492_v50, %v575_v38  ;;  %v752_v42 = vadd.f32 %v2492_v50, %v751_v39 }
 0x10c   :  { %v1979_v43 = vpop.f32.mrf.mxu0  ;;  %v2067_v44 = vpop.f32.mrf.mxu1 }
 0x10d   :  { %v879_v46 = vmax.f32 %v576_v40, 0.0  ;;  %v923_v47 = vmax.f32 %v752_v42, 0.0 }
 0x10e   :  { %v580_v48 = vpop.f32.mrf.mxu0  ;;  %v756_v49 = vpop.f32.mrf.mxu1 }
 0x10f   :  { %v1676_v51 = vpack.c.bf16 %v879_v46, %v878_v45  ;;  %v1786_v52 = vpack.c.bf16 %v923_v47, %v922_v41  ;;  %v757_v53 = vadd.f32 %v2492_v50, %v756_v49  ;;  %v581_v56 = vadd.f32 %v2492_v50, %v580_v48 }
 0x110   :  { %v1982_v54 = vpop.f32.mrf.mxu0  ;;  %v2070_v55 = vpop.f32.mrf.mxu1 }
 0x111   :  { %1858 = vst [vmem:[%s2711_s3 + $0x30] sm:$0xff] %v1676_v51   ;;  %1880 = vst [vmem:[%s2711_s3 + $0xe0] sm:$0xff] %v1786_v52   ;;  %v924_v60 = vmax.f32 %v757_v53, 0.0  ;;  %v880_v0 = vmax.f32 %v581_v56, 0.0 }
 0x112   :  { %v583_v57 = vpop.f32.mrf.mxu0  ;;  %v759_v58 = vpop.f32.mrf.mxu1 }
 0x113   :  { %v584_v59 = vadd.f32 %v2492_v50, %v583_v57  ;;  %v760_v61 = vadd.f32 %v2492_v50, %v759_v58 }
 0x114   :  { %v1983_v62 = vpop.f32.mrf.mxu0  ;;  %v2071_v63 = vpop.f32.mrf.mxu1 }
 0x115   :  { %v881_v1 = vmax.f32 %v584_v59, 0.0  ;;  %v925_v2 = vmax.f32 %v760_v61, 0.0 }
 0x116   :  { %v588_v3 = vpop.f32.mrf.mxu0  ;;  %v764_v4 = vpop.f32.mrf.mxu1 }
 0x117   :  { %v1681_v5 = vpack.c.bf16 %v881_v1, %v880_v0  ;;  %v1791_v6 = vpack.c.bf16 %v925_v2, %v924_v60  ;;  %v765_v7 = vadd.f32 %v2492_v50, %v764_v4  ;;  %v589_v10 = vadd.f32 %v2492_v50, %v588_v3 }
 0x118   :  { %v1986_v8 = vpop.f32.mrf.mxu0  ;;  %v2074_v9 = vpop.f32.mrf.mxu1 }
 0x119   :  { %1859 = vst [vmem:[%s2711_s3 + $0x38] sm:$0xff] %v1681_v5   ;;  %1881 = vst [vmem:[%s2711_s3 + $0xe8] sm:$0xff] %v1791_v6   ;;  %v926_v14 = vmax.f32 %v765_v7, 0.0  ;;  %v882_v18 = vmax.f32 %v589_v10, 0.0 }
 0x11a   :  { %v591_v11 = vpop.f32.mrf.mxu0  ;;  %v767_v12 = vpop.f32.mrf.mxu1 }
 0x11b   :  { %v592_v13 = vadd.f32 %v2492_v50, %v591_v11  ;;  %v768_v15 = vadd.f32 %v2492_v50, %v767_v12 }
 0x11c   :  { %v1987_v16 = vpop.f32.mrf.mxu0  ;;  %v2075_v17 = vpop.f32.mrf.mxu1 }
 0x11d   :  { %v883_v19 = vmax.f32 %v592_v13, 0.0  ;;  %v927_v20 = vmax.f32 %v768_v15, 0.0 }
 0x11e   :  { %v596_v21 = vpop.f32.mrf.mxu0  ;;  %v772_v22 = vpop.f32.mrf.mxu1 }
 0x11f   :  { %v1686_v23 = vpack.c.bf16 %v883_v19, %v882_v18  ;;  %v1796_v24 = vpack.c.bf16 %v927_v20, %v926_v14  ;;  %v773_v25 = vadd.f32 %v2492_v50, %v772_v22  ;;  %v597_v28 = vadd.f32 %v2492_v50, %v596_v21 }
 0x120   :  { %v1990_v26 = vpop.f32.mrf.mxu0  ;;  %v2078_v27 = vpop.f32.mrf.mxu1 }
 0x121   :  { %1860 = vst [vmem:[%s2711_s3 + $0x40] sm:$0xff] %v1686_v23   ;;  %1882 = vst [vmem:[%s2711_s3 + $0xf0] sm:$0xff] %v1796_v24   ;;  %v928_v32 = vmax.f32 %v773_v25, 0.0  ;;  %v884_v36 = vmax.f32 %v597_v28, 0.0 }
 0x122   :  { %v599_v29 = vpop.f32.mrf.mxu0  ;;  %v775_v30 = vpop.f32.mrf.mxu1 }
 0x123   :  { %v600_v31 = vadd.f32 %v2492_v50, %v599_v29  ;;  %v776_v33 = vadd.f32 %v2492_v50, %v775_v30 }
 0x124   :  { %v1991_v34 = vpop.f32.mrf.mxu0  ;;  %v2079_v35 = vpop.f32.mrf.mxu1 }
 0x125   :  { %v885_v37 = vmax.f32 %v600_v31, 0.0  ;;  %v929_v38 = vmax.f32 %v776_v33, 0.0 }
 0x126   :  { %v604_v39 = vpop.f32.mrf.mxu0  ;;  %v780_v40 = vpop.f32.mrf.mxu1 }
 0x127   :  { %v1691_v41 = vpack.c.bf16 %v885_v37, %v884_v36  ;;  %v1801_v42 = vpack.c.bf16 %v929_v38, %v928_v32  ;;  %v781_v43 = vadd.f32 %v2492_v50, %v780_v40  ;;  %v605_v46 = vadd.f32 %v2492_v50, %v604_v39 }
 0x128   :  { %v1994_v44 = vpop.f32.mrf.mxu0  ;;  %v2082_v45 = vpop.f32.mrf.mxu1 }
 0x129   :  { %1861 = vst [vmem:[%s2711_s3 + $0x48] sm:$0xff] %v1691_v41   ;;  %1883 = vst [vmem:[%s2711_s3 + $0xf8] sm:$0xff] %v1801_v42   ;;  %v930_v51 = vmax.f32 %v781_v43, 0.0  ;;  %v886_v55 = vmax.f32 %v605_v46, 0.0 }
 0x12a   :  { %v607_v47 = vpop.f32.mrf.mxu0  ;;  %v783_v48 = vpop.f32.mrf.mxu1 }
 0x12b   :  { %v608_v49 = vadd.f32 %v2492_v50, %v607_v47  ;;  %v784_v52 = vadd.f32 %v2492_v50, %v783_v48 }
 0x12c   :  { %v1995_v53 = vpop.f32.mrf.mxu0  ;;  %v2083_v54 = vpop.f32.mrf.mxu1 }
 0x12d   :  { %v887_v56 = vmax.f32 %v608_v49, 0.0  ;;  %v931_v57 = vmax.f32 %v784_v52, 0.0 }
 0x12e   :  { %v612_v58 = vpop.f32.mrf.mxu0  ;;  %v788_v59 = vpop.f32.mrf.mxu1 }
 0x12f   :  { %v1696_v60 = vpack.c.bf16 %v887_v56, %v886_v55  ;;  %v1806_v61 = vpack.c.bf16 %v931_v57, %v930_v51  ;;  %v789_v62 = vadd.f32 %v2492_v50, %v788_v59  ;;  %v613_v1 = vadd.f32 %v2492_v50, %v612_v58 }
 0x130   :  { %v1998_v63 = vpop.f32.mrf.mxu0  ;;  %v2086_v0 = vpop.f32.mrf.mxu1 }
 0x131   :  { %1862 = vst [vmem:[%s2711_s3 + $0x50] sm:$0xff] %v1696_v60   ;;  %1884 = vst [vmem:[%s2711_s3 + $0x100] sm:$0xff] %v1806_v61   ;;  %v932_v5 = vmax.f32 %v789_v62, 0.0  ;;  %v888_v9 = vmax.f32 %v613_v1, 0.0 }
 0x132   :  { %v615_v2 = vpop.f32.mrf.mxu0  ;;  %v791_v3 = vpop.f32.mrf.mxu1 }
 0x133   :  { %v616_v4 = vadd.f32 %v2492_v50, %v615_v2  ;;  %v792_v6 = vadd.f32 %v2492_v50, %v791_v3 }
 0x134   :  { %v1999_v7 = vpop.f32.mrf.mxu0  ;;  %v2087_v8 = vpop.f32.mrf.mxu1 }
 0x135   :  { %v889_v10 = vmax.f32 %v616_v4, 0.0  ;;  %v933_v11 = vmax.f32 %v792_v6, 0.0 }
 0x136   :  { %v620_v12 = vpop.f32.mrf.mxu0  ;;  %v796_v13 = vpop.f32.mrf.mxu1 }
 0x137   :  { %v1701_v14 = vpack.c.bf16 %v889_v10, %v888_v9  ;;  %v1811_v15 = vpack.c.bf16 %v933_v11, %v932_v5  ;;  %v797_v16 = vadd.f32 %v2492_v50, %v796_v13  ;;  %v621_v19 = vadd.f32 %v2492_v50, %v620_v12 }
 0x138   :  { %v2002_v17 = vpop.f32.mrf.mxu0  ;;  %v2090_v18 = vpop.f32.mrf.mxu1 }
 0x139   :  { %1863 = vst [vmem:[%s2711_s3 + $0x58] sm:$0xff] %v1701_v14   ;;  %1885 = vst [vmem:[%s2711_s3 + $0x108] sm:$0xff] %v1811_v15   ;;  %v934_v23 = vmax.f32 %v797_v16, 0.0  ;;  %v890_v27 = vmax.f32 %v621_v19, 0.0 }
 0x13a   :  { %v623_v20 = vpop.f32.mrf.mxu0  ;;  %v799_v21 = vpop.f32.mrf.mxu1 }
 0x13b   :  { %v624_v22 = vadd.f32 %v2492_v50, %v623_v20  ;;  %v800_v24 = vadd.f32 %v2492_v50, %v799_v21 }
 0x13c   :  { %v2003_v25 = vpop.f32.mrf.mxu0  ;;  %v2091_v26 = vpop.f32.mrf.mxu1 }
 0x13d   :  { %v891_v28 = vmax.f32 %v624_v22, 0.0  ;;  %v935_v29 = vmax.f32 %v800_v24, 0.0 }
 0x13e   :  { %v628_v30 = vpop.f32.mrf.mxu0  ;;  %v804_v31 = vpop.f32.mrf.mxu1 }
 0x13f   :  { %v1706_v32 = vpack.c.bf16 %v891_v28, %v890_v27  ;;  %v1816_v33 = vpack.c.bf16 %v935_v29, %v934_v23  ;;  %v805_v34 = vadd.f32 %v2492_v50, %v804_v31  ;;  %v629_v37 = vadd.f32 %v2492_v50, %v628_v30 }
 0x140   :  { %v2006_v35 = vpop.f32.mrf.mxu0  ;;  %v2094_v36 = vpop.f32.mrf.mxu1 }
 0x141   :  { %1864 = vst [vmem:[%s2711_s3 + $0x60] sm:$0xff] %v1706_v32   ;;  %1886 = vst [vmem:[%s2711_s3 + $0x110] sm:$0xff] %v1816_v33   ;;  %v936_v41 = vmax.f32 %v805_v34, 0.0  ;;  %v892_v45 = vmax.f32 %v629_v37, 0.0 }
 0x142   :  { %v631_v38 = vpop.f32.mrf.mxu0  ;;  %v807_v39 = vpop.f32.mrf.mxu1 }
 0x143   :  { %v632_v40 = vadd.f32 %v2492_v50, %v631_v38  ;;  %v808_v42 = vadd.f32 %v2492_v50, %v807_v39 }
 0x144   :  { %v2007_v43 = vpop.f32.mrf.mxu0  ;;  %v2095_v44 = vpop.f32.mrf.mxu1 }
 0x145   :  { %v893_v46 = vmax.f32 %v632_v40, 0.0  ;;  %v937_v47 = vmax.f32 %v808_v42, 0.0 }
 0x146   :  { %v636_v48 = vpop.f32.mrf.mxu0  ;;  %v812_v49 = vpop.f32.mrf.mxu1 }
 0x147   :  { %v1711_v51 = vpack.c.bf16 %v893_v46, %v892_v45  ;;  %v1821_v52 = vpack.c.bf16 %v937_v47, %v936_v41  ;;  %v813_v53 = vadd.f32 %v2492_v50, %v812_v49  ;;  %v637_v56 = vadd.f32 %v2492_v50, %v636_v48 }
 0x148   :  { %v2010_v54 = vpop.f32.mrf.mxu0  ;;  %v2098_v55 = vpop.f32.mrf.mxu1 }
 0x149   :  { %1865 = vst [vmem:[%s2711_s3 + $0x68] sm:$0xff] %v1711_v51   ;;  %1887 = vst [vmem:[%s2711_s3 + $0x118] sm:$0xff] %v1821_v52   ;;  %v938_v60 = vmax.f32 %v813_v53, 0.0  ;;  %v894_v0 = vmax.f32 %v637_v56, 0.0 }
 0x14a   :  { %v639_v57 = vpop.f32.mrf.mxu0  ;;  %v815_v58 = vpop.f32.mrf.mxu1 }
 0x14b   :  { %v640_v59 = vadd.f32 %v2492_v50, %v639_v57  ;;  %v816_v61 = vadd.f32 %v2492_v50, %v815_v58 }
 0x14c   :  { %v2011_v62 = vpop.f32.mrf.mxu0  ;;  %v2099_v63 = vpop.f32.mrf.mxu1 }
 0x14d   :  { %v895_v1 = vmax.f32 %v640_v59, 0.0  ;;  %v939_v2 = vmax.f32 %v816_v61, 0.0 }
 0x14e   :  { %v644_v3 = vpop.f32.mrf.mxu0  ;;  %v820_v4 = vpop.f32.mrf.mxu1 }
 0x14f   :  { %v1716_v5 = vpack.c.bf16 %v895_v1, %v894_v0  ;;  %v1826_v6 = vpack.c.bf16 %v939_v2, %v938_v60  ;;  %v821_v7 = vadd.f32 %v2492_v50, %v820_v4  ;;  %v645_v10 = vadd.f32 %v2492_v50, %v644_v3 }
 0x150   :  { %v2014_v8 = vpop.f32.mrf.mxu0  ;;  %v2102_v9 = vpop.f32.mrf.mxu1 }
 0x151   :  { %1866 = vst [vmem:[%s2711_s3 + $0x70] sm:$0xff] %v1716_v5   ;;  %1888 = vst [vmem:[%s2711_s3 + $0x120] sm:$0xff] %v1826_v6   ;;  %v940_v14 = vmax.f32 %v821_v7, 0.0  ;;  %v896_v18 = vmax.f32 %v645_v10, 0.0 }
 0x152   :  { %v647_v11 = vpop.f32.mrf.mxu0  ;;  %v823_v12 = vpop.f32.mrf.mxu1 }
 0x153   :  { %v648_v13 = vadd.f32 %v2492_v50, %v647_v11  ;;  %v824_v15 = vadd.f32 %v2492_v50, %v823_v12 }
 0x154   :  { %v2015_v16 = vpop.f32.mrf.mxu0  ;;  %v2103_v17 = vpop.f32.mrf.mxu1 }
 0x155   :  { %v897_v19 = vmax.f32 %v648_v13, 0.0  ;;  %v941_v20 = vmax.f32 %v824_v15, 0.0 }
 0x156   :  { %v652_v21 = vpop.f32.mrf.mxu0  ;;  %v828_v22 = vpop.f32.mrf.mxu1 }
 0x157   :  { %v1721_v23 = vpack.c.bf16 %v897_v19, %v896_v18  ;;  %v1831_v24 = vpack.c.bf16 %v941_v20, %v940_v14  ;;  %v829_v25 = vadd.f32 %v2492_v50, %v828_v22  ;;  %v653_v28 = vadd.f32 %v2492_v50, %v652_v21 }
 0x158   :  { %v2018_v26 = vpop.f32.mrf.mxu0  ;;  %v2106_v27 = vpop.f32.mrf.mxu1 }
 0x159   :  { %1867 = vst [vmem:[%s2711_s3 + $0x78] sm:$0xff] %v1721_v23   ;;  %1889 = vst [vmem:[%s2711_s3 + $0x128] sm:$0xff] %v1831_v24   ;;  %v942_v32 = vmax.f32 %v829_v25, 0.0  ;;  %v898_v36 = vmax.f32 %v653_v28, 0.0 }
 0x15a   :  { %v655_v29 = vpop.f32.mrf.mxu0  ;;  %v831_v30 = vpop.f32.mrf.mxu1 }
 0x15b   :  { %v656_v31 = vadd.f32 %v2492_v50, %v655_v29  ;;  %v832_v33 = vadd.f32 %v2492_v50, %v831_v30 }
 0x15c   :  { %v2019_v34 = vpop.f32.mrf.mxu0  ;;  %v2107_v35 = vpop.f32.mrf.mxu1 }
 0x15d   :  { %v899_v37 = vmax.f32 %v656_v31, 0.0  ;;  %v943_v38 = vmax.f32 %v832_v33, 0.0 }
 0x15e   :  { %v660_v39 = vpop.f32.mrf.mxu0  ;;  %v836_v40 = vpop.f32.mrf.mxu1 }
 0x15f   :  { %v1726_v41 = vpack.c.bf16 %v899_v37, %v898_v36  ;;  %v1836_v42 = vpack.c.bf16 %v943_v38, %v942_v32  ;;  %v837_v43 = vadd.f32 %v2492_v50, %v836_v40  ;;  %v661_v46 = vadd.f32 %v2492_v50, %v660_v39 }
 0x160   :  { %v2022_v44 = vpop.f32.mrf.mxu0  ;;  %v2110_v45 = vpop.f32.mrf.mxu1 }
 0x161   :  { %1868 = vst [vmem:[%s2711_s3 + $0x80] sm:$0xff] %v1726_v41   ;;  %1890 = vst [vmem:[%s2711_s3 + $0x130] sm:$0xff] %v1836_v42   ;;  %v944_v51 = vmax.f32 %v837_v43, 0.0  ;;  %v900_v55 = vmax.f32 %v661_v46, 0.0 }
 0x162   :  { %v663_v47 = vpop.f32.mrf.mxu0  ;;  %v839_v48 = vpop.f32.mrf.mxu1 }
 0x163   :  { %v664_v49 = vadd.f32 %v2492_v50, %v663_v47  ;;  %v840_v52 = vadd.f32 %v2492_v50, %v839_v48 }
 0x164   :  { %v2023_v53 = vpop.f32.mrf.mxu0  ;;  %v2111_v54 = vpop.f32.mrf.mxu1 }
 0x165   :  { %v901_v56 = vmax.f32 %v664_v49, 0.0  ;;  %v945_v57 = vmax.f32 %v840_v52, 0.0 }
 0x166   :  { %v668_v58 = vpop.f32.mrf.mxu0  ;;  %v844_v59 = vpop.f32.mrf.mxu1 }
 0x167   :  { %v1731_v60 = vpack.c.bf16 %v901_v56, %v900_v55  ;;  %v1841_v61 = vpack.c.bf16 %v945_v57, %v944_v51  ;;  %v845_v62 = vadd.f32 %v2492_v50, %v844_v59  ;;  %v669_v1 = vadd.f32 %v2492_v50, %v668_v58 }
 0x168   :  { %v2026_v63 = vpop.f32.mrf.mxu0  ;;  %v2114_v0 = vpop.f32.mrf.mxu1 }
 0x169   :  { %1869 = vst [vmem:[%s2711_s3 + $0x88] sm:$0xff] %v1731_v60   ;;  %1891 = vst [vmem:[%s2711_s3 + $0x138] sm:$0xff] %v1841_v61   ;;  %v946_v5 = vmax.f32 %v845_v62, 0.0  ;;  %v902_v9 = vmax.f32 %v669_v1, 0.0 }
 0x16a   :  { %v671_v2 = vpop.f32.mrf.mxu0  ;;  %v847_v3 = vpop.f32.mrf.mxu1 }
 0x16b   :  { %v672_v4 = vadd.f32 %v2492_v50, %v671_v2  ;;  %v848_v6 = vadd.f32 %v2492_v50, %v847_v3 }
 0x16c   :  { %v2027_v7 = vpop.f32.mrf.mxu0  ;;  %v2115_v8 = vpop.f32.mrf.mxu1 }
 0x16d   :  { %v903_v10 = vmax.f32 %v672_v4, 0.0  ;;  %v947_v11 = vmax.f32 %v848_v6, 0.0 }
 0x16e   :  { %v676_v12 = vpop.f32.mrf.mxu0  ;;  %v852_v13 = vpop.f32.mrf.mxu1 }
 0x16f   :  { %v1736_v14 = vpack.c.bf16 %v903_v10, %v902_v9  ;;  %v1846_v15 = vpack.c.bf16 %v947_v11, %v946_v5  ;;  %v853_v16 = vadd.f32 %v2492_v50, %v852_v13  ;;  %v677_v19 = vadd.f32 %v2492_v50, %v676_v12 }
 0x170   :  { %v2030_v17 = vpop.f32.mrf.mxu0  ;;  %v2118_v18 = vpop.f32.mrf.mxu1 }
 0x171   :  { %1870 = vst [vmem:[%s2711_s3 + $0x90] sm:$0xff] %v1736_v14   ;;  %1892 = vst [vmem:[%s2711_s3 + $0x140] sm:$0xff] %v1846_v15   ;;  %v948_v23 = vmax.f32 %v853_v16, 0.0  ;;  %v904_v27 = vmax.f32 %v677_v19, 0.0 }
 0x172   :  { %v679_v20 = vpop.f32.mrf.mxu0  ;;  %v855_v21 = vpop.f32.mrf.mxu1 }
 0x173   :  { %v680_v22 = vadd.f32 %v2492_v50, %v679_v20  ;;  %v856_v24 = vadd.f32 %v2492_v50, %v855_v21 }
 0x174   :  { %v2031_v25 = vpop.f32.mrf.mxu0  ;;  %v2119_v26 = vpop.f32.mrf.mxu1 }
 0x175   :  { %v905_v28 = vmax.f32 %v680_v22, 0.0  ;;  %v949_v29 = vmax.f32 %v856_v24, 0.0 }
 0x176   :  { %v684_v30 = vpop.f32.mrf.mxu0  ;;  %v860_v31 = vpop.f32.mrf.mxu1 }
 0x177   :  { %v1741_v32 = vpack.c.bf16 %v905_v28, %v904_v27  ;;  %v1851_v33 = vpack.c.bf16 %v949_v29, %v948_v23  ;;  %v861_v34 = vadd.f32 %v2492_v50, %v860_v31  ;;  %v685_v37 = vadd.f32 %v2492_v50, %v684_v30 }
 0x178   :  { %v2034_v35 = vpop.f32.mrf.mxu0  ;;  %v2122_v36 = vpop.f32.mrf.mxu1 }
 0x179   :  { %1871 = vst [vmem:[%s2711_s3 + $0x98] sm:$0xff] %v1741_v32   ;;  %1893 = vst [vmem:[%s2711_s3 + $0x148] sm:$0xff] %v1851_v33   ;;  %v950_v38 = vmax.f32 %v861_v34, 0.0  ;;  %v906_v45 = vmax.f32 %v685_v37, 0.0 }
 0x17a   :  { %v687_v39 = vpop.f32.mrf.mxu0  ;;  %v863_v40 = vpop.f32.mrf.mxu1 }
 0x17b   :  { %v688_v41 = vadd.f32 %v2492_v50, %v687_v39  ;;  %v1642_v42 = vpack.c.bf16 %v950_v38, %v950_v38 }
 0x17c   :  { %v2035_v43 = vpop.f32.mrf.mxu0  ;;  %v2123_v44 = vpop.f32.mrf.mxu1 }
 0x17d   :  { %v907_v46 = vmax.f32 %v688_v41, 0.0  ;;  %1376 = vst [vmem:[%s2711_s3 + $0x150] sm:$0x3] %v1642_v42 }
 0x17e   :  { %v692_v47 = vpop.f32.mrf.mxu0 }
 0x17f   :  { %v1746_v48 = vpack.c.bf16 %v907_v46, %v906_v45  ;;  %v693_v51 = vadd.f32 %v2492_v50, %v692_v47 }
 0x180   :  { %v2038_v49 = vpop.f32.mrf.mxu0 }
 0x181   :  { %1872 = vst [vmem:[%s2711_s3 + $0xa0] sm:$0xff] %v1746_v48   ;;  %v908_v55 = vmax.f32 %v693_v51, 0.0 }
 0x182   :  { %v695_v52 = vpop.f32.mrf.mxu0 }
 0x183   :  { %v696_v53 = vadd.f32 %v2492_v50, %v695_v52 }
 0x184   :  { %v2039_v54 = vpop.f32.mrf.mxu0 }
 0x185   :  { %v909_v56 = vmax.f32 %v696_v53, 0.0 }
 0x187   :  { %v1751_v57 = vpack.c.bf16 %v909_v56, %v908_v55 }
 0x189   :  { %1873 = vst [vmem:[%s2711_s3 + $0xa8] sm:$0xff] %v1751_v57  }

// kernel: tile.18
= control target key start
LH: loop header
LB: loop body
LE: loop exit
PB: predicated region body
PF: predicated region fallthrough
CT: control target
= control target key end

     0   :  { %s22_s0 = inlined_call_operand.vmem [shape: f32[32], index: 0, kind: input, shape index: {}]   ;;  %s23_s1 = inlined_call_operand.vmem [shape: f32[4,32], index: 1, kind: output, shape index: {}]  }
   0x1   :  { %v4_v0 = vld [vmem:[%s22_s0] ss:$0 sm:$0xff] }
   0x2   :  { %5 = vst [vmem:[%s23_s1] sm:$0xf] %v4_v0 }

// kernel: tile.19
= control target key start
LH: loop header
LB: loop body
LE: loop exit
PB: predicated region body
PF: predicated region fallthrough
CT: control target
= control target key end

     0   :  { %vm8_vm0 = vcmask 261120   ;;  %s40_s8 = smov 32   ;;  %s41_s9 = smov 64   ;;  %vm14_vm1 = vcmask 1048320   ;;  %vm20_vm2 = vcmask 785920   ;;  %vm26_vm3 = vcmask 523520   ;;  %s58_s0 = inlined_call_operand.vmem [shape: f32[4,32], index: 0, kind: input, shape index: {}]   ;;  %s59_s1 = inlined_call_operand.vmem [shape: f32[1,128], index: 1, kind: output, shape index: {}]  }
   0x1   :  { %v5_v0 = vld [vmem:[%s58_s0] sm:$0xf]  ;;  %s39_s0 = smov 96  }
   0x2   :  { %6 = vst [vmem:[#allocation1] sm:$0xf] %v5_v0 }
   0x9   :  { %v11_v1 = vld [vmem:[#allocation1 + $0x3] sm:$0x1]   ;;  %v23_v2 = vld [vmem:[#allocation1 + $0x1] sm:$0x1]   ;;  %v7_v3 = vld [vmem:[#allocation1] sm:$0x1]  }
   0xa   :  { %12 = vrot.lane.b32.xlu0 %v11_v1, %s39_s0  ;;  %24 = vrot.lane.b32.xlu1 %v23_v2, %s40_s8  ;;  %v17_v4 = vld [vmem:[#allocation1 + $0x2] sm:$0x1]   ;;  %9 = vst.msk [vmem:[#allocation0] sm:$0x1] %vm8_vm0, %v7_v3  }
   0xe   :  { %18 = vrot.lane.b32.xlu0 %v17_v4, %s41_s9 }
  0x7c   :  { %v13_v5 = vpop.permute.xlu0 %12   ;;  %v25_v6 = vpop.permute.xlu1 %24  }
  0x7d   :  { %15 = vst.msk [vmem:[#allocation0] sm:$0x1] %vm14_vm1, %v13_v5  }
  0x80   :  { %v19_v7 = vpop.permute.xlu0 %18  }
  0x81   :  { %21 = vst.msk [vmem:[#allocation0] sm:$0x1] %vm20_vm2, %v19_v7  }
  0x82   :  { %27 = vst.msk [vmem:[#allocation0] sm:$0x1] %vm26_vm3, %v25_v6  }
  0x89   :  { %v32_v8 = vld [vmem:[#allocation0] sm:$0x1] }
  0x8a   :  { %35 = vst [vmem:[%s59_s1] sm:$0x1] %v32_v8 }

// kernel: forward.4
= control target key start
LH: loop header
LB: loop body
LE: loop exit
PB: predicated region body
PF: predicated region fallthrough
CT: control target
= control target key end

     0   :  { %vm795_vm0 = vcmask 523264   ;;  %s2932_s1 = inlined_call_operand.vmem [shape: bf16[576,128], index: 1, kind: input, shape index: {}]   ;;  %s2933_s0 = inlined_call_operand.vmem [shape: bf16[242,576], index: 0, kind: input, shape index: {}]   ;;  %s2934_s2 = inlined_call_operand.vmem [shape: f32[1,128], index: 2, kind: input, shape index: {}]   ;;  %s2935_s3 = inlined_call_operand.vmem [shape: bf16[242,128], index: 3, kind: output, shape index: {}]  }
   0x1   :  { %v2099_v0 = vld [vmem:[%s2932_s1 + $0x78] sm:$0xff]   ;;  %v2101_v2 = vld [vmem:[%s2932_s1 + $0x70] sm:$0xff]   ;;  %v2103_v4 = vld [vmem:[%s2932_s1 + $0x68] sm:$0xff]  }
   0x2   :  { %v2100_v1 = vld [vmem:[%s2932_s1 + $0x38] sm:$0xff]   ;;  %1799 = vmatprep.subr.bf16.mxu0 %v2099_v0  ;;  %2083 = vmatprep.subr.bf16.mxu1 %v2099_v0  ;;  %v2102_v3 = vld [vmem:[%s2932_s1 + $0x30] sm:$0xff]   ;;  %v2104_v5 = vld [vmem:[%s2932_s1 + $0x28] sm:$0xff]  }
   0x3   :  { %1800 = vmatpush3.bf16.msra.mxu0 %v2100_v1  ;;  %2091 = vmatpush3.bf16.msra.mxu1 %v2100_v1  ;;  %v2105_v6 = vld [vmem:[%s2932_s1 + $0x60] sm:$0xff]   ;;  %v2107_v8 = vld [vmem:[%s2932_s1 + $0x58] sm:$0xff]   ;;  %v2109_v10 = vld [vmem:[%s2932_s1 + $0x50] sm:$0xff]  }
   0x4   :  { %1801 = vmatprep.subr.bf16.mxu0 %v2101_v2  ;;  %2084 = vmatprep.subr.bf16.mxu1 %v2101_v2  ;;  %v2106_v7 = vld [vmem:[%s2932_s1 + $0x20] sm:$0xff]   ;;  %v2108_v9 = vld [vmem:[%s2932_s1 + $0x18] sm:$0xff]   ;;  %v2110_v13 = vld [vmem:[%s2932_s1 + $0x10] sm:$0xff]  }
   0x5   :  { %v2117_v11 = vld [vmem:[%s2933_s0 + $0x4] ss:$20 sps:$4 sm:$0xff]   ;;  %v2111_v14 = vld [vmem:[%s2932_s1 + $0x48] sm:$0xff]   ;;  %v2115_v20 = vld [vmem:[%s2933_s0] ss:$20 sps:$4 sm:$0xff]  }
   0x6   :  { %v2120_v12 = vld [vmem:[%s2933_s0 + $0x1e4] ss:$20 sps:$4 sm:$0xff]   ;;  %876 = vmatprep.mubr.bf16.mxu0 %v2117_v11  ;;  %v2112_v15 = vld [vmem:[%s2932_s1 + $0x8] sm:$0xff]   ;;  %v2118_v21 = vld [vmem:[%s2933_s0 + $0x1e0] ss:$20 sps:$4 sm:$0xff]  }
   0x7   :  { %1802 = vmatpush3.bf16.msra.mxu0 %v2102_v3  ;;  %2092 = vmatpush3.bf16.msra.mxu1 %v2102_v3  ;;  %v2113_v16 = vld [vmem:[%s2932_s1 + $0x40] sm:$0xff]   ;;  %v2121_v18 = vld [vmem:[%s2932_s1 + $0xf8] sm:$0xff]   ;;  %v2124_v23 = vld [vmem:[%s2932_s1 + $0xf0] sm:$0xff]  }
   0x8   :  { %1803 = vmatprep.subr.bf16.mxu0 %v2103_v4  ;;  %2085 = vmatprep.subr.bf16.mxu1 %v2103_v4  ;;  %v2114_v17 = vld [vmem:[%s2932_s1] sm:$0xff]   ;;  %v2122_v19 = vld [vmem:[%s2932_s1 + $0x118] sm:$0xff]   ;;  %v2125_v26 = vld [vmem:[%s2932_s1 + $0xb0] sm:$0xff]  }
   0x9   :  { %972 = vmatprep.mubr.bf16.mxu1 %v2120_v12  ;;  %v2123_v22 = vld [vmem:[%s2932_s1 + $0xb8] sm:$0xff]   ;;  %v2126_v24 = vld [vmem:[%s2933_s0 + $0x2c] ss:$20 sps:$4 sm:$0xff]   ;;  %v2136_v32 = vld [vmem:[%s2933_s0 + $0x54] ss:$20 sps:$4 sm:$0xff]  }
   0xa   :  { %v2128_v25 = vld [vmem:[%s2933_s0 + $0x20c] ss:$20 sps:$4 sm:$0xff]   ;;  %v2130_v27 = vld [vmem:[%s2933_s0 + $0x28] ss:$20 sps:$4 sm:$0xff]   ;;  %v2152_v34 = vld [vmem:[%s2932_s1 + $0x110] sm:$0xff]  }
   0xb   :  { %1804 = vmatpush3.bf16.msra.mxu0 %v2104_v5  ;;  %2093 = vmatpush3.bf16.msra.mxu1 %v2104_v5  ;;  %v2132_v28 = vld [vmem:[%s2932_s1 + $0xe8] sm:$0xff]   ;;  %v2134_v31 = vld [vmem:[%s2932_s1 + $0xe0] sm:$0xff]   ;;  %v2142_v37 = vld [vmem:[%s2932_s1 + $0xd8] sm:$0xff]  }
   0xc   :  { %1805 = vmatprep.subr.bf16.mxu0 %v2105_v6  ;;  %2086 = vmatprep.subr.bf16.mxu1 %v2105_v6  ;;  %v2131_v29 = vld [vmem:[%s2933_s0 + $0x208] ss:$20 sps:$4 sm:$0xff]   ;;  %v2135_v35 = vld [vmem:[%s2932_s1 + $0xa0] sm:$0xff]   ;;  %v2144_v42 = vld [vmem:[%s2932_s1 + $0xd0] sm:$0xff]  }
   0xd   :  { %v2133_v30 = vld [vmem:[%s2932_s1 + $0xa8] sm:$0xff]   ;;  %v2140_v36 = vld [vmem:[%s2933_s0 + $0x50] ss:$20 sps:$4 sm:$0xff]   ;;  %v105_v39 = vld [vmem:[%s2933_s0 + $0x258] sm:$0x11] }
   0xe   :  { %v2138_v33 = vld [vmem:[%s2933_s0 + $0x234] ss:$20 sps:$4 sm:$0xff]   ;;  %v2141_v38 = vld [vmem:[%s2933_s0 + $0x230] ss:$20 sps:$4 sm:$0xff]   ;;  %v2143_v40 = vld [vmem:[%s2932_s1 + $0x98] sm:$0xff]   ;;  %v1592_v43 = vcombine.high %v105_v39, %v105_v39  ;;  %v1591_v48 = vcombine.low %v105_v39, %v105_v39 }
   0xf   :  { %1806 = vmatpush3.bf16.msra.mxu0 %v2106_v7  ;;  %2094 = vmatpush3.bf16.msra.mxu1 %v2106_v7  ;;  %v2146_v41 = vld [vmem:[%s2933_s0 + $0x7c] ss:$20 sps:$4 sm:$0xff]   ;;  %v2151_v45 = vld [vmem:[%s2932_s1 + $0xc8] sm:$0xff]   ;;  %v2154_v50 = vld [vmem:[%s2932_s1 + $0xc0] sm:$0xff]  }
  0x10   :  { %1807 = vmatprep.subr.bf16.mxu0 %v2107_v8  ;;  %2087 = vmatprep.subr.bf16.mxu1 %v2107_v8  ;;  %v2145_v44 = vld [vmem:[%s2932_s1 + $0x90] sm:$0xff]   ;;  %v2174_v46 = vld [vmem:[%s2932_s1 + $0x108] sm:$0xff]   ;;  %v2156_v51 = vld [vmem:[%s2933_s0 + $0xa4] ss:$20 sps:$4 sm:$0xff]  }
  0x11   :  { %v2149_v47 = vld [vmem:[%s2933_s0 + $0x78] ss:$20 sps:$4 sm:$0xff]   ;;  %v2155_v53 = vld [vmem:[%s2932_s1 + $0x80] sm:$0xff]   ;;  %v2158_v54 = vld [vmem:[%s2933_s0 + $0x8] ss:$20 sps:$4 sm:$0xff]  }
  0x12   :  { %v2153_v49 = vld [vmem:[%s2932_s1 + $0x88] sm:$0xff]   ;;  %v2193_v55 = vld [vmem:[%s2932_s1 + $0x100] sm:$0xff]   ;;  %v2170_v62 = vld [vmem:[%s2933_s0 + $0x5c] ss:$20 sps:$4 sm:$0xff]  }
  0x13   :  { %1808 = vmatpush3.bf16.msra.mxu0 %v2108_v9  ;;  %2095 = vmatpush3.bf16.msra.mxu1 %v2108_v9  ;;  %v2160_v52 = vld [vmem:[%s2933_s0 + $0xc] ss:$20 sps:$4 sm:$0xff]   ;;  %v2164_v58 = vld [vmem:[%s2933_s0 + $0x34] ss:$20 sps:$4 sm:$0xff]   ;;  %v2167_v60 = vld [vmem:[%s2933_s0 + $0x30] ss:$20 sps:$4 sm:$0xff]  }
  0x14   :  { %1809 = vmatprep.subr.bf16.mxu0 %v2109_v10  ;;  %2088 = vmatprep.subr.bf16.mxu1 %v2109_v10  ;;  %v2161_v56 = vld [vmem:[%s2933_s0 + $0xa0] ss:$20 sps:$4 sm:$0xff]   ;;  %v2166_v59 = vld [vmem:[%s2933_s0 + $0xc8] ss:$20 sps:$4 sm:$0xff]   ;;  %v2172_v63 = vld [vmem:[%s2933_s0 + $0xf0] ss:$20 sps:$4 sm:$0xff]  }
  0x15   :  { %v2162_v57 = vld [vmem:[%s2933_s0 + $0xcc] ss:$20 sps:$4 sm:$0xff]   ;;  %v2168_v61 = vld [vmem:[%s2933_s0 + $0xf4] ss:$20 sps:$4 sm:$0xff]   ;;  %v2175_v1 = vld [vmem:[%s2933_s0 + $0x11c] ss:$20 sps:$4 sm:$0xff]  }
  0x16   :  { %v2173_v0 = vld [vmem:[%s2933_s0 + $0x58] ss:$20 sps:$4 sm:$0xff]   ;;  %v2180_v4 = vld [vmem:[%s2933_s0 + $0x80] ss:$20 sps:$4 sm:$0xff]   ;;  %v2186_v8 = vld [vmem:[%s2933_s0 + $0xa8] ss:$20 sps:$4 sm:$0xff]  }
  0x17   :  { %1810 = vmatpush3.bf16.msra.mxu0 %v2110_v13  ;;  %2096 = vmatpush3.bf16.msra.mxu1 %v2110_v13  ;;  %v2177_v2 = vld [vmem:[%s2933_s0 + $0x84] ss:$20 sps:$4 sm:$0xff]   ;;  %v2183_v6 = vld [vmem:[%s2933_s0 + $0xac] ss:$20 sps:$4 sm:$0xff]   ;;  %v2189_v10 = vld [vmem:[%s2933_s0 + $0xd4] ss:$20 sps:$4 sm:$0xff]  }
  0x18   :  { %1811 = vmatprep.subr.bf16.mxu0 %v2111_v14  ;;  %2089 = vmatprep.subr.bf16.mxu1 %v2111_v14  ;;  %v2179_v3 = vld [vmem:[%s2933_s0 + $0x118] ss:$20 sps:$4 sm:$0xff]   ;;  %v2185_v7 = vld [vmem:[%s2933_s0 + $0x140] ss:$20 sps:$4 sm:$0xff]   ;;  %v2191_v11 = vld [vmem:[%s2933_s0 + $0x168] ss:$20 sps:$4 sm:$0xff]  }
  0x19   :  { %v2181_v5 = vld [vmem:[%s2933_s0 + $0x144] ss:$20 sps:$4 sm:$0xff]   ;;  %v2187_v9 = vld [vmem:[%s2933_s0 + $0x16c] ss:$20 sps:$4 sm:$0xff]   ;;  %v2194_v13 = vld [vmem:[%s2933_s0 + $0x194] ss:$20 sps:$4 sm:$0xff]  }
  0x1a   :  { %v2192_v12 = vld [vmem:[%s2933_s0 + $0xd0] ss:$20 sps:$4 sm:$0xff]   ;;  %v2229_v39 = vld [vmem:[%s2933_s0 + $0x1e8] ss:$20 sps:$4 sm:$0xff]  }
  0x1b   :  { %1812 = vmatpush3.bf16.msra.mxu0 %v2112_v15  ;;  %2097 = vmatpush3.bf16.msra.mxu1 %v2112_v15  ;;  %v2196_v14 = vld [vmem:[%s2933_s0 + $0xfc] ss:$20 sps:$4 sm:$0xff]  }
  0x1c   :  { %1813 = vmatprep.subr.bf16.mxu0 %v2113_v16  ;;  %2090 = vmatprep.subr.bf16.mxu1 %v2113_v16  ;;  %v2198_v15 = vld [vmem:[%s2933_s0 + $0x190] ss:$20 sps:$4 sm:$0xff]   ;;  %v2199_v16 = vld [vmem:[%s2933_s0 + $0xf8] ss:$20 sps:$4 sm:$0xff]  }
  0x1f   :  { %1814 = vmatpush3.bf16.msra.mxu0 %v2114_v17  ;;  %2098 = vmatpush3.bf16.msra.mxu1 %v2114_v17  ;;  %v2200_v17 = vld [vmem:[%s2933_s0 + $0x1bc] ss:$20 sps:$4 sm:$0xff]  }
  0x20   :  { %1911 = vmatprep.subr.bf16.mxu1 %v2121_v18  ;;  %2043 = vmatprep.subr.bf16.mxu0 %v2122_v19  ;;  %v2202_v18 = vld [vmem:[%s2933_s0 + $0x124] ss:$20 sps:$4 sm:$0xff]  }
  0x22   :  { %877 = vmatmul.mubr.bf16.vlgmr.msra.gmra.mxu0 %v2115_v20  ;;  %973 = vmatmul.mubr.bf16.vlgmr.msra.gmra.mxu1 %v2118_v21  ;;  %v2205_v20 = vld [vmem:[%s2933_s0 + $0x120] ss:$20 sps:$4 sm:$0xff]  }
  0x23   :  { %1912 = vmatpush3.bf16.msra.mxu1 %v2123_v22  ;;  %2044 = vmatpush3.bf16.msra.mxu0 %v2122_v19  ;;  %v2204_v19 = vld [vmem:[%s2933_s0 + $0x1b8] ss:$20 sps:$4 sm:$0xff]   ;;  %v2208_v22 = vld [vmem:[%s2933_s0 + $0x10] ss:$20 sps:$4 sm:$0xff]  }
  0x24   :  { %1913 = vmatprep.subr.bf16.mxu1 %v2124_v23  ;;  %884 = vmatprep.mubr.bf16.mxu0 %v2126_v24  ;;  %v2206_v21 = vld [vmem:[%s2933_s0 + $0x14c] ss:$20 sps:$4 sm:$0xff]   ;;  %v2209_v23 = vld [vmem:[%s2933_s0 + $0x148] ss:$20 sps:$4 sm:$0xff]  }
  0x25   :  { %980 = vmatprep.mubr.bf16.mxu1 %v2128_v25  ;;  %2045 = vmatprep.subr.bf16.mxu0 %v2152_v34  ;;  %v2210_v24 = vld [vmem:[%s2933_s0 + $0x38] ss:$20 sps:$4 sm:$0xff]   ;;  %v2211_v25 = vld [vmem:[%s2933_s0 + $0x174] ss:$20 sps:$4 sm:$0xff]  }
  0x27   :  { %1914 = vmatpush3.bf16.msra.mxu1 %v2125_v26  ;;  %2046 = vmatpush3.bf16.msra.mxu0 %v2152_v34  ;;  %v2213_v26 = vld [vmem:[%s2933_s0 + $0x60] ss:$20 sps:$4 sm:$0xff]  }
  0x28   :  { %1915 = vmatprep.subr.bf16.mxu1 %v2132_v28  ;;  %2047 = vmatprep.subr.bf16.mxu0 %v2174_v46  ;;  %v2215_v28 = vld [vmem:[%s2933_s0 + $0x88] ss:$20 sps:$4 sm:$0xff]   ;;  %v2223_v34 = vld [vmem:[%s2933_s0 + $0x100] ss:$20 sps:$4 sm:$0xff]  }
  0x2a   :  { %885 = vmatmul.mubr.bf16.gmra.mxu0 %v2130_v27  ;;  %981 = vmatmul.mubr.bf16.gmra.mxu1 %v2131_v29  ;;  %v2214_v27 = vld [vmem:[%s2933_s0 + $0x170] ss:$20 sps:$4 sm:$0xff]  }
  0x2b   :  { %1916 = vmatpush3.bf16.msra.mxu1 %v2133_v30  ;;  %892 = vmatprep.mubr.bf16.mxu0 %v2136_v32  ;;  %v2216_v29 = vld [vmem:[%s2933_s0 + $0x19c] ss:$20 sps:$4 sm:$0xff]   ;;  %v2220_v32 = vld [vmem:[%s2933_s0 + $0xd8] ss:$20 sps:$4 sm:$0xff]  }
  0x2c   :  { %1917 = vmatprep.subr.bf16.mxu1 %v2134_v31  ;;  %988 = vmatprep.mubr.bf16.mxu1 %v2138_v33  ;;  %v2218_v30 = vld [vmem:[%s2933_s0 + $0xb0] ss:$20 sps:$4 sm:$0xff]   ;;  %v2219_v31 = vld [vmem:[%s2933_s0 + $0x198] ss:$20 sps:$4 sm:$0xff]  }
  0x2d   :  { %2048 = vmatpush3.bf16.msra.mxu0 %v2174_v46  ;;  %v2221_v33 = vld [vmem:[%s2933_s0 + $0x1c4] ss:$20 sps:$4 sm:$0xff]  }
  0x2e   :  { %2049 = vmatprep.subr.bf16.mxu0 %v2193_v55  ;;  %v2238_v46 = vld [vmem:[%s2933_s0 + $0x1f0] ss:$20 sps:$4 sm:$0xff]  }
  0x2f   :  { %1918 = vmatpush3.bf16.msra.mxu1 %v2135_v35  ;;  %v2224_v35 = vld [vmem:[%s2933_s0 + $0x1c0] ss:$20 sps:$4 sm:$0xff]  }
  0x30   :  { %1919 = vmatprep.subr.bf16.mxu1 %v2142_v37  ;;  %v2226_v37 = vld [vmem:[%s2933_s0 + $0x1ec] ss:$20 sps:$4 sm:$0xff]  }
  0x31   :  { %2050 = vmatpush3.bf16.msra.mxu0 %v2193_v55 }
  0x32   :  { %893 = vmatmul.mubr.bf16.gmra.mxu0 %v2140_v36  ;;  %989 = vmatmul.mubr.bf16.gmra.mxu1 %v2141_v38  ;;  %v2225_v36 = vld [vmem:[%s2933_s0 + $0x128] ss:$20 sps:$4 sm:$0xff]   ;;  %v2228_v38 = vld [vmem:[%s2933_s0 + $0x150] ss:$20 sps:$4 sm:$0xff]  }
  0x33   :  { %1920 = vmatpush3.bf16.msra.mxu1 %v2143_v40  ;;  %900 = vmatprep.mubr.bf16.mxu0 %v2146_v41  ;;  %v2230_v40 = vld [vmem:[%s2933_s0 + $0x178] ss:$20 sps:$4 sm:$0xff]   ;;  %v2231_v41 = vld [vmem:[%s2933_s0 + $0x214] ss:$20 sps:$4 sm:$0xff]  }
  0x34   :  { %1921 = vmatprep.subr.bf16.mxu1 %v2144_v42  ;;  %996 = vmatprep.mubr.bf16.mxu1 %v1592_v43  ;;  %v2233_v42 = vld [vmem:[%s2933_s0 + $0x1a0] ss:$20 sps:$4 sm:$0xff]   ;;  %v2234_v43 = vld [vmem:[%s2933_s0 + $0x210] ss:$20 sps:$4 sm:$0xff]  }
  0x37   :  { %1922 = vmatpush3.bf16.msra.mxu1 %v2145_v44  ;;  %v2235_v44 = vld [vmem:[%s2933_s0 + $0x1c8] ss:$20 sps:$4 sm:$0xff]  }
  0x38   :  { %1923 = vmatprep.subr.bf16.mxu1 %v2151_v45  ;;  %v2236_v45 = vld [vmem:[%s2933_s0 + $0x23c] ss:$20 sps:$4 sm:$0xff]  }
  0x3a   :  { %901 = vmatmul.mubr.bf16.gmra.mxu0 %v2149_v47  ;;  %997 = vmatmul.mubr.bf16.gmra.mxu1 %v1591_v48  ;;  %v106_v47 = vld [vmem:[%s2933_s0 + $0x260] sm:$0x11]  ;;  %v2239_v48 = vld [vmem:[%s2933_s0 + $0x238] ss:$20 sps:$4 sm:$0xff]  }
  0x3b   :  { %1924 = vmatpush3.bf16.msra.mxu1 %v2153_v49  ;;  %908 = vmatprep.mubr.bf16.mxu0 %v2156_v51  ;;  %v2240_v49 = vld [vmem:[%s2933_s0 + $0x218] ss:$20 sps:$4 sm:$0xff]   ;;  %v2242_v51 = vld [vmem:[%s2933_s0 + $0x240] ss:$20 sps:$4 sm:$0xff]  }
  0x3c   :  { %1925 = vmatprep.subr.bf16.mxu1 %v2154_v50  ;;  %1036 = vmatprep.mubr.bf16.mxu1 %v2160_v52  ;;  %v1594_v50 = vcombine.high %v106_v47, %v106_v47  ;;  %v1593_v52 = vcombine.low %v106_v47, %v106_v47 }
  0x3f   :  { %1926 = vmatpush3.bf16.msra.mxu1 %v2155_v53  ;;  %v2244_v53 = vld [vmem:[%s2933_s0 + $0x268] ss:$0 sps:$4 sm:$0x11]  }
  0x42   :  { %909 = vmatmul.mubr.bf16.gmra.mxu0 %v2161_v56  ;;  %1037 = vmatmul.mubr.bf16.vlgmr.msra.gmra.mxu1 %v2158_v54 }
  0x43   :  { %916 = vmatprep.mubr.bf16.mxu0 %v2162_v57  ;;  %1044 = vmatprep.mubr.bf16.mxu1 %v2164_v58 }
  0x4a   :  { %917 = vmatmul.mubr.bf16.gmra.mxu0 %v2166_v59  ;;  %1045 = vmatmul.mubr.bf16.gmra.mxu1 %v2167_v60 }
  0x4b   :  { %924 = vmatprep.mubr.bf16.mxu0 %v2168_v61  ;;  %1052 = vmatprep.mubr.bf16.mxu1 %v2170_v62 }
  0x52   :  { %925 = vmatmul.mubr.bf16.gmra.mxu0 %v2172_v63  ;;  %1053 = vmatmul.mubr.bf16.gmra.mxu1 %v2173_v0 }
  0x53   :  { %932 = vmatprep.mubr.bf16.mxu0 %v2175_v1  ;;  %1060 = vmatprep.mubr.bf16.mxu1 %v2177_v2 }
  0x5a   :  { %933 = vmatmul.mubr.bf16.gmra.mxu0 %v2179_v3  ;;  %1061 = vmatmul.mubr.bf16.gmra.mxu1 %v2180_v4 }
  0x5b   :  { %940 = vmatprep.mubr.bf16.mxu0 %v2181_v5  ;;  %1068 = vmatprep.mubr.bf16.mxu1 %v2183_v6 }
  0x62   :  { %941 = vmatmul.mubr.bf16.gmra.mxu0 %v2185_v7  ;;  %1069 = vmatmul.mubr.bf16.gmra.mxu1 %v2186_v8 }
  0x63   :  { %948 = vmatprep.mubr.bf16.mxu0 %v2187_v9  ;;  %1076 = vmatprep.mubr.bf16.mxu1 %v2189_v10 }
  0x6a   :  { %949 = vmatmul.mubr.bf16.gmra.mxu0 %v2191_v11  ;;  %1077 = vmatmul.mubr.bf16.gmra.mxu1 %v2192_v12 }
  0x6b   :  { %956 = vmatprep.mubr.bf16.mxu0 %v2194_v13  ;;  %1084 = vmatprep.mubr.bf16.mxu1 %v2196_v14 }
  0x72   :  { %957 = vmatmul.mubr.bf16.gmra.mxu0 %v2198_v15  ;;  %1085 = vmatmul.mubr.bf16.gmra.mxu1 %v2199_v16 }
  0x73   :  { %964 = vmatprep.mubr.bf16.mxu0 %v2200_v17  ;;  %1092 = vmatprep.mubr.bf16.mxu1 %v2202_v18 }
  0x7a   :  { %965 = vmatmul.mubr.bf16.gmra.mxu0 %v2204_v19  ;;  %1093 = vmatmul.mubr.bf16.gmra.mxu1 %v2205_v20 }
  0x7b   :  { %1100 = vmatprep.mubr.bf16.mxu1 %v2206_v21  ;;  %2051 = vmatprep.mubr.msk.bf16.mxu0 %vm795_vm0, %v2208_v22 }
  0x82   :  { %1101 = vmatmul.mubr.bf16.gmra.mxu1 %v2209_v23  ;;  %2052 = vmatmul.mubr.msk.bf16.vlgmr.msra.gmra.mxu0 %vm795_vm0, %v2210_v24 }
  0x83   :  { %1108 = vmatprep.mubr.bf16.mxu1 %v2211_v25  ;;  %2055 = vmatprep.mubr.msk.bf16.mxu0 %vm795_vm0, %v2213_v26 }
  0x8a   :  { %1109 = vmatmul.mubr.bf16.gmra.mxu1 %v2214_v27  ;;  %2056 = vmatmul.mubr.msk.bf16.gmra.mxu0 %vm795_vm0, %v2215_v28 }
  0x8b   :  { %1116 = vmatprep.mubr.bf16.mxu1 %v2216_v29  ;;  %2059 = vmatprep.mubr.msk.bf16.mxu0 %vm795_vm0, %v2218_v30 }
  0x92   :  { %1117 = vmatmul.mubr.bf16.gmra.mxu1 %v2219_v31  ;;  %2060 = vmatmul.mubr.msk.bf16.gmra.mxu0 %vm795_vm0, %v2220_v32 }
  0x93   :  { %1124 = vmatprep.mubr.bf16.mxu1 %v2221_v33  ;;  %2063 = vmatprep.mubr.msk.bf16.mxu0 %vm795_vm0, %v2223_v34 }
  0x9a   :  { %1125 = vmatmul.mubr.bf16.gmra.mxu1 %v2224_v35  ;;  %2064 = vmatmul.mubr.msk.bf16.gmra.mxu0 %vm795_vm0, %v2225_v36 }
  0x9b   :  { %1132 = vmatprep.mubr.bf16.mxu1 %v2226_v37  ;;  %2067 = vmatprep.mubr.msk.bf16.mxu0 %vm795_vm0, %v2228_v38  ;;  %v2654_v37 = vld [vmem:[%s2934_s2] ss:$0 sm:$0xff] }
  0xa2   :  { %1133 = vmatmul.mubr.bf16.gmra.mxu1 %v2229_v39  ;;  %2068 = vmatmul.mubr.msk.bf16.gmra.mxu0 %vm795_vm0, %v2230_v40 }
  0xa3   :  { %1140 = vmatprep.mubr.bf16.mxu1 %v2231_v41  ;;  %2071 = vmatprep.mubr.msk.bf16.mxu0 %vm795_vm0, %v2233_v42 }
  0xaa   :  { %1141 = vmatmul.mubr.bf16.gmra.mxu1 %v2234_v43  ;;  %2072 = vmatmul.mubr.msk.bf16.gmra.mxu0 %vm795_vm0, %v2235_v44 }
  0xab   :  { %1148 = vmatprep.mubr.bf16.mxu1 %v2236_v45  ;;  %2075 = vmatprep.mubr.msk.bf16.mxu0 %vm795_vm0, %v2238_v46 }
  0xb2   :  { %1149 = vmatmul.mubr.bf16.gmra.mxu1 %v2239_v48  ;;  %2076 = vmatmul.mubr.msk.bf16.gmra.mxu0 %vm795_vm0, %v2240_v49 }
  0xb3   :  { %1156 = vmatprep.mubr.bf16.mxu1 %v1594_v50  ;;  %2079 = vmatprep.mubr.msk.bf16.mxu0 %vm795_vm0, %v2242_v51 }
  0xba   :  { %1157 = vmatmul.mubr.bf16.gmra.mxu1 %v1593_v52  ;;  %2080 = vmatmul.mubr.msk.bf16.gmra.mxu0 %vm795_vm0, %v2244_v53 }
  0xe2   :  { %v1815_v54 = vpop.f32.mrf.mxu0  ;;  %v1887_v55 = vpop.f32.mrf.mxu1 }
  0xe4   :  { %v1816_v56 = vpop.f32.mrf.mxu0  ;;  %v1888_v57 = vpop.f32.mrf.mxu1 }
  0xe5   :  { %v1817_v58 = vadd.f32 %v1816_v56, %v1815_v54  ;;  %v2623_v59 = vadd.f32 %v1888_v57, %v1887_v55 }
  0xe6   :  { %v1818_v60 = vpop.f32.mrf.mxu0  ;;  %v1890_v61 = vpop.f32.mrf.mxu1 }
  0xe7   :  { %2936 = vst [vmem:[#allocation2_spill] sm:$0xff] %v2623_v59  ;;  %v879_v42 = vadd.f32 %v1817_v58, %v2654_v37 }
  0xe8   :  { %v1819_v62 = vpop.f32.mrf.mxu0  ;;  %v1891_v63 = vpop.f32.mrf.mxu1 }
  0xe9   :  { %v2625_v0 = vadd.f32 %v1819_v62, %v1818_v60  ;;  %v2627_v1 = vadd.f32 %v1891_v63, %v1890_v61 }
  0xea   :  { %v1821_v2 = vpop.f32.mrf.mxu0  ;;  %v1893_v3 = vpop.f32.mrf.mxu1 }
  0xeb   :  { %2937 = vst [vmem:[#allocation3_spill] sm:$0xff] %v2627_v1 }
  0xec   :  { %v1822_v4 = vpop.f32.mrf.mxu0  ;;  %v1894_v5 = vpop.f32.mrf.mxu1 }
  0xed   :  { %v2629_v6 = vadd.f32 %v1822_v4, %v1821_v2  ;;  %v2631_v7 = vadd.f32 %v1894_v5, %v1893_v3 }
  0xee   :  { %v1824_v8 = vpop.f32.mrf.mxu0  ;;  %v1896_v9 = vpop.f32.mrf.mxu1 }
  0xef   :  { %2938 = vst [vmem:[#allocation4_spill] sm:$0xff] %v2631_v7 }
  0xf0   :  { %v1825_v10 = vpop.f32.mrf.mxu0  ;;  %v1897_v11 = vpop.f32.mrf.mxu1 }
  0xf1   :  { %v2633_v12 = vadd.f32 %v1825_v10, %v1824_v8  ;;  %v2635_v13 = vadd.f32 %v1897_v11, %v1896_v9 }
  0xf2   :  { %v1827_v14 = vpop.f32.mrf.mxu0  ;;  %v1899_v15 = vpop.f32.mrf.mxu1 }
  0xf3   :  { %2939 = vst [vmem:[#allocation5_spill] sm:$0xff] %v2635_v13 }
  0xf4   :  { %v1828_v16 = vpop.f32.mrf.mxu0  ;;  %v1900_v17 = vpop.f32.mrf.mxu1 }
  0xf5   :  { %v2637_v18 = vadd.f32 %v1828_v16, %v1827_v14  ;;  %v2639_v19 = vadd.f32 %v1900_v17, %v1899_v15 }
  0xf6   :  { %v1830_v20 = vpop.f32.mrf.mxu0  ;;  %v1902_v21 = vpop.f32.mrf.mxu1 }
  0xf7   :  { %2940 = vst [vmem:[#allocation6_spill] sm:$0xff] %v2639_v19 }
  0xf8   :  { %v1831_v22 = vpop.f32.mrf.mxu0  ;;  %v1903_v23 = vpop.f32.mrf.mxu1 }
  0xf9   :  { %v2641_v24 = vadd.f32 %v1831_v22, %v1830_v20  ;;  %v2643_v25 = vadd.f32 %v1903_v23, %v1902_v21 }
  0xfa   :  { %v1833_v26 = vpop.f32.mrf.mxu0  ;;  %v1905_v27 = vpop.f32.mrf.mxu1 }
  0xfb   :  { %2941 = vst [vmem:[#allocation7_spill] sm:$0xff] %v2643_v25 }
  0xfc   :  { %v1834_v28 = vpop.f32.mrf.mxu0  ;;  %v1906_v29 = vpop.f32.mrf.mxu1 }
  0xfd   :  { %v2645_v30 = vadd.f32 %v1834_v28, %v1833_v26  ;;  %v2647_v31 = vadd.f32 %v1906_v29, %v1905_v27 }
  0xfe   :  { %v1836_v32 = vpop.f32.mrf.mxu0  ;;  %v1908_v33 = vpop.f32.mrf.mxu1 }
  0xff   :  { %2942 = vst [vmem:[#allocation8_spill] sm:$0xff] %v2647_v31 }
 0x100   :  { %v1837_v34 = vpop.f32.mrf.mxu0  ;;  %v1909_v35 = vpop.f32.mrf.mxu1 }
 0x101   :  { %v2649_v36 = vadd.f32 %v1837_v34, %v1836_v32 }
 0x102   :  { %v1839_v38 = vpop.f32.mrf.mxu0  ;;  %v1927_v39 = vpop.f32.mrf.mxu1 }
 0x104   :  { %v1840_v40 = vpop.f32.mrf.mxu0  ;;  %v1928_v41 = vpop.f32.mrf.mxu1 }
 0x105   :  { %v2657_v43 = vadd.f32 %v1840_v40, %v1839_v38  ;;  %v1929_v44 = vadd.f32 %v1928_v41, %v1927_v39 }
 0x106   :  { %v1842_v45 = vpop.f32.mrf.mxu0  ;;  %v2659_v46 = vpop.f32.mrf.mxu1 }
 0x107   :  { %v2661_v47 = vadd.f32 %v1929_v44, %v879_v42 }
 0x108   :  { %v1843_v48 = vpop.f32.mrf.mxu0  ;;  %v2663_v49 = vpop.f32.mrf.mxu1 }
 0x109   :  { %v2665_v50 = vadd.f32 %v1843_v48, %v1842_v45 }
 0x10a   :  { %v1845_v51 = vpop.f32.mrf.mxu0  ;;  %v1933_v52 = vpop.f32.mrf.mxu1 }
 0x10c   :  { %v1846_v53 = vpop.f32.mrf.mxu0  ;;  %v1934_v54 = vpop.f32.mrf.mxu1 }
 0x10d   :  { %v2667_v55 = vadd.f32 %v1846_v53, %v1845_v51  ;;  %v1935_v7 = vadd.f32 %v1934_v54, %v1933_v52  ;;  %v882_v54 = vadd.f32 %v2625_v0, %v2654_v37 }
 0x10e   :  { %v1848_v56 = vpop.f32.mrf.mxu0  ;;  %v1936_v57 = vpop.f32.mrf.mxu1 }
 0x110   :  { %v1849_v58 = vpop.f32.mrf.mxu0  ;;  %v1937_v60 = vpop.f32.mrf.mxu1 }
 0x111   :  { %v2669_v61 = vadd.f32 %v1849_v58, %v1848_v56 }
 0x112   :  { %v1851_v62 = vpop.f32.mrf.mxu0  ;;  %v2671_v63 = vpop.f32.mrf.mxu1 }
 0x114   :  { %v1852_v2 = vpop.f32.mrf.mxu0  ;;  %v2673_v3 = vpop.f32.mrf.mxu1 }
 0x115   :  { %v2675_v4 = vadd.f32 %v1852_v2, %v1851_v62 }
 0x116   :  { %v1854_v5 = vpop.f32.mrf.mxu0  ;;  %v2677_v8 = vpop.f32.mrf.mxu1 }
 0x118   :  { %v1855_v9 = vpop.f32.mrf.mxu0  ;;  %v2679_v10 = vpop.f32.mrf.mxu1 }
 0x119   :  { %v2681_v11 = vadd.f32 %v1855_v9, %v1854_v5 }
 0x11a   :  { %v2683_v14 = vpop.f32.mrf.mxu0  ;;  %v1945_v15 = vpop.f32.mrf.mxu1 }
 0x11c   :  { %v2685_v16 = vpop.f32.mrf.mxu0  ;;  %v1946_v17 = vpop.f32.mrf.mxu1 }
 0x11e   :  { %v2687_v20 = vpop.f32.mrf.mxu0  ;;  %v1948_v21 = vpop.f32.mrf.mxu1 }
 0x120   :  { %v2689_v22 = vpop.f32.mrf.mxu0  ;;  %v1949_v23 = vpop.f32.mrf.mxu1 }
 0x121   :  { %v1950_v0 = vadd.f32 %v1949_v23, %v1948_v21  ;;  %v898_v21 = vadd.f32 %v2641_v24, %v2654_v37 }
 0x122   :  { %v2691_v26 = vpop.f32.mrf.mxu0  ;;  %v2693_v27 = vpop.f32.mrf.mxu1 }
 0x124   :  { %v2695_v28 = vpop.f32.mrf.mxu0  ;;  %v2697_v29 = vpop.f32.mrf.mxu1 }
 0x125   :  { %2943 = vst [vmem:[#allocation9_spill] sm:$0xff] %v2695_v28 }
 0x126   :  { %v2699_v32 = vpop.f32.mrf.mxu0  ;;  %v2701_v33 = vpop.f32.mrf.mxu1 }
 0x127   :  { %2944 = vst [vmem:[#allocation10_spill] sm:$0xff] %v2699_v32 }
 0x128   :  { %v2703_v34 = vpop.f32.mrf.mxu0  ;;  %v2705_v35 = vpop.f32.mrf.mxu1 }
 0x129   :  { %2945 = vst [vmem:[#allocation11_spill] sm:$0xff] %v2703_v34 }
 0x12a   :  { %v2707_v38 = vpop.f32.mrf.mxu0  ;;  %v2709_v39 = vpop.f32.mrf.mxu1 }
 0x12c   :  { %v2711_v40 = vpop.f32.mrf.mxu0  ;;  %v2713_v41 = vpop.f32.mrf.mxu1 }
 0x12e   :  { %v2715_v42 = vpop.f32.mrf.mxu0  ;;  %v2717_v44 = vpop.f32.mrf.mxu1 }
 0x12f   :  { %2946 = vst [vmem:[#allocation12_spill] sm:$0xff] %v2715_v42 }
 0x130   :  { %v2719_v45 = vpop.f32.mrf.mxu0  ;;  %v2721_v48 = vpop.f32.mrf.mxu1 }
 0x131   :  { %2947 = vst [vmem:[#allocation13_spill] sm:$0xff] %v2719_v45 }
 0x132   :  { %v2723_v51 = vpop.f32.mrf.mxu0  ;;  %v2725_v53 = vpop.f32.mrf.mxu1 }
 0x133   :  { %2948 = vst [vmem:[#allocation14_spill] sm:$0xff] %v2723_v51  ;;  %v1938_v51 = vadd.f32 %v1937_v60, %v1936_v57  ;;  %v1947_v60 = vadd.f32 %v1946_v17, %v1945_v15  ;;  %v895_v15 = vadd.f32 %v2637_v18, %v2654_v37 }
 0x134   :  { %v2727_v56 = vpop.f32.mrf.mxu0  ;;  %v2729_v58 = vpop.f32.mrf.mxu1 }
 0x135   :  { %2949 = vst [vmem:[#allocation15_spill] sm:$0xff] %v2727_v56 }
 0x136   :  { %v2731_v62 = vpop.f32.mrf.mxu0  ;;  %v2733_v2 = vpop.f32.mrf.mxu1 }
 0x137   :  { %2950 = vst [vmem:[#allocation16_spill] sm:$0xff] %v2731_v62 }
 0x138   :  { %v2735_v5 = vpop.f32.mrf.mxu0  ;;  %v2737_v9 = vpop.f32.mrf.mxu1 }
 0x139   :  { %2951 = vst [vmem:[#allocation17_spill] sm:$0xff] %v2735_v5  ;;  %v887_v5 = vadd.f32 %v2629_v6, %v2654_v37 }
 0x13a   :  { %v2739_v31 = vpop.f32.mrf.mxu0  ;;  %v2741_v25 = vpop.f32.mrf.mxu1 }
 0x13b   :  { %2952 = vst [vmem:[#allocation18_spill] sm:$0xff] %v2739_v31  ;;  %v1047_v32 = vadd.f32 %v1935_v7, %v887_v5  ;;  %v1941_v7 = vadd.f32 %v2673_v3, %v2671_v63 }
 0x13c   :  { %v2743_v19 = vpop.f32.mrf.mxu0  ;;  %v2745_v1 = vpop.f32.mrf.mxu1 }
 0x13d   :  { %2953 = vst [vmem:[#allocation19_spill] sm:$0xff] %v2743_v19  ;;  %v890_v19 = vadd.f32 %v2633_v12, %v2654_v37 }
 0x13e   :  { %v2747_v13 = vpop.f32.mrf.mxu0  ;;  %v2749_v59 = vpop.f32.mrf.mxu1 }
 0x13f   :  { %2954 = vst [vmem:[#allocation20_spill] sm:$0xff] %v2747_v13  ;;  %v1932_v13 = vadd.f32 %v2663_v49, %v2659_v46  ;;  %v1050_v42 = vadd.f32 %v1938_v51, %v890_v19  ;;  %v903_v46 = vadd.f32 %v2645_v30, %v2654_v37 }
 0x140   :  { %v2751_v62 = vpop.f32.mrf.mxu0  ;;  %v2753_v56 = vpop.f32.mrf.mxu1 }
 0x141   :  { %2955 = vst [vmem:[#allocation21_spill] sm:$0xff] %v2751_v62  ;;  %v1042_v12 = vadd.f32 %v1932_v13, %v882_v54  ;;  %v1944_v13 = vadd.f32 %v2679_v10, %v2677_v8  ;;  %v1063_v51 = vadd.f32 %v1947_v60, %v903_v46  ;;  %v1055_v8 = vadd.f32 %v1941_v7, %v895_v15 }
 0x142   :  { %v2757_v31 = vpop.f32.mrf.mxu1  ;;  %v2053_v34 = vpop.f32.mrf.mxu0  ;;  %v919_v60 = vadd.f32 %v2667_v55, %v2654_v37  ;;  %v1956_v55 = vadd.f32 %v2705_v35, %v2701_v33 }
 0x143   :  { %2956 = vst [vmem:[#allocation22_spill] sm:$0xff] %v2757_v31  ;;  %v1207_v62 = vadd.f32 %v2053_v34, %v1047_v32 }
 0x144   :  { %v2763_v45 = vpop.f32.mrf.mxu1  ;;  %v1198_v52 = vpop.f32.mrf.mxu0 }
 0x145   :  { %v1199_v31 = vadd.f32 %v1198_v52, %v2661_v47  ;;  %v1326_v32 = vmax.f32 %v1207_v62, 0.0  ;;  %v906_v47 = vadd.f32 %v2649_v36, %v2654_v37  ;;  %v1959_v52 = vadd.f32 %v2713_v41, %v2709_v39 }
 0x146   :  { %v2767_v6 = vpop.f32.mrf.mxu1  ;;  %v2054_v57 = vpop.f32.mrf.mxu0 }
 0x147   :  { %v1210_v28 = vadd.f32 %v2054_v57, %v1050_v42  ;;  %v1324_v63 = vmax.f32 %v1199_v31, 0.0  ;;  %v1066_v10 = vadd.f32 %v1950_v0, %v906_v47  ;;  %v1058_v57 = vadd.f32 %v1944_v13, %v898_v21 }
 0x148   :  { %v2774_v49 = vpop.f32.mrf.mxu1  ;;  %v1201_v5 = vpop.f32.mrf.mxu0  ;;  %v1079_v13 = vadd.f32 %v1959_v52, %v919_v60  ;;  %v1968_v52 = vadd.f32 %v2737_v9, %v2733_v2 }
 0x149   :  { %v1327_v19 = vmax.f32 %v1210_v28, 0.0  ;;  %v1202_v34 = vadd.f32 %v1201_v5, %v1042_v12  ;;  %v1953_v12 = vadd.f32 %v2697_v29, %v2693_v27  ;;  %v1962_v5 = vadd.f32 %v2721_v48, %v2717_v44 }
 0x14a   :  { %v2782_v30 = vpop.f32.mrf.mxu1  ;;  %v2057_v17 = vpop.f32.mrf.mxu0  ;;  %v914_v44 = vadd.f32 %v2665_v50, %v2654_v37  ;;  %v1859_v48 = vadd.f32 %v2685_v16, %v2683_v14  ;;  %v1971_v14 = vadd.f32 %v2745_v1, %v2741_v25 }
 0x14b   :  { %v1718_v3 = vpack.c.bf16 %v1327_v19, %v1326_v32  ;;  %v1325_v42 = vmax.f32 %v1202_v34, 0.0  ;;  %v1223_v36 = vadd.f32 %v2057_v17, %v1063_v51  ;;  %v911_v32 = vadd.f32 %v2657_v43, %v2654_v37 }
 0x14c   :  { %v2786_v23 = vpop.f32.mrf.mxu1  ;;  %v1214_v28 = vpop.f32.mrf.mxu0  ;;  %v922_v19 = vadd.f32 %v2669_v61, %v2654_v37  ;;  %v1074_v21 = vadd.f32 %v1956_v55, %v914_v44  ;;  %v2962_v44 = vld [vmem:[#allocation22_spill] sm:$0xff] }
 0x14d   :  { %1785 = vst [vmem:[%s2935_s3 + $0x8] sm:$0xff] %v1718_v3   ;;  %v1713_v18 = vpack.c.bf16 %v1325_v42, %v1324_v63  ;;  %v1215_v24 = vadd.f32 %v1214_v28, %v1055_v8  ;;  %v1330_v39 = vmax.f32 %v1223_v36, 0.0  ;;  %v1071_v35 = vadd.f32 %v1953_v12, %v911_v32  ;;  %v2959_v32 = vld [vmem:[#allocation13_spill] sm:$0xff] }
 0x14e   :  { %v2791_v62 = vpop.f32.mrf.mxu1  ;;  %v2058_v31 = vpop.f32.mrf.mxu0  ;;  %v1082_v63 = vadd.f32 %v1962_v5, %v922_v19  ;;  %v1862_v3 = vadd.f32 %v2689_v22, %v2687_v20  ;;  %v935_v28 = vadd.f32 %v1859_v48, %v2654_v37  ;;  %v1974_v22 = vadd.f32 %v2753_v56, %v2749_v59 }
 0x14f   :  { %1714 = vst [vmem:[%s2935_s3] sm:$0xff] %v1713_v18   ;;  %v1226_v54 = vadd.f32 %v2058_v31, %v1066_v10  ;;  %v1328_v29 = vmax.f32 %v1215_v24, 0.0  ;;  %v1965_v18 = vadd.f32 %v2729_v58, %v2725_v53  ;;  %v927_v10 = vadd.f32 %v2675_v4, %v2654_v37 }
 0x150   :  { %v2802_v46 = vpop.f32.mrf.mxu1  ;;  %v1217_v7 = vpop.f32.mrf.mxu0  ;;  %v938_v31 = vadd.f32 %v1862_v3, %v2654_v37  ;;  %v1095_v60 = vadd.f32 %v1971_v14, %v935_v28  ;;  %v930_v59 = vadd.f32 %v2681_v11, %v2654_v37  ;;  %v1871_v56 = vadd.f32 %v2711_v40, %v2707_v38 }
 0x151   :  { %v1331_v41 = vmax.f32 %v1226_v54, 0.0  ;;  %v1218_v0 = vadd.f32 %v1217_v7, %v1058_v57  ;;  %v1087_v9 = vadd.f32 %v1965_v18, %v927_v10  ;;  %v1983_v38 = vadd.f32 %v2786_v23, %v2782_v30  ;;  %v2965_v10 = vld [vmem:[#allocation14_spill] sm:$0xff] }
 0x152   :  { %v2812_v34 = vpop.f32.mrf.mxu1  ;;  %v2061_v27 = vpop.f32.mrf.mxu0  ;;  %v1098_v5 = vadd.f32 %v1974_v22, %v938_v31  ;;  %v1977_v48 = vadd.f32 %v2763_v45, %v2962_v44  ;;  %v1986_v30 = vadd.f32 %v2802_v46, %v2791_v62  ;;  %v2964_v62 = vld [vmem:[#allocation19_spill] sm:$0xff] }
 0x153   :  { %v1728_v15 = vpack.c.bf16 %v1331_v41, %v1330_v39  ;;  %v1329_v47 = vmax.f32 %v1218_v0, 0.0  ;;  %v1239_v33 = vadd.f32 %v2061_v27, %v1079_v13  ;;  %v2957_v39 = vld [vmem:[#allocation9_spill] sm:$0xff]  ;;  %v2958_v0 = vld [vmem:[#allocation12_spill] sm:$0xff]  ;;  %v2966_v31 = vld [vmem:[#allocation15_spill] sm:$0xff] }
 0x154   :  { %v2818_v43 = vpop.f32.mrf.mxu1  ;;  %v1230_v17 = vpop.f32.mrf.mxu0  ;;  %v1865_v41 = vadd.f32 %v2957_v39, %v2691_v26  ;;  %v1874_v19 = vadd.f32 %v2959_v32, %v2958_v0  ;;  %v951_v26 = vadd.f32 %v1871_v56, %v2654_v37 }
 0x155   :  { %1787 = vst [vmem:[%s2935_s3 + $0x18] sm:$0xff] %v1728_v15   ;;  %v1723_v61 = vpack.c.bf16 %v1329_v47, %v1328_v29  ;;  %v1231_v16 = vadd.f32 %v1230_v17, %v1071_v35  ;;  %v1334_v8 = vmax.f32 %v1239_v33, 0.0  ;;  %v1090_v29 = vadd.f32 %v1968_v52, %v930_v59  ;;  %v2960_v15 = vld [vmem:[#allocation10_spill] sm:$0xff]  ;;  %v2961_v47 = vld [vmem:[#allocation11_spill] sm:$0xff] }
 0x156   :  { %v2825_v42 = vpop.f32.mrf.mxu1  ;;  %v2062_v50 = vpop.f32.mrf.mxu0  ;;  %v1868_v13 = vadd.f32 %v2961_v47, %v2960_v15  ;;  %v954_v3 = vadd.f32 %v1874_v19, %v2654_v37  ;;  %v1111_v28 = vadd.f32 %v1983_v38, %v951_v26  ;;  %v1877_v52 = vadd.f32 %v2966_v31, %v2965_v10 }
 0x157   :  { %1786 = vst [vmem:[%s2935_s3 + $0x10] sm:$0xff] %v1723_v61   ;;  %v1242_v51 = vadd.f32 %v2062_v50, %v1082_v63  ;;  %v1332_v53 = vmax.f32 %v1231_v16, 0.0  ;;  %v943_v63 = vadd.f32 %v1865_v41, %v2654_v37  ;;  %v1980_v50 = vadd.f32 %v2774_v49, %v2767_v6 }
 0x158   :  { %v2835_v36 = vpop.f32.mrf.mxu1  ;;  %v1233_v20 = vpop.f32.mrf.mxu0  ;;  %v946_v18 = vadd.f32 %v1868_v13, %v2654_v37  ;;  %v1114_v49 = vadd.f32 %v1986_v30, %v954_v3  ;;  %v1989_v41 = vadd.f32 %v2818_v43, %v2812_v34  ;;  %v959_v38 = vadd.f32 %v1877_v52, %v2654_v37  ;;  %v2971_v3 = vld [vmem:[#allocation4_spill] sm:$0xff] }
 0x159   :  { %v1335_v1 = vmax.f32 %v1242_v51, 0.0  ;;  %v1234_v25 = vadd.f32 %v1233_v20, %v1074_v21  ;;  %v2963_v20 = vld [vmem:[#allocation18_spill] sm:$0xff]  ;;  %v1103_v6 = vadd.f32 %v1977_v48, %v943_v63 }
 0x15a   :  { %v1993_v24 = vpop.f32.mrf.mxu1  ;;  %v2065_v54 = vpop.f32.mrf.mxu0  ;;  %v1883_v46 = vadd.f32 %v2964_v62, %v2963_v20  ;;  %v2972_v62 = vld [vmem:[#allocation2_spill] sm:$0xff] }
 0x15b   :  { %v1738_v58 = vpack.c.bf16 %v1335_v1, %v1334_v8  ;;  %v1333_v57 = vmax.f32 %v1234_v25, 0.0  ;;  %v1255_v2 = vadd.f32 %v2065_v54, %v1095_v60  ;;  %v2967_v54 = vld [vmem:[#allocation20_spill] sm:$0xff] }
 0x15c   :  { %v1994_v12 = vpop.f32.mrf.mxu1  ;;  %v1246_v7 = vpop.f32.mrf.mxu0  ;;  %v967_v39 = vadd.f32 %v1883_v46, %v2654_v37  ;;  %v975_v46 = vadd.f32 %v2972_v62, %v2654_v37 }
 0x15d   :  { %1789 = vst [vmem:[%s2935_s3 + $0x28] sm:$0xff] %v1738_v58   ;;  %v1733_v4 = vpack.c.bf16 %v1333_v57, %v1332_v53  ;;  %v1247_v40 = vadd.f32 %v1246_v7, %v1087_v9  ;;  %v1338_v23 = vmax.f32 %v1255_v2, 0.0  ;;  %v2968_v53 = vld [vmem:[#allocation21_spill] sm:$0xff]  ;;  %v1995_v59 = vadd.f32 %v1994_v12, %v1993_v24  ;;  %v2969_v2 = vld [vmem:[#allocation16_spill] sm:$0xff] }
 0x15e   :  { %v1996_v11 = vpop.f32.mrf.mxu1  ;;  %v2066_v55 = vpop.f32.mrf.mxu0  ;;  %v1886_v58 = vadd.f32 %v2968_v53, %v2967_v54  ;;  %v2970_v9 = vld [vmem:[#allocation17_spill] sm:$0xff] }
 0x15f   :  { %1788 = vst [vmem:[%s2935_s3 + $0x20] sm:$0xff] %v1733_v4   ;;  %v1258_v27 = vadd.f32 %v2066_v55, %v1098_v5  ;;  %v1336_v51 = vmax.f32 %v1247_v40, 0.0  ;;  %v1106_v4 = vadd.f32 %v1980_v50, %v946_v18  ;;  %v1880_v5 = vadd.f32 %v2970_v9, %v2969_v2 }
 0x160   :  { %v1997_v17 = vpop.f32.mrf.mxu1  ;;  %v1249_v61 = vpop.f32.mrf.mxu0  ;;  %v970_v40 = vadd.f32 %v1886_v58, %v2654_v37  ;;  %v1127_v44 = vadd.f32 %v1995_v59, %v967_v39  ;;  %v983_v50 = vadd.f32 %v2971_v3, %v2654_v37 }
 0x161   :  { %v1339_v33 = vmax.f32 %v1258_v27, 0.0  ;;  %v1250_v35 = vadd.f32 %v1249_v61, %v1090_v29  ;;  %v1998_v19 = vadd.f32 %v1997_v17, %v1996_v11  ;;  %v1992_v27 = vadd.f32 %v2835_v36, %v2825_v42 }
 0x162   :  { %v1999_v14 = vpop.f32.mrf.mxu1  ;;  %v2069_v16 = vpop.f32.mrf.mxu0  ;;  %v962_v34 = vadd.f32 %v1880_v5, %v2654_v37  ;;  %v1119_v61 = vadd.f32 %v1989_v41, %v959_v38 }
 0x163   :  { %v1748_v21 = vpack.c.bf16 %v1339_v33, %v1338_v23  ;;  %v1337_v45 = vmax.f32 %v1250_v35, 0.0  ;;  %v1271_v25 = vadd.f32 %v2069_v16, %v1111_v28  ;;  %v1130_v30 = vadd.f32 %v1998_v19, %v970_v40 }
 0x164   :  { %v2000_v22 = vpop.f32.mrf.mxu1  ;;  %v1262_v8 = vpop.f32.mrf.mxu0  ;;  %v1122_v63 = vadd.f32 %v1992_v27, %v962_v34 }
 0x165   :  { %1791 = vst [vmem:[%s2935_s3 + $0x38] sm:$0xff] %v1748_v21   ;;  %v1743_v1 = vpack.c.bf16 %v1337_v45, %v1336_v51  ;;  %v1263_v56 = vadd.f32 %v1262_v8, %v1103_v6  ;;  %v1342_v55 = vmax.f32 %v1271_v25, 0.0  ;;  %v2001_v16 = vadd.f32 %v2000_v22, %v1999_v14  ;;  %v2973_v8 = vld [vmem:[#allocation5_spill] sm:$0xff]  ;;  %v2974_v14 = vld [vmem:[#allocation3_spill] sm:$0xff] }
 0x166   :  { %v2002_v57 = vpop.f32.mrf.mxu1  ;;  %v2070_v60 = vpop.f32.mrf.mxu0  ;;  %v978_v22 = vadd.f32 %v2974_v14, %v2654_v37 }
 0x167   :  { %1790 = vst [vmem:[%s2935_s3 + $0x30] sm:$0xff] %v1743_v1   ;;  %v1274_v7 = vadd.f32 %v2070_v60, %v1114_v49  ;;  %v1340_v47 = vmax.f32 %v1263_v56, 0.0  ;;  %v986_v1 = vadd.f32 %v2973_v8, %v2654_v37  ;;  %v1135_v56 = vadd.f32 %v2001_v16, %v975_v46 }
 0x168   :  { %v2003_v0 = vpop.f32.mrf.mxu1  ;;  %v1265_v32 = vpop.f32.mrf.mxu0 }
 0x169   :  { %v1343_v24 = vmax.f32 %v1274_v7, 0.0  ;;  %v1266_v12 = vadd.f32 %v1265_v32, %v1106_v4  ;;  %v2004_v25 = vadd.f32 %v2003_v0, %v2002_v57 }
 0x16a   :  { %v2005_v29 = vpop.f32.mrf.mxu1  ;;  %v2073_v15 = vpop.f32.mrf.mxu0 }
 0x16b   :  { %v1758_v13 = vpack.c.bf16 %v1343_v24, %v1342_v55  ;;  %v1341_v26 = vmax.f32 %v1266_v12, 0.0  ;;  %v1287_v17 = vadd.f32 %v2073_v15, %v1127_v44  ;;  %v1138_v5 = vadd.f32 %v2004_v25, %v978_v22  ;;  %v2975_v24 = vld [vmem:[#allocation6_spill] sm:$0xff] }
 0x16c   :  { %v2006_v43 = vpop.f32.mrf.mxu1  ;;  %v1278_v11 = vpop.f32.mrf.mxu0  ;;  %v991_v12 = vadd.f32 %v2975_v24, %v2654_v37 }
 0x16d   :  { %1793 = vst [vmem:[%s2935_s3 + $0x48] sm:$0xff] %v1758_v13   ;;  %v1753_v48 = vpack.c.bf16 %v1341_v26, %v1340_v47  ;;  %v2007_v36 = vadd.f32 %v2006_v43, %v2005_v29  ;;  %v1279_v33 = vadd.f32 %v1278_v11, %v1119_v61  ;;  %v1346_v45 = vmax.f32 %v1287_v17, 0.0  ;;  %v2976_v13 = vld [vmem:[#allocation7_spill] sm:$0xff]  ;;  %v2977_v43 = vld [vmem:[#allocation8_spill] sm:$0xff] }
 0x16e   :  { %v2008_v23 = vpop.f32.mrf.mxu1  ;;  %v2074_v42 = vpop.f32.mrf.mxu0  ;;  %v994_v26 = vadd.f32 %v2976_v13, %v2654_v37  ;;  %v999_v11 = vadd.f32 %v2977_v43, %v2654_v37 }
 0x16f   :  { %1792 = vst [vmem:[%s2935_s3 + $0x40] sm:$0xff] %v1753_v48   ;;  %v1290_v35 = vadd.f32 %v2074_v42, %v1130_v30  ;;  %v1344_v10 = vmax.f32 %v1279_v33, 0.0  ;;  %v1143_v54 = vadd.f32 %v2007_v36, %v983_v50 }
 0x170   :  { %v2009_v51 = vpop.f32.mrf.mxu1  ;;  %v1281_v21 = vpop.f32.mrf.mxu0 }
 0x171   :  { %v1347_v28 = vmax.f32 %v1290_v35, 0.0  ;;  %v2010_v18 = vadd.f32 %v2009_v51, %v2008_v23  ;;  %v1282_v20 = vadd.f32 %v1281_v21, %v1122_v63 }
 0x172   :  { %v2011_v6 = vpop.f32.mrf.mxu1  ;;  %v2077_v49 = vpop.f32.mrf.mxu0 }
 0x173   :  { %v1768_v31 = vpack.c.bf16 %v1347_v28, %v1346_v45  ;;  %v1345_v52 = vmax.f32 %v1282_v20, 0.0  ;;  %v1303_v59 = vadd.f32 %v2077_v49, %v1143_v54  ;;  %v1146_v7 = vadd.f32 %v2010_v18, %v986_v1 }
 0x174   :  { %v2012_v53 = vpop.f32.mrf.mxu1  ;;  %v1294_v58 = vpop.f32.mrf.mxu0 }
 0x175   :  { %1795 = vst [vmem:[%s2935_s3 + $0x58] sm:$0xff] %v1768_v31   ;;  %v1763_v60 = vpack.c.bf16 %v1345_v52, %v1344_v10  ;;  %v1295_v2 = vadd.f32 %v1294_v58, %v1135_v56  ;;  %v1350_v0 = vmax.f32 %v1303_v59, 0.0  ;;  %v2013_v32 = vadd.f32 %v2012_v53, %v2011_v6 }
 0x176   :  { %v2014_v57 = vpop.f32.mrf.mxu1  ;;  %v2078_v4 = vpop.f32.mrf.mxu0 }
 0x177   :  { %1794 = vst [vmem:[%s2935_s3 + $0x50] sm:$0xff] %v1763_v60   ;;  %v1306_v9 = vadd.f32 %v2078_v4, %v1146_v7  ;;  %v1348_v27 = vmax.f32 %v1295_v2, 0.0  ;;  %v1151_v61 = vadd.f32 %v2013_v32, %v991_v12 }
 0x178   :  { %v2015_v39 = vpop.f32.mrf.mxu1  ;;  %v1297_v41 = vpop.f32.mrf.mxu0 }
 0x179   :  { %v1351_v19 = vmax.f32 %v1306_v9, 0.0  ;;  %v1298_v55 = vadd.f32 %v1297_v41, %v1138_v5  ;;  %v2016_v15 = vadd.f32 %v2015_v39, %v2014_v57 }
 0x17a   :  { %v2017_v38 = vpop.f32.mrf.mxu1  ;;  %v2081_v40 = vpop.f32.mrf.mxu0 }
 0x17b   :  { %v1778_v29 = vpack.c.bf16 %v1351_v19, %v1350_v0  ;;  %v1349_v47 = vmax.f32 %v1298_v55, 0.0  ;;  %v1154_v33 = vadd.f32 %v2016_v15, %v994_v26 }
 0x17c   :  { %v2018_v44 = vpop.f32.mrf.mxu1  ;;  %v1310_v34 = vpop.f32.mrf.mxu0 }
 0x17d   :  { %1797 = vst [vmem:[%s2935_s3 + $0x68] sm:$0xff] %v1778_v29   ;;  %v1773_v48 = vpack.c.bf16 %v1349_v47, %v1348_v27  ;;  %v2019_v17 = vadd.f32 %v2018_v44, %v2017_v38  ;;  %v1311_v36 = vadd.f32 %v1310_v34, %v1151_v61 }
 0x17e   :  { %v2020_v30 = vpop.f32.mrf.mxu1  ;;  %v2082_v23 = vpop.f32.mrf.mxu0 }
 0x17f   :  { %1796 = vst [vmem:[%s2935_s3 + $0x60] sm:$0xff] %v1773_v48   ;;  %v1159_v42 = vadd.f32 %v2019_v17, %v999_v11  ;;  %v1352_v16 = vmax.f32 %v1311_v36, 0.0 }
 0x180   :  { %v2021_v35 = vpop.f32.mrf.mxu1  ;;  %v1313_v63 = vpop.f32.mrf.mxu0 }
 0x181   :  { %v1319_v3 = vadd.f32 %v2081_v40, %v1159_v42  ;;  %v1314_v37 = vadd.f32 %v1313_v63, %v1154_v33 }
 0x183   :  { %v1354_v50 = vmax.f32 %v1319_v3, 0.0  ;;  %v1353_v51 = vmax.f32 %v1314_v37, 0.0 }
 0x185   :  { %v1709_v21 = vpack.c.bf16 %v1354_v50, %v1354_v50  ;;  %v1783_v45 = vpack.c.bf16 %v1353_v51, %v1352_v16 }
 0x187   :  { %1510 = vst [vmem:[%s2935_s3 + $0x78] sm:$0x1] %v1709_v21  ;;  %1798 = vst [vmem:[%s2935_s3 + $0x70] sm:$0xff] %v1783_v45  }

// kernel: forward.5
= control target key start
LH: loop header
LB: loop body
LE: loop exit
PB: predicated region body
PF: predicated region fallthrough
CT: control target
= control target key end

     0   :  { %vm228_vm0 = vcmask 261120   ;;  %vm528_vm1 = vcmask 523264   ;;  %vm4386_vm2 = vmmov 0   ;;  %s4388_s19 = smov 64   ;;  %s4389_s20 = smov 32   ;;  %vm3243_vm3 = vcmask 15360   ;;  %s5430_s1 = inlined_call_operand.vmem [shape: bf16[288,64], index: 1, kind: input, shape index: {}]   ;;  %s5431_s0 = inlined_call_operand.vmem [shape: bf16[9,32,288], index: 0, kind: input, shape index: {}]   ;;  %s5432_s3 = inlined_call_operand.vmem [shape: bf16[576,128], index: 3, kind: input, shape index: {}]   ;;  %s5433_s2 = inlined_call_operand.vmem [shape: f32[1,64], index: 2, kind: input, shape index: {}]   ;;  %s5434_s5 = inlined_call_operand.vmem [shape: bf16[128,128], index: 5, kind: input, shape index: {}]   ;;  %s5435_s7 = inlined_call_operand.vmem [shape: bf16[2,32,128], index: 7, kind: input, shape index: {}]   ;;  %s5436_s4 = inlined_call_operand.vmem [shape: f32[1,128], index: 4, kind: input, shape index: {}]   ;;  %s5437_s8 = inlined_call_operand.vmem [shape: f32[2,1,128], index: 8, kind: input, shape index: {}]   ;;  %s5438_s6 = inlined_call_operand.vmem [shape: bf16[1,32,128], index: 6, kind: input, shape index: {}]   ;;  %s5439_s9 = inlined_call_operand.vmem [shape: bf16[32,2], index: 9, kind: input, shape index: {}]   ;;  %s5440_s10 = inlined_call_operand.vmem [shape: f32[1,2], index: 10, kind: input, shape index: {}]   ;;  %s5441_s11 = inlined_call_operand.vmem [shape: f32[8,2], index: 11, kind: output, shape index: {}]  }
   0x1   :  { %v4453_v0 = vld [vmem:[%s5430_s1 + $0x78] sm:$0xff]   ;;  %v4458_v1 = vld [vmem:[%s5430_s1 + $0x88] sm:$0xff]   ;;  %v4470_v3 = vld [vmem:[%s5430_s1 + $0x70] sm:$0xff]  }
   0x2   :  { %3508 = vmatprep.subr.bf16.mxu0 %v4453_v0  ;;  %v4464_v2 = vld [vmem:[%s5430_s1 + $0x38] sm:$0xff]   ;;  %3891 = vmatprep.subr.bf16.mxu1 %v4458_v1  ;;  %v4477_v4 = vld [vmem:[%s5430_s1 + $0x80] sm:$0xff]   ;;  %v4483_v5 = vld [vmem:[%s5430_s1 + $0x30] sm:$0xff]  }
   0x3   :  { %3509 = vmatpush3.bf16.msra.mxu0 %v4464_v2  ;;  %3892 = vmatpush3.bf16.msra.mxu1 %v4458_v1  ;;  %v4182_v6 = vld [vmem:[%s5431_s0 + $0x8] ss:$12 sps:$4 sm:$0xff]   ;;  %v4184_v8 = vld [vmem:[%s5431_s0 + $0x20] ss:$12 sps:$4 sm:$0xff]   ;;  %v4525_v12 = vld [vmem:[%s5430_s1 + $0x58] sm:$0xff]  }
   0x4   :  { %3510 = vmatprep.subr.bf16.mxu0 %v4470_v3  ;;  %3893 = vmatprep.subr.bf16.mxu1 %v4477_v4  ;;  %v4492_v7 = vld [vmem:[%s5430_s1 + $0x68] sm:$0xff]   ;;  %v4510_v10 = vld [vmem:[%s5430_s1 + $0x60] sm:$0xff]   ;;  %v4532_v13 = vld [vmem:[%s5430_s1 + $0x18] sm:$0xff]  }
   0x5   :  { %3895 = vmatprep.mubr.msk.bf16.mxu1 %vm228_vm0, %v4182_v6  ;;  %v4504_v9 = vld [vmem:[%s5430_s1 + $0x28] sm:$0xff]   ;;  %v4518_v11 = vld [vmem:[%s5430_s1 + $0x20] sm:$0xff]   ;;  %v4539_v14 = vld [vmem:[%s5430_s1 + $0x50] sm:$0xff]  }
   0x6   :  { %v4544_v15 = vld [vmem:[%s5430_s1 + $0x10] sm:$0xff]   ;;  %v4551_v16 = vld [vmem:[%s5430_s1 + $0x48] sm:$0xff]   ;;  %v4573_v20 = vld [vmem:[%s5430_s1 + $0x40] sm:$0xff]  }
   0x7   :  { %3511 = vmatpush3.bf16.msra.mxu0 %v4483_v5  ;;  %3894 = vmatpush3.bf16.msra.mxu1 %v4477_v4  ;;  %v4198_v17 = vld [vmem:[%s5431_s0 + $0x4] ss:$12 sps:$4 sm:$0xff]   ;;  %v4203_v18 = vld [vmem:[%s5431_s0 + $0x34] ss:$12 sps:$4 sm:$0xff]   ;;  %v4566_v19 = vld [vmem:[%s5430_s1 + $0x8] sm:$0xff]  }
   0x8   :  { %3512 = vmatprep.subr.bf16.mxu0 %v4492_v7  ;;  %3540 = vmatprep.subr.bf16.mxu1 %v4453_v0  ;;  %v4578_v21 = vld [vmem:[%s5430_s1] sm:$0xff]   ;;  %v4199_v23 = vld [vmem:[%s5431_s0 + $0x1c] ss:$12 sps:$4 sm:$0xff]   ;;  %v4205_v26 = vld [vmem:[%s5431_s0 + $0x4c] ss:$12 sps:$4 sm:$0xff]  }
   0x9   :  { %267 = vmatprep.mubr.bf16.mxu0 %v4198_v17  ;;  %v4196_v22 = vld [vmem:[%s5431_s0] ss:$12 sps:$4 sm:$0xff]   ;;  %v4201_v24 = vld [vmem:[%s5431_s0 + $0x30] ss:$12 sps:$4 sm:$0xff]   ;;  %v4204_v25 = vld [vmem:[%s5431_s0 + $0x18] ss:$12 sps:$4 sm:$0xff]  }
   0xa   :  { %3896 = vmatmul.mubr.msk.bf16.vlgmr.msra.gmra.mxu1 %vm228_vm0, %v4184_v8  ;;  %v4207_v27 = vld [vmem:[%s5431_s0 + $0x38] ss:$12 sps:$4 sm:$0xff]   ;;  %v4208_v28 = vld [vmem:[%s5431_s0 + $0x48] ss:$12 sps:$4 sm:$0xff]   ;;  %v4209_v29 = vld [vmem:[%s5431_s0 + $0x50] ss:$12 sps:$4 sm:$0xff]  }
   0xb   :  { %3513 = vmatpush3.bf16.msra.mxu0 %v4504_v9  ;;  %3541 = vmatpush3.bf16.msra.mxu1 %v4464_v2  ;;  %v4210_v30 = vld [vmem:[%s5432_s3 + $0x18] sm:$0xff]   ;;  %v4211_v31 = vld [vmem:[%s5432_s3 + $0x10] sm:$0xff]   ;;  %v4213_v33 = vld [vmem:[%s5432_s3 + $0x8] sm:$0xff]  }
   0xc   :  { %3514 = vmatprep.subr.bf16.mxu0 %v4510_v10  ;;  %3542 = vmatprep.subr.bf16.mxu1 %v4470_v3  ;;  %v4212_v32 = vld [vmem:[%s5432_s3 + $0x38] sm:$0xff]   ;;  %v4214_v34 = vld [vmem:[%s5432_s3 + $0x30] sm:$0xff]   ;;  %v4215_v35 = vld [vmem:[%s5432_s3] sm:$0xff]  }
   0xd   :  { %424 = vmatprep.mubr.bf16.mxu1 %v4203_v18  ;;  %v4216_v36 = vld [vmem:[%s5432_s3 + $0x28] sm:$0xff]   ;;  %v4217_v37 = vld [vmem:[%s5432_s3 + $0x20] sm:$0xff]  }
   0xe   :  { %v4649_v42 = vld [vmem:[%s5433_s2] ss:$0 sm:$0xff] }
   0xf   :  { %3515 = vmatpush3.bf16.msra.mxu0 %v4518_v11  ;;  %3543 = vmatpush3.bf16.msra.mxu1 %v4483_v5 }
  0x10   :  { %3516 = vmatprep.subr.bf16.mxu0 %v4525_v12  ;;  %3544 = vmatprep.subr.bf16.mxu1 %v4492_v7 }
  0x13   :  { %3517 = vmatpush3.bf16.msra.mxu0 %v4532_v13  ;;  %3545 = vmatpush3.bf16.msra.mxu1 %v4504_v9 }
  0x14   :  { %3518 = vmatprep.subr.bf16.mxu0 %v4539_v14  ;;  %3546 = vmatprep.subr.bf16.mxu1 %v4510_v10 }
  0x17   :  { %3519 = vmatpush3.bf16.msra.mxu0 %v4544_v15  ;;  %3547 = vmatpush3.bf16.msra.mxu1 %v4518_v11 }
  0x18   :  { %3520 = vmatprep.subr.bf16.mxu0 %v4551_v16  ;;  %3548 = vmatprep.subr.bf16.mxu1 %v4525_v12 }
  0x1b   :  { %3521 = vmatpush3.bf16.msra.mxu0 %v4566_v19  ;;  %3549 = vmatpush3.bf16.msra.mxu1 %v4532_v13 }
  0x1c   :  { %3522 = vmatprep.subr.bf16.mxu0 %v4573_v20  ;;  %3550 = vmatprep.subr.bf16.mxu1 %v4539_v14 }
  0x1f   :  { %3523 = vmatpush3.bf16.msra.mxu0 %v4578_v21  ;;  %3551 = vmatpush3.bf16.msra.mxu1 %v4544_v15 }
  0x20   :  { %3552 = vmatprep.subr.bf16.mxu1 %v4551_v16  ;;  %3899 = vmatprep.subr.bf16.mxu0 %v4458_v1 }
  0x22   :  { %268 = vmatmul.mubr.bf16.vlgmr.msra.gmra.mxu0 %v4196_v22 }
  0x23   :  { %3553 = vmatpush3.bf16.msra.mxu1 %v4566_v19  ;;  %3900 = vmatpush3.bf16.msra.mxu0 %v4458_v1 }
  0x24   :  { %3554 = vmatprep.subr.bf16.mxu1 %v4573_v20  ;;  %275 = vmatprep.mubr.bf16.mxu0 %v4199_v23 }
  0x25   :  { %3901 = vmatprep.subr.bf16.mxu0 %v4477_v4 }
  0x27   :  { %3555 = vmatpush3.bf16.msra.mxu1 %v4578_v21  ;;  %3902 = vmatpush3.bf16.msra.mxu0 %v4477_v4 }
  0x28   :  { %3919 = vmatprep.subr.bf16.mxu0 %v4210_v30  ;;  %3907 = vmatprep.subr.bf16.mxu1 %v4212_v32 }
  0x2a   :  { %276 = vmatmul.mubr.bf16.gmra.mxu0 %v4204_v25  ;;  %425 = vmatmul.mubr.bf16.vlgmr.msra.gmra.mxu1 %v4201_v24 }
  0x2b   :  { %432 = vmatprep.mubr.bf16.mxu1 %v4205_v26  ;;  %3903 = vmatprep.mubr.msk.bf16.mxu0 %vm228_vm0, %v4207_v27 }
  0x2c   :  { %3908 = vmatpush3.bf16.msra.mxu1 %v4212_v32 }
  0x2d   :  { %3909 = vmatprep.subr.bf16.mxu1 %v4214_v34 }
  0x30   :  { %3910 = vmatpush3.bf16.msra.mxu1 %v4214_v34 }
  0x31   :  { %3911 = vmatprep.subr.bf16.mxu1 %v4216_v36 }
  0x32   :  { %433 = vmatmul.mubr.bf16.gmra.mxu1 %v4208_v28  ;;  %3904 = vmatmul.mubr.msk.bf16.vlgmr.msra.gmra.mxu0 %vm228_vm0, %v4209_v29 }
  0x33   :  { %3920 = vmatpush3.bf16.msra.mxu0 %v4210_v30 }
  0x34   :  { %3921 = vmatprep.subr.bf16.mxu0 %v4211_v31  ;;  %3912 = vmatpush3.bf16.msra.mxu1 %v4216_v36 }
  0x35   :  { %3913 = vmatprep.subr.bf16.mxu1 %v4217_v37 }
  0x37   :  { %3922 = vmatpush3.bf16.msra.mxu0 %v4211_v31 }
  0x38   :  { %3923 = vmatprep.subr.bf16.mxu0 %v4213_v33  ;;  %3914 = vmatpush3.bf16.msra.mxu1 %v4217_v37 }
  0x39   :  { %3584 = vmatprep.subr.bf16.mxu1 %v4453_v0 }
  0x3b   :  { %3924 = vmatpush3.bf16.msra.mxu0 %v4213_v33 }
  0x3c   :  { %3925 = vmatprep.subr.bf16.mxu0 %v4215_v35 }
  0x3f   :  { %3926 = vmatpush3.bf16.msra.mxu0 %v4215_v35 }
  0x40   :  { %3931 = vmatprep.subr.bf16.mxu0 %v4458_v1 }
  0xca   :  { %v3897_v38 = vpop.f32.mrf.mxu1 }
  0xcc   :  { %v318_v39 = vpop.f32.mrf.mxu1 }
  0xce   :  { %v3898_v41 = vpop.f32.mrf.mxu1 }
  0xd0   :  { %v321_v47 = vpop.f32.mrf.mxu1 }
  0xe2   :  { %v3524_v40 = vpop.f32.mrf.mxu0 }
  0xe4   :  { %v3525_v43 = vpop.f32.mrf.mxu0 }
  0xe5   :  { %v3526_v44 = vadd.f32 %v3525_v43, %v3524_v40  ;;  %v4221_v43 = vld [vmem:[%s5431_s0 + $0x68] ss:$12 sps:$4 sm:$0xff]  }
  0xe6   :  { %v3527_v45 = vpop.f32.mrf.mxu0 }
  0xe7   :  { %v270_v46 = vadd.f32 %v3526_v44, %v4649_v42 }
  0xe8   :  { %v3528_v48 = vpop.f32.mrf.mxu0 }
  0xe9   :  { %v3529_v49 = vadd.f32 %v3528_v48, %v3527_v45  ;;  %v319_v52 = vadd.f32 %v318_v39, %v270_v46 }
  0xea   :  { %v3530_v50 = vpop.f32.mrf.mxu0  ;;  %v3556_v51 = vpop.f32.mrf.mxu1 }
  0xeb   :  { %v273_v53 = vadd.f32 %v3529_v49, %v4649_v42  ;;  %v333_v60 = vmax.f32 %v319_v52, 0.0 }
  0xec   :  { %v3531_v54 = vpop.f32.mrf.mxu0  ;;  %v3557_v55 = vpop.f32.mrf.mxu1 }
  0xed   :  { %v322_v56 = vadd.f32 %v321_v47, %v273_v53  ;;  %v3532_v57 = vadd.f32 %v3531_v54, %v3530_v50  ;;  %v3558_v17 = vadd.f32 %v3557_v55, %v3556_v51  ;;  %v4222_v54 = vld [vmem:[%s5431_s0 + $0x80] ss:$12 sps:$4 sm:$0xff]   ;;  %v4220_v55 = vld [vmem:[%s5431_s0 + $0x64] ss:$12 sps:$4 sm:$0xff]  }
  0xee   :  { %v3533_v58 = vpop.f32.mrf.mxu0  ;;  %v3559_v59 = vpop.f32.mrf.mxu1 }
  0xef   :  { %v334_v61 = vmax.f32 %v322_v56, 0.0  ;;  %v278_v62 = vadd.f32 %v3532_v57, %v4649_v42  ;;  %v427_v31 = vadd.f32 %v3558_v17, %v4649_v42  ;;  %v4218_v57 = vld [vmem:[%s5431_s0 + $0x60] ss:$12 sps:$4 sm:$0xff]  }
  0xf0   :  { %v3534_v63 = vpop.f32.mrf.mxu0  ;;  %v3560_v6 = vpop.f32.mrf.mxu1 }
  0xf1   :  { %v337_v8 = vpack.c.bf16 %v334_v61, %v333_v60  ;;  %v3535_v18 = vadd.f32 %v3534_v63, %v3533_v58  ;;  %v327_v22 = vadd.f32 %v3897_v38, %v278_v62  ;;  %v3561_v26 = vadd.f32 %v3560_v6, %v3559_v59  ;;  %v4223_v58 = vld [vmem:[%s5431_s0 + $0x7c] ss:$12 sps:$4 sm:$0xff]   ;;  %v4225_v59 = vld [vmem:[%s5431_s0 + $0x78] ss:$12 sps:$4 sm:$0xff]   ;;  %v4227_v61 = vld [vmem:[%s5432_s3 + $0x50] sm:$0xff]  }
  0xf2   :  { %v3562_v23 = vpop.f32.mrf.mxu1  ;;  %v3905_v24 = vpop.f32.mrf.mxu0  ;;  %v4226_v60 = vld [vmem:[%s5432_s3 + $0x58] sm:$0xff]   ;;  %v4228_v62 = vld [vmem:[%s5432_s3 + $0x48] sm:$0xff]   ;;  %v4229_v63 = vld [vmem:[%s5432_s3 + $0x40] sm:$0xff]  }
  0xf3   :  { %v281_v25 = vadd.f32 %v3535_v18, %v4649_v42  ;;  %3927 = vmatprep.mubr.msk.bf16.mxu0 %vm528_vm1, %v337_v8  ;;  %v335_v32 = vmax.f32 %v327_v22, 0.0  ;;  %v430_v38 = vadd.f32 %v3561_v26, %v4649_v42  ;;  %v4233_v6 = vld [vmem:[%s5431_s0 + $0x98] ss:$12 sps:$4 sm:$0xff]   ;;  %v4234_v8 = vld [vmem:[%s5431_s0 + $0xb0] ss:$12 sps:$4 sm:$0xff]  }
  0xf4   :  { %v3563_v27 = vpop.f32.mrf.mxu1  ;;  %v475_v28 = vpop.f32.mrf.mxu0 }
  0xf5   :  { %v330_v29 = vadd.f32 %v3898_v41, %v281_v25  ;;  %v3564_v30 = vadd.f32 %v3563_v27, %v3562_v23  ;;  %v476_v37 = vadd.f32 %v475_v28, %v427_v31 }
  0xf6   :  { %v3565_v33 = vpop.f32.mrf.mxu1  ;;  %v3906_v34 = vpop.f32.mrf.mxu0 }
  0xf7   :  { %v336_v35 = vmax.f32 %v330_v29, 0.0  ;;  %v435_v36 = vadd.f32 %v3564_v30, %v4649_v42  ;;  %v490_v47 = vmax.f32 %v476_v37, 0.0 }
  0xf8   :  { %v3566_v39 = vpop.f32.mrf.mxu1  ;;  %v478_v40 = vpop.f32.mrf.mxu0 }
  0xf9   :  { %v338_v44 = vpack.c.bf16 %v336_v35, %v335_v32  ;;  %v3567_v41 = vadd.f32 %v3566_v39, %v3565_v33  ;;  %v479_v45 = vadd.f32 %v478_v40, %v430_v38  ;;  %v484_v46 = vadd.f32 %v3905_v24, %v435_v36 }
  0xfb   :  { %v438_v48 = vadd.f32 %v3567_v41, %v4649_v42  ;;  %v491_v49 = vmax.f32 %v479_v45, 0.0  ;;  %3928 = vmatmul.mubr.msk.bf16.vlgmr.msra.gmra.mxu0 %vm528_vm1, %v338_v44  ;;  %v492_v52 = vmax.f32 %v484_v46, 0.0 }
  0xfc   :  { %3932 = vmatpush3.bf16.msra.mxu0 %v4458_v1  ;;  %3935 = vmatprep.mubr.msk.bf16.mxu0 %vm228_vm0, %v4221_v43 }
  0xfd   :  { %v487_v50 = vadd.f32 %v3906_v34, %v438_v48  ;;  %v494_v51 = vpack.c.bf16 %v491_v49, %v490_v47  ;;  %3933 = vmatprep.subr.bf16.mxu0 %v4477_v4 }
  0xff   :  { %v493_v53 = vmax.f32 %v487_v50, 0.0  ;;  %3915 = vmatprep.mubr.msk.bf16.mxu1 %vm528_vm1, %v494_v51 }
 0x100   :  { %3934 = vmatpush3.bf16.msra.mxu0 %v4477_v4 }
 0x101   :  { %v495_v56 = vpack.c.bf16 %v493_v53, %v492_v52  ;;  %3939 = vmatprep.subr.bf16.mxu0 %v4226_v60 }
 0x103   :  { %3916 = vmatmul.mubr.msk.bf16.vlgmr.msra.gmra.mxu1 %vm528_vm1, %v495_v56  ;;  %3936 = vmatmul.mubr.msk.bf16.vlgmr.msra.gmra.mxu0 %vm228_vm0, %v4222_v54 }
 0x104   :  { %3585 = vmatpush3.bf16.msra.mxu1 %v4464_v2  ;;  %740 = vmatprep.mubr.bf16.mxu1 %v4220_v55 }
 0x105   :  { %3586 = vmatprep.subr.bf16.mxu1 %v4470_v3  ;;  %3940 = vmatpush3.bf16.msra.mxu0 %v4226_v60 }
 0x106   :  { %3941 = vmatprep.subr.bf16.mxu0 %v4227_v61 }
 0x108   :  { %3587 = vmatpush3.bf16.msra.mxu1 %v4483_v5 }
 0x109   :  { %3588 = vmatprep.subr.bf16.mxu1 %v4492_v7  ;;  %3942 = vmatpush3.bf16.msra.mxu0 %v4227_v61 }
 0x10a   :  { %3943 = vmatprep.subr.bf16.mxu0 %v4228_v62 }
 0x10c   :  { %3589 = vmatpush3.bf16.msra.mxu1 %v4504_v9 }
 0x10d   :  { %3590 = vmatprep.subr.bf16.mxu1 %v4510_v10  ;;  %3944 = vmatpush3.bf16.msra.mxu0 %v4228_v62  ;;  %v4232_v62 = vld [vmem:[%s5431_s0 + $0x94] ss:$12 sps:$4 sm:$0xff]  }
 0x10e   :  { %3945 = vmatprep.subr.bf16.mxu0 %v4229_v63 }
 0x110   :  { %3591 = vmatpush3.bf16.msra.mxu1 %v4518_v11 }
 0x111   :  { %3592 = vmatprep.subr.bf16.mxu1 %v4525_v12  ;;  %3946 = vmatpush3.bf16.msra.mxu0 %v4229_v63 }
 0x112   :  { %3622 = vmatprep.subr.bf16.mxu0 %v4453_v0 }
 0x114   :  { %3593 = vmatpush3.bf16.msra.mxu1 %v4532_v13 }
 0x115   :  { %3594 = vmatprep.subr.bf16.mxu1 %v4539_v14 }
 0x118   :  { %3595 = vmatpush3.bf16.msra.mxu1 %v4544_v15 }
 0x119   :  { %3596 = vmatprep.subr.bf16.mxu1 %v4551_v16 }
 0x11c   :  { %3597 = vmatpush3.bf16.msra.mxu1 %v4566_v19 }
 0x11d   :  { %3598 = vmatprep.subr.bf16.mxu1 %v4573_v20 }
 0x120   :  { %3599 = vmatpush3.bf16.msra.mxu1 %v4578_v21 }
 0x121   :  { %3951 = vmatprep.subr.bf16.mxu1 %v4458_v1 }
 0x123   :  { %741 = vmatmul.mubr.bf16.vlgmr.msra.gmra.mxu1 %v4218_v57 }
 0x124   :  { %748 = vmatprep.mubr.bf16.mxu1 %v4223_v58  ;;  %3952 = vmatpush3.bf16.msra.mxu1 %v4458_v1 }
 0x125   :  { %3953 = vmatprep.subr.bf16.mxu1 %v4477_v4 }
 0x128   :  { %3954 = vmatpush3.bf16.msra.mxu1 %v4477_v4 }
 0x12b   :  { %749 = vmatmul.mubr.bf16.gmra.mxu1 %v4225_v59 }
 0x12c   :  { %3955 = vmatprep.mubr.msk.bf16.mxu1 %vm228_vm0, %v4233_v6  ;;  %v4230_v6 = vld [vmem:[%s5431_s0 + $0x90] ss:$12 sps:$4 sm:$0xff]  }
 0x133   :  { %3956 = vmatmul.mubr.msk.bf16.vlgmr.msra.gmra.mxu1 %vm228_vm0, %v4234_v8  ;;  %v4235_v8 = vld [vmem:[%s5431_s0 + $0xac] ss:$12 sps:$4 sm:$0xff]  }
 0x1bb   :  { %v3929_v17 = vpop.f32.mrf.mxu0 }
 0x1bd   :  { %v648_v18 = vpop.f32.mrf.mxu0 }
 0x1bf   :  { %v3930_v24 = vpop.f32.mrf.mxu0 }
 0x1c1   :  { %v651_v29 = vpop.f32.mrf.mxu0 }
 0x1c3   :  { %v3917_v22 = vpop.f32.mrf.mxu1  ;;  %v3937_v32 = vpop.f32.mrf.mxu0 }
 0x1c4   :  { %v4726_v23 = vadd.f32 %v3929_v17, %v3917_v22  ;;  %v4237_v17 = vld [vmem:[%s5431_s0 + $0xa8] ss:$12 sps:$4 sm:$0xff]  }
 0x1c5   :  { %v569_v25 = vpop.f32.mrf.mxu1  ;;  %v791_v34 = vpop.f32.mrf.mxu0 }
 0x1c6   :  { %v4728_v26 = vadd.f32 %v648_v18, %v569_v25 }
 0x1c7   :  { %v3918_v27 = vpop.f32.mrf.mxu1  ;;  %v3938_v38 = vpop.f32.mrf.mxu0 }
 0x1c8   :  { %v4730_v28 = vadd.f32 %v3930_v24, %v3918_v27 }
 0x1c9   :  { %v572_v30 = vpop.f32.mrf.mxu1  ;;  %v794_v41 = vpop.f32.mrf.mxu0 }
 0x1ca   :  { %v4732_v31 = vadd.f32 %v651_v29, %v572_v30 }
 0x1e3   :  { %v3600_v33 = vpop.f32.mrf.mxu1 }
 0x1e5   :  { %v3601_v35 = vpop.f32.mrf.mxu1 }
 0x1e6   :  { %v3602_v36 = vadd.f32 %v3601_v35, %v3600_v33 }
 0x1e7   :  { %v3603_v37 = vpop.f32.mrf.mxu1 }
 0x1e8   :  { %v743_v39 = vadd.f32 %v3602_v36, %v4649_v42 }
 0x1e9   :  { %v3604_v40 = vpop.f32.mrf.mxu1 }
 0x1ea   :  { %v3605_v43 = vadd.f32 %v3604_v40, %v3603_v37  ;;  %v792_v45 = vadd.f32 %v791_v34, %v743_v39 }
 0x1eb   :  { %v3606_v44 = vpop.f32.mrf.mxu1 }
 0x1ec   :  { %v746_v46 = vadd.f32 %v3605_v43, %v4649_v42  ;;  %v806_v51 = vmax.f32 %v792_v45, 0.0 }
 0x1ed   :  { %v3607_v47 = vpop.f32.mrf.mxu1 }
 0x1ee   :  { %v3608_v48 = vadd.f32 %v3607_v47, %v3606_v44  ;;  %v795_v49 = vadd.f32 %v794_v41, %v746_v46 }
 0x1ef   :  { %v3609_v50 = vpop.f32.mrf.mxu1 }
 0x1f0   :  { %v751_v52 = vadd.f32 %v3608_v48, %v4649_v42  ;;  %v807_v53 = vmax.f32 %v795_v49, 0.0  ;;  %v4248_v49 = vld [vmem:[%s5431_s0 + $0xc8] ss:$12 sps:$4 sm:$0xff]  }
 0x1f1   :  { %v3610_v54 = vpop.f32.mrf.mxu1 }
 0x1f2   :  { %v810_v55 = vpack.c.bf16 %v807_v53, %v806_v51  ;;  %v3611_v56 = vadd.f32 %v3610_v54, %v3609_v50  ;;  %v800_v57 = vadd.f32 %v3937_v32, %v751_v52  ;;  %v4836_v51 = vld [vmem:[%s5430_s1 + $0x88] sm:$0xff]   ;;  %v4843_v52 = vld [vmem:[%s5430_s1 + $0x80] sm:$0xff]   ;;  %v4250_v54 = vld [vmem:[%s5432_s3 + $0x98] sm:$0xff]  }
 0x1f3   :  { %v4249_v53 = vld [vmem:[%s5431_s0 + $0xe0] ss:$12 sps:$4 sm:$0xff]  }
 0x1f4   :  { %v754_v58 = vadd.f32 %v3611_v56, %v4649_v42  ;;  %3947 = vmatprep.mubr.msk.bf16.mxu0 %vm528_vm1, %v810_v55  ;;  %v808_v60 = vmax.f32 %v800_v57, 0.0  ;;  %v4251_v55 = vld [vmem:[%s5432_s3 + $0x90] sm:$0xff]   ;;  %v4252_v56 = vld [vmem:[%s5432_s3 + $0x88] sm:$0xff]   ;;  %v4253_v57 = vld [vmem:[%s5432_s3 + $0x80] sm:$0xff]  }
 0x1f6   :  { %v803_v59 = vadd.f32 %v3938_v38, %v754_v58  ;;  %v4866_v58 = vld [vmem:[%s5430_s1 + $0x78] sm:$0xff]  }
 0x1f8   :  { %v809_v61 = vmax.f32 %v803_v59, 0.0  ;;  %v4257_v59 = vld [vmem:[%s5431_s0 + $0xf8] ss:$12 sps:$4 sm:$0xff]  }
 0x1fa   :  { %v811_v63 = vpack.c.bf16 %v809_v61, %v808_v60  ;;  %v4258_v60 = vld [vmem:[%s5431_s0 + $0x110] ss:$12 sps:$4 sm:$0xff]  }
 0x1fc   :  { %3948 = vmatmul.mubr.msk.bf16.vlgmr.msra.gmra.mxu0 %vm528_vm1, %v811_v63 }
 0x1fd   :  { %3623 = vmatpush3.bf16.msra.mxu0 %v4464_v2  ;;  %980 = vmatprep.mubr.bf16.mxu0 %v4232_v62 }
 0x1fe   :  { %3624 = vmatprep.subr.bf16.mxu0 %v4470_v3 }
 0x201   :  { %3625 = vmatpush3.bf16.msra.mxu0 %v4483_v5 }
 0x202   :  { %3626 = vmatprep.subr.bf16.mxu0 %v4492_v7 }
 0x205   :  { %3627 = vmatpush3.bf16.msra.mxu0 %v4504_v9 }
 0x206   :  { %3628 = vmatprep.subr.bf16.mxu0 %v4510_v10 }
 0x209   :  { %3629 = vmatpush3.bf16.msra.mxu0 %v4518_v11 }
 0x20a   :  { %3630 = vmatprep.subr.bf16.mxu0 %v4525_v12 }
 0x20d   :  { %3631 = vmatpush3.bf16.msra.mxu0 %v4532_v13 }
 0x20e   :  { %3632 = vmatprep.subr.bf16.mxu0 %v4539_v14 }
 0x211   :  { %3633 = vmatpush3.bf16.msra.mxu0 %v4544_v15 }
 0x212   :  { %3634 = vmatprep.subr.bf16.mxu0 %v4551_v16 }
 0x215   :  { %3635 = vmatpush3.bf16.msra.mxu0 %v4566_v19 }
 0x216   :  { %3636 = vmatprep.subr.bf16.mxu0 %v4573_v20 }
 0x219   :  { %3637 = vmatpush3.bf16.msra.mxu0 %v4578_v21 }
 0x21a   :  { %3660 = vmatprep.subr.bf16.mxu0 %v4453_v0  ;;  %v4238_v0 = vld [vmem:[%s5432_s3 + $0x78] sm:$0xff]  }
 0x21b   :  { %3959 = vmatprep.subr.bf16.mxu1 %v4238_v0 }
 0x21c   :  { %981 = vmatmul.mubr.bf16.vlgmr.msra.gmra.mxu0 %v4230_v6  ;;  %3960 = vmatpush3.bf16.msra.mxu1 %v4238_v0 }
 0x21d   :  { %988 = vmatprep.mubr.bf16.mxu0 %v4235_v8  ;;  %3661 = vmatpush3.bf16.msra.mxu0 %v4464_v2  ;;  %v4239_v2 = vld [vmem:[%s5432_s3 + $0x70] sm:$0xff]  }
 0x21e   :  { %3662 = vmatprep.subr.bf16.mxu0 %v4470_v3  ;;  %3961 = vmatprep.subr.bf16.mxu1 %v4239_v2  ;;  %v4242_v3 = vld [vmem:[%s5431_s0 + $0xc4] ss:$12 sps:$4 sm:$0xff]  }
 0x220   :  { %3962 = vmatpush3.bf16.msra.mxu1 %v4239_v2 }
 0x221   :  { %3663 = vmatpush3.bf16.msra.mxu0 %v4483_v5  ;;  %v4240_v5 = vld [vmem:[%s5431_s0 + $0xc0] ss:$12 sps:$4 sm:$0xff]  }
 0x222   :  { %3664 = vmatprep.subr.bf16.mxu0 %v4492_v7  ;;  %v4243_v7 = vld [vmem:[%s5432_s3 + $0x68] sm:$0xff]  }
 0x223   :  { %3963 = vmatprep.subr.bf16.mxu1 %v4243_v7 }
 0x224   :  { %989 = vmatmul.mubr.bf16.gmra.mxu0 %v4237_v17  ;;  %3964 = vmatpush3.bf16.msra.mxu1 %v4243_v7 }
 0x225   :  { %3665 = vmatpush3.bf16.msra.mxu0 %v4504_v9  ;;  %1220 = vmatprep.mubr.bf16.mxu0 %v4242_v3  ;;  %v4244_v9 = vld [vmem:[%s5432_s3 + $0x60] sm:$0xff]  }
 0x226   :  { %3666 = vmatprep.subr.bf16.mxu0 %v4510_v10  ;;  %3965 = vmatprep.subr.bf16.mxu1 %v4244_v9  ;;  %v4245_v10 = vld [vmem:[%s5431_s0 + $0xdc] ss:$12 sps:$4 sm:$0xff]  }
 0x228   :  { %3966 = vmatpush3.bf16.msra.mxu1 %v4244_v9 }
 0x229   :  { %3667 = vmatpush3.bf16.msra.mxu0 %v4518_v11  ;;  %v4247_v11 = vld [vmem:[%s5431_s0 + $0xd8] ss:$12 sps:$4 sm:$0xff]   ;;  %3971 = vmatprep.subr.bf16.mxu1 %v4458_v1 }
 0x22a   :  { %3668 = vmatprep.subr.bf16.mxu0 %v4525_v12 }
 0x22d   :  { %3669 = vmatpush3.bf16.msra.mxu0 %v4532_v13 }
 0x22e   :  { %3670 = vmatprep.subr.bf16.mxu0 %v4539_v14 }
 0x231   :  { %3671 = vmatpush3.bf16.msra.mxu0 %v4544_v15 }
 0x232   :  { %3672 = vmatprep.subr.bf16.mxu0 %v4551_v16 }
 0x235   :  { %3673 = vmatpush3.bf16.msra.mxu0 %v4566_v19 }
 0x236   :  { %3674 = vmatprep.subr.bf16.mxu0 %v4573_v20 }
 0x239   :  { %3675 = vmatpush3.bf16.msra.mxu0 %v4578_v21  ;;  %v3957_v21 = vpop.f32.mrf.mxu1 }
 0x23a   :  { %3991 = vmatprep.subr.bf16.mxu0 %v4458_v1 }
 0x23c   :  { %1221 = vmatmul.mubr.bf16.vlgmr.msra.gmra.mxu0 %v4240_v5 }
 0x23d   :  { %3992 = vmatpush3.bf16.msra.mxu0 %v4458_v1  ;;  %1228 = vmatprep.mubr.bf16.mxu0 %v4245_v10  ;;  %v1031_v1 = vpop.f32.mrf.mxu1 }
 0x23e   :  { %3993 = vmatprep.subr.bf16.mxu0 %v4477_v4 }
 0x241   :  { %3994 = vmatpush3.bf16.msra.mxu0 %v4477_v4 }
 0x244   :  { %1229 = vmatmul.mubr.bf16.gmra.mxu0 %v4247_v11 }
 0x245   :  { %3995 = vmatprep.mubr.msk.bf16.mxu0 %vm228_vm0, %v4257_v59  ;;  %v4263_v59 = vld [vmem:[%s5432_s3 + $0xb0] sm:$0xff]  }
 0x24c   :  { %3996 = vmatmul.mubr.msk.bf16.vlgmr.msra.gmra.mxu0 %vm228_vm0, %v4258_v60  ;;  %v4266_v60 = vld [vmem:[%s5431_s0 + $0x124] ss:$12 sps:$4 sm:$0xff]  }
 0x2bc   :  { %v3949_v12 = vpop.f32.mrf.mxu0 }
 0x2bd   :  { %v4813_v13 = vadd.f32 %v3949_v12, %v4726_v23  ;;  %v3958_v23 = vpop.f32.mrf.mxu1 }
 0x2be   :  { %v884_v14 = vpop.f32.mrf.mxu0 }
 0x2bf   :  { %v4816_v15 = vadd.f32 %v884_v14, %v4728_v26  ;;  %v1034_v32 = vpop.f32.mrf.mxu1 }
 0x2c0   :  { %v3950_v16 = vpop.f32.mrf.mxu0 }
 0x2c1   :  { %v4819_v4 = vadd.f32 %v3950_v16, %v4730_v28 }
 0x2c2   :  { %v887_v19 = vpop.f32.mrf.mxu0 }
 0x2c3   :  { %v4822_v20 = vadd.f32 %v887_v19, %v4732_v31 }
 0x2dc   :  { %v3638_v18 = vpop.f32.mrf.mxu0 }
 0x2de   :  { %v3639_v22 = vpop.f32.mrf.mxu0 }
 0x2df   :  { %v3640_v24 = vadd.f32 %v3639_v22, %v3638_v18 }
 0x2e0   :  { %v3641_v25 = vpop.f32.mrf.mxu0 }
 0x2e1   :  { %v983_v27 = vadd.f32 %v3640_v24, %v4649_v42 }
 0x2e2   :  { %v3642_v29 = vpop.f32.mrf.mxu0 }
 0x2e3   :  { %v3643_v26 = vadd.f32 %v3642_v29, %v3641_v25  ;;  %v1032_v33 = vadd.f32 %v1031_v1, %v983_v27 }
 0x2e4   :  { %v3644_v30 = vpop.f32.mrf.mxu0 }
 0x2e5   :  { %v986_v28 = vadd.f32 %v3643_v26, %v4649_v42  ;;  %v1046_v37 = vmax.f32 %v1032_v33, 0.0 }
 0x2e6   :  { %v3645_v34 = vpop.f32.mrf.mxu0 }
 0x2e7   :  { %v3646_v35 = vadd.f32 %v3645_v34, %v3644_v30  ;;  %v1035_v31 = vadd.f32 %v1034_v32, %v986_v28 }
 0x2e8   :  { %v3647_v36 = vpop.f32.mrf.mxu0 }
 0x2e9   :  { %v991_v38 = vadd.f32 %v3646_v35, %v4649_v42  ;;  %v1047_v39 = vmax.f32 %v1035_v31, 0.0  ;;  %v4256_v35 = vld [vmem:[%s5431_s0 + $0xf4] ss:$12 sps:$4 sm:$0xff]  }
 0x2ea   :  { %v3648_v40 = vpop.f32.mrf.mxu0 }
 0x2eb   :  { %v1050_v43 = vpack.c.bf16 %v1047_v39, %v1046_v37  ;;  %v3649_v44 = vadd.f32 %v3648_v40, %v3647_v36  ;;  %v1040_v41 = vadd.f32 %v3957_v21, %v991_v38  ;;  %v4901_v36 = vld [vmem:[%s5430_s1 + $0x38] sm:$0xff]   ;;  %v4907_v37 = vld [vmem:[%s5430_s1 + $0x70] sm:$0xff]   ;;  %v4919_v39 = vld [vmem:[%s5430_s1 + $0x68] sm:$0xff]  }
 0x2ec   :  { %v4913_v38 = vld [vmem:[%s5430_s1 + $0x30] sm:$0xff]   ;;  %v4925_v40 = vld [vmem:[%s5430_s1 + $0x28] sm:$0xff]  }
 0x2ed   :  { %v994_v45 = vadd.f32 %v3649_v44, %v4649_v42  ;;  %3967 = vmatprep.mubr.msk.bf16.mxu1 %vm528_vm1, %v1050_v43  ;;  %v1048_v47 = vmax.f32 %v1040_v41, 0.0  ;;  %v4931_v43 = vld [vmem:[%s5430_s1 + $0x60] sm:$0xff]   ;;  %v4943_v41 = vld [vmem:[%s5430_s1 + $0x58] sm:$0xff]  }
 0x2ee   :  { %v4937_v44 = vld [vmem:[%s5430_s1 + $0x20] sm:$0xff]  }
 0x2ef   :  { %v1043_v46 = vadd.f32 %v3958_v23, %v994_v45  ;;  %v4949_v45 = vld [vmem:[%s5430_s1 + $0x18] sm:$0xff]  }
 0x2f1   :  { %v1049_v48 = vmax.f32 %v1043_v46, 0.0  ;;  %v4955_v46 = vld [vmem:[%s5430_s1 + $0x50] sm:$0xff]  }
 0x2f3   :  { %v1051_v50 = vpack.c.bf16 %v1049_v48, %v1048_v47  ;;  %v4961_v47 = vld [vmem:[%s5430_s1 + $0x10] sm:$0xff]   ;;  %v4967_v48 = vld [vmem:[%s5430_s1 + $0x48] sm:$0xff]  }
 0x2f5   :  { %3968 = vmatmul.mubr.msk.bf16.vlgmr.msra.gmra.mxu1 %vm528_vm1, %v1051_v50  ;;  %v4979_v50 = vld [vmem:[%s5430_s1 + $0x40] sm:$0xff]  }
 0x2f6   :  { %3972 = vmatpush3.bf16.msra.mxu1 %v4836_v51  ;;  %3975 = vmatprep.mubr.msk.bf16.mxu1 %vm228_vm0, %v4248_v49  ;;  %v4973_v49 = vld [vmem:[%s5430_s1 + $0x8] sm:$0xff]  }
 0x2f7   :  { %3973 = vmatprep.subr.bf16.mxu1 %v4843_v52 }
 0x2fa   :  { %3974 = vmatpush3.bf16.msra.mxu1 %v4843_v52 }
 0x2fb   :  { %3979 = vmatprep.subr.bf16.mxu1 %v4250_v54 }
 0x2fc   :  { %v3676_v61 = vpop.f32.mrf.mxu0 }
 0x2fd   :  { %3976 = vmatmul.mubr.msk.bf16.vlgmr.msra.gmra.mxu1 %vm228_vm0, %v4249_v53  ;;  %v4254_v53 = vld [vmem:[%s5431_s0 + $0xf0] ss:$12 sps:$4 sm:$0xff]  }
 0x2fe   :  { %3980 = vmatpush3.bf16.msra.mxu1 %v4250_v54  ;;  %v3677_v62 = vpop.f32.mrf.mxu0  ;;  %v4988_v54 = vld [vmem:[%s5430_s1] sm:$0xff]  }
 0x2ff   :  { %3981 = vmatprep.subr.bf16.mxu1 %v4251_v55  ;;  %v3678_v16 = vadd.f32 %v3677_v62, %v3676_v61  ;;  %v4264_v61 = vld [vmem:[%s5431_s0 + $0x120] ss:$12 sps:$4 sm:$0xff]  }
 0x300   :  { %v3679_v63 = vpop.f32.mrf.mxu0  ;;  %v4267_v62 = vld [vmem:[%s5432_s3 + $0xa8] sm:$0xff]  }
 0x302   :  { %3982 = vmatpush3.bf16.msra.mxu1 %v4251_v55  ;;  %v3680_v6 = vpop.f32.mrf.mxu0  ;;  %v4259_v55 = vld [vmem:[%s5431_s0 + $0x10c] ss:$12 sps:$4 sm:$0xff]  }
 0x303   :  { %3983 = vmatprep.subr.bf16.mxu1 %v4252_v56  ;;  %v3681_v1 = vadd.f32 %v3680_v6, %v3679_v63  ;;  %v4268_v63 = vld [vmem:[%s5432_s3 + $0xa0] sm:$0xff]   ;;  %v4269_v6 = vld [vmem:[%s5431_s0 + $0x13c] ss:$12 sps:$4 sm:$0xff]  }
 0x304   :  { %v3682_v8 = vpop.f32.mrf.mxu0 }
 0x305   :  { %v1226_v27 = vadd.f32 %v3681_v1, %v4649_v42 }
 0x306   :  { %3984 = vmatpush3.bf16.msra.mxu1 %v4252_v56  ;;  %v3683_v17 = vpop.f32.mrf.mxu0  ;;  %v4261_v56 = vld [vmem:[%s5431_s0 + $0x108] ss:$12 sps:$4 sm:$0xff]  }
 0x307   :  { %3985 = vmatprep.subr.bf16.mxu1 %v4253_v57  ;;  %v3684_v12 = vadd.f32 %v3683_v17, %v3682_v8  ;;  %v4271_v8 = vld [vmem:[%s5431_s0 + $0x138] ss:$12 sps:$4 sm:$0xff]  }
 0x308   :  { %v3685_v2 = vpop.f32.mrf.mxu0 }
 0x30a   :  { %3986 = vmatpush3.bf16.msra.mxu1 %v4253_v57  ;;  %v3686_v10 = vpop.f32.mrf.mxu0  ;;  %v4262_v57 = vld [vmem:[%s5432_s3 + $0xb8] sm:$0xff]  }
 0x30b   :  { %3698 = vmatprep.subr.bf16.mxu1 %v4866_v58  ;;  %v3687_v19 = vadd.f32 %v3686_v10, %v3685_v2  ;;  %3999 = vmatprep.subr.bf16.mxu0 %v4262_v57 }
 0x30c   :  { %4000 = vmatpush3.bf16.msra.mxu0 %v4262_v57  ;;  %v4272_v57 = vld [vmem:[%s5431_s0 + $0x128] ss:$12 sps:$4 sm:$0xff]  }
 0x30d   :  { %v1234_v24 = vadd.f32 %v3687_v19, %v4649_v42  ;;  %4001 = vmatprep.subr.bf16.mxu0 %v4263_v59 }
 0x310   :  { %4002 = vmatpush3.bf16.msra.mxu0 %v4263_v59 }
 0x311   :  { %4003 = vmatprep.subr.bf16.mxu0 %v4267_v62 }
 0x314   :  { %4004 = vmatpush3.bf16.msra.mxu0 %v4267_v62  ;;  %v4275_v62 = vld [vmem:[%s5432_s3 + $0xd0] sm:$0xff]  }
 0x315   :  { %4005 = vmatprep.subr.bf16.mxu0 %v4268_v63 }
 0x318   :  { %4006 = vmatpush3.bf16.msra.mxu0 %v4268_v63  ;;  %v4276_v63 = vld [vmem:[%s5432_s3 + $0xc8] sm:$0xff]  }
 0x319   :  { %4011 = vmatprep.subr.bf16.mxu0 %v4836_v51 }
 0x3b5   :  { %v3969_v0 = vpop.f32.mrf.mxu1 }
 0x3b6   :  { %v4878_v3 = vadd.f32 %v3969_v0, %v4813_v13  ;;  %v1231_v13 = vadd.f32 %v3684_v12, %v4649_v42 }
 0x3b7   :  { %v1124_v5 = vpop.f32.mrf.mxu1 }
 0x3b8   :  { %v4881_v7 = vadd.f32 %v1124_v5, %v4816_v15  ;;  %v1223_v15 = vadd.f32 %v3678_v16, %v4649_v42  ;;  %v3997_v16 = vpop.f32.mrf.mxu0 }
 0x3b9   :  { %v3970_v9 = vpop.f32.mrf.mxu1 }
 0x3ba   :  { %v4884_v11 = vadd.f32 %v3970_v9, %v4819_v4 }
 0x3bb   :  { %v1127_v14 = vpop.f32.mrf.mxu1 }
 0x3bc   :  { %v4887_v21 = vadd.f32 %v1127_v14, %v4822_v20 }
 0x3bd   :  { %v3977_v18 = vpop.f32.mrf.mxu1 }
 0x3be   :  { %v1280_v29 = vadd.f32 %v3977_v18, %v1231_v13  ;;  %v1511_v18 = vpop.f32.mrf.mxu0 }
 0x3bf   :  { %v1271_v22 = vpop.f32.mrf.mxu1 }
 0x3c0   :  { %v1272_v23 = vadd.f32 %v1271_v22, %v1223_v15  ;;  %v1288_v28 = vmax.f32 %v1280_v29, 0.0 }
 0x3c1   :  { %v3978_v25 = vpop.f32.mrf.mxu1 }
 0x3c2   :  { %v1283_v4 = vadd.f32 %v3978_v25, %v1234_v24  ;;  %v1286_v20 = vmax.f32 %v1272_v23, 0.0 }
 0x3c3   :  { %v1274_v26 = vpop.f32.mrf.mxu1 }
 0x3c4   :  { %v1275_v30 = vadd.f32 %v1274_v26, %v1226_v27  ;;  %v1289_v32 = vmax.f32 %v1283_v4, 0.0 }
 0x3c6   :  { %v1287_v33 = vmax.f32 %v1275_v30, 0.0  ;;  %v1291_v31 = vpack.c.bf16 %v1289_v32, %v1288_v28 }
 0x3c8   :  { %v1290_v34 = vpack.c.bf16 %v1287_v33, %v1286_v20 }
 0x3ca   :  { %3987 = vmatprep.mubr.msk.bf16.mxu1 %vm528_vm1, %v1290_v34 }
 0x3cb   :  { %3988 = vmatmul.mubr.msk.bf16.vlgmr.msra.gmra.mxu1 %vm528_vm1, %v1291_v31 }
 0x3cc   :  { %3699 = vmatpush3.bf16.msra.mxu1 %v4901_v36  ;;  %1460 = vmatprep.mubr.bf16.mxu1 %v4256_v35 }
 0x3cd   :  { %3700 = vmatprep.subr.bf16.mxu1 %v4907_v37 }
 0x3d0   :  { %3701 = vmatpush3.bf16.msra.mxu1 %v4913_v38 }
 0x3d1   :  { %3702 = vmatprep.subr.bf16.mxu1 %v4919_v39 }
 0x3d4   :  { %3703 = vmatpush3.bf16.msra.mxu1 %v4925_v40 }
 0x3d5   :  { %3704 = vmatprep.subr.bf16.mxu1 %v4931_v43 }
 0x3d8   :  { %3705 = vmatpush3.bf16.msra.mxu1 %v4937_v44 }
 0x3d9   :  { %3706 = vmatprep.subr.bf16.mxu1 %v4943_v41 }
 0x3dc   :  { %3707 = vmatpush3.bf16.msra.mxu1 %v4949_v45 }
 0x3dd   :  { %3708 = vmatprep.subr.bf16.mxu1 %v4955_v46 }
 0x3e0   :  { %3709 = vmatpush3.bf16.msra.mxu1 %v4961_v47 }
 0x3e1   :  { %3710 = vmatprep.subr.bf16.mxu1 %v4967_v48 }
 0x3e4   :  { %3711 = vmatpush3.bf16.msra.mxu1 %v4973_v49 }
 0x3e5   :  { %3712 = vmatprep.subr.bf16.mxu1 %v4979_v50 }
 0x3e8   :  { %3713 = vmatpush3.bf16.msra.mxu1 %v4988_v54 }
 0x3e9   :  { %3736 = vmatprep.subr.bf16.mxu1 %v4866_v58 }
 0x3eb   :  { %1461 = vmatmul.mubr.bf16.vlgmr.msra.gmra.mxu1 %v4254_v53 }
 0x3ec   :  { %1468 = vmatprep.mubr.bf16.mxu1 %v4259_v55  ;;  %3737 = vmatpush3.bf16.msra.mxu1 %v4901_v36 }
 0x3ed   :  { %3738 = vmatprep.subr.bf16.mxu1 %v4907_v37 }
 0x3f0   :  { %3739 = vmatpush3.bf16.msra.mxu1 %v4913_v38 }
 0x3f1   :  { %3740 = vmatprep.subr.bf16.mxu1 %v4919_v39 }
 0x3f3   :  { %1469 = vmatmul.mubr.bf16.gmra.mxu1 %v4261_v56 }
 0x3f4   :  { %3741 = vmatpush3.bf16.msra.mxu1 %v4925_v40  ;;  %1700 = vmatprep.mubr.bf16.mxu1 %v4266_v60  ;;  %v4273_v60 = vld [vmem:[%s5431_s0 + $0x140] ss:$12 sps:$4 sm:$0xff]  }
 0x3f5   :  { %3742 = vmatprep.subr.bf16.mxu1 %v4931_v43 }
 0x3f8   :  { %3743 = vmatpush3.bf16.msra.mxu1 %v4937_v44 }
 0x3f9   :  { %3744 = vmatprep.subr.bf16.mxu1 %v4943_v41 }
 0x3fc   :  { %3745 = vmatpush3.bf16.msra.mxu1 %v4949_v45 }
 0x3fd   :  { %3746 = vmatprep.subr.bf16.mxu1 %v4955_v46 }
 0x400   :  { %3747 = vmatpush3.bf16.msra.mxu1 %v4961_v47 }
 0x401   :  { %3748 = vmatprep.subr.bf16.mxu1 %v4967_v48 }
 0x404   :  { %3749 = vmatpush3.bf16.msra.mxu1 %v4973_v49 }
 0x405   :  { %3750 = vmatprep.subr.bf16.mxu1 %v4979_v50 }
 0x408   :  { %3751 = vmatpush3.bf16.msra.mxu1 %v4988_v54 }
 0x409   :  { %4031 = vmatprep.subr.bf16.mxu1 %v4836_v51 }
 0x40b   :  { %1701 = vmatmul.mubr.bf16.vlgmr.msra.gmra.mxu1 %v4264_v61  ;;  %v4274_v61 = vld [vmem:[%s5432_s3 + $0xd8] sm:$0xff]  }
 0x40c   :  { %4032 = vmatpush3.bf16.msra.mxu1 %v4836_v51  ;;  %1708 = vmatprep.mubr.bf16.mxu1 %v4269_v6  ;;  %v4277_v6 = vld [vmem:[%s5432_s3 + $0xc0] sm:$0xff]  }
 0x40d   :  { %4033 = vmatprep.subr.bf16.mxu1 %v4843_v52 }
 0x410   :  { %4034 = vmatpush3.bf16.msra.mxu1 %v4843_v52 }
 0x413   :  { %1709 = vmatmul.mubr.bf16.gmra.mxu1 %v4271_v8  ;;  %v4281_v8 = vld [vmem:[%s5431_s0 + $0x158] ss:$12 sps:$4 sm:$0xff]  }
 0x414   :  { %4035 = vmatprep.mubr.msk.bf16.mxu1 %vm228_vm0, %v4281_v8 }
 0x48b   :  { %v3989_v17 = vpop.f32.mrf.mxu1 }
 0x48c   :  { %v5043_v0 = vadd.f32 %v3989_v17, %v4878_v3  ;;  %v3998_v3 = vpop.f32.mrf.mxu0  ;;  %v4282_v17 = vld [vmem:[%s5431_s0 + $0x170] ss:$12 sps:$4 sm:$0xff]  }
 0x48d   :  { %v1364_v2 = vpop.f32.mrf.mxu1  ;;  %4036 = vmatmul.mubr.msk.bf16.vlgmr.msra.gmra.mxu1 %vm228_vm0, %v4282_v17 }
 0x48e   :  { %v5046_v5 = vadd.f32 %v1364_v2, %v4881_v7  ;;  %v1514_v23 = vpop.f32.mrf.mxu0 }
 0x48f   :  { %v3990_v9 = vpop.f32.mrf.mxu1 }
 0x490   :  { %v5049_v10 = vadd.f32 %v3990_v9, %v4884_v11 }
 0x491   :  { %v1367_v12 = vpop.f32.mrf.mxu1 }
 0x492   :  { %v5052_v14 = vadd.f32 %v1367_v12, %v4887_v21 }
 0x4ab   :  { %v3714_v19 = vpop.f32.mrf.mxu1 }
 0x4ad   :  { %v3715_v1 = vpop.f32.mrf.mxu1 }
 0x4ae   :  { %v3716_v13 = vadd.f32 %v3715_v1, %v3714_v19 }
 0x4af   :  { %v3717_v22 = vpop.f32.mrf.mxu1 }
 0x4b0   :  { %v1463_v15 = vadd.f32 %v3716_v13, %v4649_v42 }
 0x4b1   :  { %v3718_v24 = vpop.f32.mrf.mxu1 }
 0x4b2   :  { %v3719_v7 = vadd.f32 %v3718_v24, %v3717_v22  ;;  %v1512_v4 = vadd.f32 %v1511_v18, %v1463_v15 }
 0x4b3   :  { %v3720_v25 = vpop.f32.mrf.mxu1 }
 0x4b4   :  { %v1466_v11 = vadd.f32 %v3719_v7, %v4649_v42  ;;  %v1526_v30 = vmax.f32 %v1512_v4, 0.0 }
 0x4b5   :  { %v3721_v27 = vpop.f32.mrf.mxu1 }
 0x4b6   :  { %v3722_v29 = vadd.f32 %v3721_v27, %v3720_v25  ;;  %v1515_v21 = vadd.f32 %v1514_v23, %v1466_v11 }
 0x4b7   :  { %v3723_v26 = vpop.f32.mrf.mxu1 }
 0x4b8   :  { %v1471_v32 = vadd.f32 %v3722_v29, %v4649_v42  ;;  %v1527_v20 = vmax.f32 %v1515_v21, 0.0 }
 0x4b9   :  { %v3724_v33 = vpop.f32.mrf.mxu1 }
 0x4ba   :  { %v1530_v28 = vpack.c.bf16 %v1527_v20, %v1526_v30  ;;  %v3725_v34 = vadd.f32 %v3724_v33, %v3723_v26  ;;  %v1520_v35 = vadd.f32 %v3997_v16, %v1471_v32 }
 0x4bc   :  { %v1474_v31 = vadd.f32 %v3725_v34, %v4649_v42  ;;  %4007 = vmatprep.mubr.msk.bf16.mxu0 %vm528_vm1, %v1530_v28  ;;  %v1528_v55 = vmax.f32 %v1520_v35, 0.0 }
 0x4be   :  { %v1523_v53 = vadd.f32 %v3998_v3, %v1474_v31 }
 0x4c0   :  { %v1529_v56 = vmax.f32 %v1523_v53, 0.0 }
 0x4c2   :  { %v1531_v59 = vpack.c.bf16 %v1529_v56, %v1528_v55 }
 0x4c4   :  { %4008 = vmatmul.mubr.msk.bf16.vlgmr.msra.gmra.mxu0 %vm528_vm1, %v1531_v59  ;;  %v4280_v59 = vld [vmem:[%s5431_s0 + $0x154] ss:$12 sps:$4 sm:$0xff]  }
 0x4c5   :  { %4012 = vmatpush3.bf16.msra.mxu0 %v4836_v51  ;;  %4015 = vmatprep.mubr.msk.bf16.mxu0 %vm228_vm0, %v4272_v57 }
 0x4c6   :  { %4013 = vmatprep.subr.bf16.mxu0 %v4843_v52 }
 0x4c9   :  { %4014 = vmatpush3.bf16.msra.mxu0 %v4843_v52 }
 0x4ca   :  { %4019 = vmatprep.subr.bf16.mxu0 %v4274_v61 }
 0x4cb   :  { %v3752_v2 = vpop.f32.mrf.mxu1 }
 0x4cc   :  { %4016 = vmatmul.mubr.msk.bf16.vlgmr.msra.gmra.mxu0 %vm228_vm0, %v4273_v60 }
 0x4cd   :  { %4020 = vmatpush3.bf16.msra.mxu0 %v4274_v61  ;;  %v3753_v9 = vpop.f32.mrf.mxu1  ;;  %v4283_v61 = vld [vmem:[%s5431_s0 + $0x16c] ss:$12 sps:$4 sm:$0xff]  }
 0x4ce   :  { %4021 = vmatprep.subr.bf16.mxu0 %v4275_v62  ;;  %v3754_v11 = vadd.f32 %v3753_v9, %v3752_v2 }
 0x4cf   :  { %v3755_v12 = vpop.f32.mrf.mxu1 }
 0x4d1   :  { %4022 = vmatpush3.bf16.msra.mxu0 %v4275_v62  ;;  %v3756_v16 = vpop.f32.mrf.mxu1  ;;  %v4285_v62 = vld [vmem:[%s5431_s0 + $0x168] ss:$12 sps:$4 sm:$0xff]  }
 0x4d2   :  { %4023 = vmatprep.subr.bf16.mxu0 %v4276_v63  ;;  %v3757_v26 = vadd.f32 %v3756_v16, %v3755_v12  ;;  %v5193_v16 = vld [vmem:[%s5433_s2] ss:$0 sm:$0xff] }
 0x4d3   :  { %v3758_v19 = vpop.f32.mrf.mxu1 }
 0x4d4   :  { %v1706_v28 = vadd.f32 %v3757_v26, %v4649_v42 }
 0x4d5   :  { %4024 = vmatpush3.bf16.msra.mxu0 %v4276_v63  ;;  %v3759_v18 = vpop.f32.mrf.mxu1 }
 0x4d6   :  { %4025 = vmatprep.subr.bf16.mxu0 %v4277_v6  ;;  %v3760_v23 = vadd.f32 %v3759_v18, %v3758_v19 }
 0x4d7   :  { %v3761_v13 = vpop.f32.mrf.mxu1 }
 0x4d9   :  { %4026 = vmatpush3.bf16.msra.mxu0 %v4277_v6  ;;  %v3762_v7 = vpop.f32.mrf.mxu1 }
 0x4da   :  { %3774 = vmatprep.subr.bf16.mxu0 %v4866_v58  ;;  %v3763_v27 = vadd.f32 %v3762_v7, %v3761_v13 }
 0x4dc   :  { %v1714_v32 = vadd.f32 %v3763_v27, %v4649_v42 }
 0x54d   :  { %v4037_v63 = vpop.f32.mrf.mxu1 }
 0x54f   :  { %v1991_v8 = vpop.f32.mrf.mxu1 }
 0x551   :  { %v4038_v12 = vpop.f32.mrf.mxu1 }
 0x584   :  { %v4009_v1 = vpop.f32.mrf.mxu0 }
 0x585   :  { %v5093_v22 = vadd.f32 %v4009_v1, %v5043_v0  ;;  %v1711_v0 = vadd.f32 %v3760_v23, %v4649_v42 }
 0x586   :  { %v1604_v3 = vpop.f32.mrf.mxu0 }
 0x587   :  { %v5096_v15 = vadd.f32 %v1604_v3, %v5046_v5  ;;  %v1703_v5 = vadd.f32 %v3754_v11, %v4649_v42  ;;  %v4278_v42 = vld [vmem:[%s5431_s0 + $0x150] ss:$12 sps:$4 sm:$0xff]  }
 0x588   :  { %v4010_v24 = vpop.f32.mrf.mxu0 }
 0x589   :  { %v5099_v25 = vadd.f32 %v4010_v24, %v5049_v10 }
 0x58a   :  { %v1607_v4 = vpop.f32.mrf.mxu0 }
 0x58b   :  { %v5102_v29 = vadd.f32 %v1607_v4, %v5052_v14 }
 0x58c   :  { %v4017_v21 = vpop.f32.mrf.mxu0 }
 0x58d   :  { %v1760_v34 = vadd.f32 %v4017_v21, %v1711_v0 }
 0x58e   :  { %v1751_v30 = vpop.f32.mrf.mxu0 }
 0x58f   :  { %v1752_v33 = vadd.f32 %v1751_v30, %v1703_v5  ;;  %v1768_v56 = vmax.f32 %v1760_v34, 0.0  ;;  %v4298_v34 = vld [vmem:[%s5432_s3 + $0x118] sm:$0xff]  }
 0x590   :  { %v4018_v20 = vpop.f32.mrf.mxu0 }
 0x591   :  { %v1763_v10 = vadd.f32 %v4018_v20, %v1714_v32  ;;  %v1766_v14 = vmax.f32 %v1752_v33, 0.0  ;;  %v4296_v33 = vld [vmem:[%s5431_s0 + $0x188] ss:$12 sps:$4 sm:$0xff]  }
 0x592   :  { %v1754_v35 = vpop.f32.mrf.mxu0 }
 0x593   :  { %v1755_v31 = vadd.f32 %v1754_v35, %v1706_v28  ;;  %v1769_v53 = vmax.f32 %v1763_v10, 0.0  ;;  %v4297_v28 = vld [vmem:[%s5431_s0 + $0x1a0] ss:$12 sps:$4 sm:$0xff]  }
 0x594   :  { %v4300_v35 = vld [vmem:[%s5432_s3 + $0x108] sm:$0xff]  }
 0x595   :  { %v1767_v55 = vmax.f32 %v1755_v31, 0.0  ;;  %v1771_v60 = vpack.c.bf16 %v1769_v53, %v1768_v56  ;;  %v4302_v31 = vld [vmem:[%s5434_s5 + $0x38] sm:$0xff]  }
 0x597   :  { %v1770_v57 = vpack.c.bf16 %v1767_v55, %v1766_v14 }
 0x599   :  { %4027 = vmatprep.mubr.msk.bf16.mxu0 %vm528_vm1, %v1770_v57 }
 0x59a   :  { %4028 = vmatmul.mubr.msk.bf16.vlgmr.msra.gmra.mxu0 %vm528_vm1, %v1771_v60 }
 0x59b   :  { %3775 = vmatpush3.bf16.msra.mxu0 %v4901_v36  ;;  %1940 = vmatprep.mubr.bf16.mxu0 %v4280_v59 }
 0x59c   :  { %3776 = vmatprep.subr.bf16.mxu0 %v4907_v37 }
 0x59f   :  { %3777 = vmatpush3.bf16.msra.mxu0 %v4913_v38 }
 0x5a0   :  { %3778 = vmatprep.subr.bf16.mxu0 %v4919_v39 }
 0x5a3   :  { %3779 = vmatpush3.bf16.msra.mxu0 %v4925_v40 }
 0x5a4   :  { %3780 = vmatprep.subr.bf16.mxu0 %v4931_v43 }
 0x5a7   :  { %3781 = vmatpush3.bf16.msra.mxu0 %v4937_v44 }
 0x5a8   :  { %3782 = vmatprep.subr.bf16.mxu0 %v4943_v41 }
 0x5ab   :  { %3783 = vmatpush3.bf16.msra.mxu0 %v4949_v45 }
 0x5ac   :  { %3784 = vmatprep.subr.bf16.mxu0 %v4955_v46 }
 0x5af   :  { %3785 = vmatpush3.bf16.msra.mxu0 %v4961_v47 }
 0x5b0   :  { %3786 = vmatprep.subr.bf16.mxu0 %v4967_v48 }
 0x5b3   :  { %3787 = vmatpush3.bf16.msra.mxu0 %v4973_v49 }
 0x5b4   :  { %3788 = vmatprep.subr.bf16.mxu0 %v4979_v50 }
 0x5b7   :  { %3789 = vmatpush3.bf16.msra.mxu0 %v4988_v54 }
 0x5b8   :  { %3812 = vmatprep.subr.bf16.mxu0 %v4866_v58  ;;  %v4286_v58 = vld [vmem:[%s5432_s3 + $0xf8] sm:$0xff]  }
 0x5b9   :  { %4039 = vmatprep.subr.bf16.mxu1 %v4286_v58 }
 0x5ba   :  { %1941 = vmatmul.mubr.bf16.vlgmr.msra.gmra.mxu0 %v4278_v42  ;;  %4040 = vmatpush3.bf16.msra.mxu1 %v4286_v58 }
 0x5bb   :  { %1948 = vmatprep.mubr.bf16.mxu0 %v4283_v61  ;;  %3813 = vmatpush3.bf16.msra.mxu0 %v4901_v36  ;;  %v4287_v36 = vld [vmem:[%s5432_s3 + $0xf0] sm:$0xff]  }
 0x5bc   :  { %3814 = vmatprep.subr.bf16.mxu0 %v4907_v37  ;;  %4041 = vmatprep.subr.bf16.mxu1 %v4287_v36  ;;  %v4290_v37 = vld [vmem:[%s5431_s0 + $0x184] ss:$12 sps:$4 sm:$0xff]  }
 0x5be   :  { %4042 = vmatpush3.bf16.msra.mxu1 %v4287_v36 }
 0x5bf   :  { %3815 = vmatpush3.bf16.msra.mxu0 %v4913_v38  ;;  %v4288_v38 = vld [vmem:[%s5431_s0 + $0x180] ss:$12 sps:$4 sm:$0xff]  }
 0x5c0   :  { %3816 = vmatprep.subr.bf16.mxu0 %v4919_v39  ;;  %v4291_v39 = vld [vmem:[%s5432_s3 + $0xe8] sm:$0xff]  }
 0x5c1   :  { %4043 = vmatprep.subr.bf16.mxu1 %v4291_v39 }
 0x5c2   :  { %1949 = vmatmul.mubr.bf16.gmra.mxu0 %v4285_v62  ;;  %4044 = vmatpush3.bf16.msra.mxu1 %v4291_v39 }
 0x5c3   :  { %3817 = vmatpush3.bf16.msra.mxu0 %v4925_v40  ;;  %2180 = vmatprep.mubr.bf16.mxu0 %v4290_v37  ;;  %v4292_v40 = vld [vmem:[%s5432_s3 + $0xe0] sm:$0xff]  }
 0x5c4   :  { %3818 = vmatprep.subr.bf16.mxu0 %v4931_v43  ;;  %4045 = vmatprep.subr.bf16.mxu1 %v4292_v40  ;;  %v4293_v43 = vld [vmem:[%s5431_s0 + $0x19c] ss:$12 sps:$4 sm:$0xff]  }
 0x5c6   :  { %4046 = vmatpush3.bf16.msra.mxu1 %v4292_v40 }
 0x5c7   :  { %3819 = vmatpush3.bf16.msra.mxu0 %v4937_v44  ;;  %v4295_v44 = vld [vmem:[%s5431_s0 + $0x198] ss:$12 sps:$4 sm:$0xff]   ;;  %4051 = vmatprep.subr.bf16.mxu1 %v4836_v51 }
 0x5c8   :  { %3820 = vmatprep.subr.bf16.mxu0 %v4943_v41 }
 0x5cb   :  { %3821 = vmatpush3.bf16.msra.mxu0 %v4949_v45 }
 0x5cc   :  { %3822 = vmatprep.subr.bf16.mxu0 %v4955_v46 }
 0x5cf   :  { %3823 = vmatpush3.bf16.msra.mxu0 %v4961_v47 }
 0x5d0   :  { %3824 = vmatprep.subr.bf16.mxu0 %v4967_v48 }
 0x5d3   :  { %3825 = vmatpush3.bf16.msra.mxu0 %v4973_v49 }
 0x5d4   :  { %3826 = vmatprep.subr.bf16.mxu0 %v4979_v50 }
 0x5d7   :  { %3827 = vmatpush3.bf16.msra.mxu0 %v4988_v54 }
 0x5da   :  { %2181 = vmatmul.mubr.bf16.vlgmr.msra.gmra.mxu0 %v4288_v38 }
 0x5db   :  { %2188 = vmatprep.mubr.bf16.mxu0 %v4293_v43 }
 0x5e2   :  { %2189 = vmatmul.mubr.bf16.gmra.mxu0 %v4295_v44 }
 0x65a   :  { %v4029_v41 = vpop.f32.mrf.mxu0 }
 0x65b   :  { %v5179_v45 = vadd.f32 %v4029_v41, %v5093_v22  ;;  %v1994_v22 = vpop.f32.mrf.mxu1 }
 0x65c   :  { %v1844_v46 = vpop.f32.mrf.mxu0 }
 0x65d   :  { %v5182_v47 = vadd.f32 %v1844_v46, %v5096_v15 }
 0x65e   :  { %v4030_v48 = vpop.f32.mrf.mxu0 }
 0x65f   :  { %v5185_v49 = vadd.f32 %v4030_v48, %v5099_v25 }
 0x660   :  { %v1847_v50 = vpop.f32.mrf.mxu0 }
 0x661   :  { %v5188_v54 = vadd.f32 %v1847_v50, %v5102_v29 }
 0x67a   :  { %v3790_v6 = vpop.f32.mrf.mxu0 }
 0x67c   :  { %v3791_v17 = vpop.f32.mrf.mxu0 }
 0x67d   :  { %v3792_v2 = vadd.f32 %v3791_v17, %v3790_v6 }
 0x67e   :  { %v3793_v9 = vpop.f32.mrf.mxu0 }
 0x67f   :  { %v1943_v19 = vadd.f32 %v5193_v16, %v3792_v2 }
 0x680   :  { %v3794_v18 = vpop.f32.mrf.mxu0 }
 0x681   :  { %v3795_v1 = vadd.f32 %v3794_v18, %v3793_v9  ;;  %v1992_v3 = vadd.f32 %v1991_v8, %v1943_v19 }
 0x682   :  { %v3796_v13 = vpop.f32.mrf.mxu0 }
 0x683   :  { %v1946_v15 = vadd.f32 %v5193_v16, %v3795_v1  ;;  %v2006_v4 = vmax.f32 %v1992_v3, 0.0  ;;  %v4303_v3 = vld [vmem:[%s5434_s5 + $0x30] sm:$0xff]  }
 0x684   :  { %v3797_v24 = vpop.f32.mrf.mxu0 }
 0x685   :  { %v3798_v7 = vadd.f32 %v3797_v24, %v3796_v13  ;;  %v1995_v25 = vadd.f32 %v1994_v22, %v1946_v15  ;;  %v4305_v15 = vld [vmem:[%s5434_s5 + $0x20] sm:$0xff]   ;;  %v4306_v24 = vld [vmem:[%s5434_s5 + $0x18] sm:$0xff]  }
 0x686   :  { %v3799_v23 = vpop.f32.mrf.mxu0 }
 0x687   :  { %v1951_v11 = vadd.f32 %v5193_v16, %v3798_v7  ;;  %v2007_v27 = vmax.f32 %v1995_v25, 0.0  ;;  %v4307_v7 = vld [vmem:[%s5434_s5 + $0x10] sm:$0xff]   ;;  %v5263_v25 = vld [vmem:[%s5435_s7 + $0x8] sm:$0xff]  }
 0x688   :  { %v3800_v29 = vpop.f32.mrf.mxu0 }
 0x689   :  { %v2010_v21 = vpack.c.bf16 %v2007_v27, %v2006_v4  ;;  %v3801_v26 = vadd.f32 %v3800_v29, %v3799_v23  ;;  %v2000_v0 = vadd.f32 %v4037_v63, %v1951_v11  ;;  %v4385_v23 = vmov 0.0   ;;  %v4309_v4 = vld [vmem:[%s5434_s5 + $0x8] sm:$0xff]   ;;  %v5274_v11 = vld [vmem:[%s5435_s7] sm:$0xff]  }
 0x68a   :  { %4091 = vmatprep.subr.bf16.mxu0 %v4385_v23  ;;  %v4311_v27 = vld [vmem:[%s5434_s5] sm:$0xff]   ;;  %4095 = vmatprep.mubr.msk.bf16.mxu0 %vm4386_vm2, %v4385_v23  ;;  %v4387_v29 = vmov 0  }
 0x68b   :  { %v1954_v30 = vadd.f32 %v5193_v16, %v3801_v26  ;;  %4047 = vmatprep.mubr.msk.bf16.mxu1 %vm528_vm1, %v2010_v21  ;;  %v2008_v32 = vmax.f32 %v2000_v0, 0.0  ;;  %4092 = vmatpush3.bf16.msra.mxu0 %v5263_v25  ;;  %v3458_v0 = vld [vmem:[%s5436_s4] ss:$0 sm:$0xff] }
 0x68c   :  { %4093 = vmatprep.subr.bf16.mxu0 %v4385_v23 }
 0x68d   :  { %v2003_v5 = vadd.f32 %v4038_v12, %v1954_v30 }
 0x68f   :  { %v2009_v20 = vmax.f32 %v2003_v5, 0.0  ;;  %4094 = vmatpush3.bf16.msra.mxu0 %v5274_v11 }
 0x690   :  { %4099 = vmatprep.subr.bf16.mxu0 %v4385_v23 }
 0x691   :  { %v2011_v10 = vpack.c.bf16 %v2009_v20, %v2008_v32 }
 0x692   :  { %4096 = vmatmul.mubr.bf16.vlgmr.msra.gmra.mxu0 %v4387_v29 }
 0x693   :  { %4048 = vmatmul.mubr.msk.bf16.vlgmr.msra.gmra.mxu1 %vm528_vm1, %v2011_v10  ;;  %4100 = vmatpush3.bf16.msra.mxu0 %v5263_v25 }
 0x694   :  { %4052 = vmatpush3.bf16.msra.mxu1 %v4836_v51  ;;  %4055 = vmatprep.mubr.msk.bf16.mxu1 %vm228_vm0, %v4296_v33  ;;  %v4299_v51 = vld [vmem:[%s5432_s3 + $0x110] sm:$0xff]  }
 0x695   :  { %4053 = vmatprep.subr.bf16.mxu1 %v4843_v52  ;;  %4103 = vmatprep.mubr.msk.bf16.mxu0 %vm4386_vm2, %v4385_v23 }
 0x696   :  { %4101 = vmatprep.subr.bf16.mxu0 %v4385_v23 }
 0x697   :  { %4102 = vmatpush3.bf16.msra.mxu0 %v5274_v11 }
 0x698   :  { %4054 = vmatpush3.bf16.msra.mxu1 %v4843_v52  ;;  %v4301_v52 = vld [vmem:[%s5432_s3 + $0x100] sm:$0xff]   ;;  %4107 = vmatprep.subr.bf16.mxu0 %v4385_v23 }
 0x699   :  { %4059 = vmatprep.subr.bf16.mxu1 %v4298_v34 }
 0x69a   :  { %v3828_v53 = vpop.f32.mrf.mxu0 }
 0x69b   :  { %4056 = vmatmul.mubr.msk.bf16.vlgmr.msra.gmra.mxu1 %vm228_vm0, %v4297_v28 }
 0x69c   :  { %4060 = vmatpush3.bf16.msra.mxu1 %v4298_v34  ;;  %v3829_v14 = vpop.f32.mrf.mxu0 }
 0x69d   :  { %4061 = vmatprep.subr.bf16.mxu1 %v4299_v51  ;;  %v3830_v43 = vadd.f32 %v3829_v14, %v3828_v53 }
 0x69e   :  { %v3831_v55 = vpop.f32.mrf.mxu0 }
 0x6a0   :  { %4062 = vmatpush3.bf16.msra.mxu1 %v4299_v51  ;;  %v3832_v56 = vpop.f32.mrf.mxu0 }
 0x6a1   :  { %4063 = vmatprep.subr.bf16.mxu1 %v4300_v35  ;;  %v3833_v48 = vadd.f32 %v3832_v56, %v3831_v55 }
 0x6a2   :  { %v3834_v57 = vpop.f32.mrf.mxu0 }
 0x6a3   :  { %v2186_v17 = vadd.f32 %v5193_v16, %v3833_v48 }
 0x6a4   :  { %4064 = vmatpush3.bf16.msra.mxu1 %v4300_v35  ;;  %v3835_v59 = vpop.f32.mrf.mxu0 }
 0x6a5   :  { %4065 = vmatprep.subr.bf16.mxu1 %v4301_v52  ;;  %v3836_v39 = vadd.f32 %v3835_v59, %v3834_v57 }
 0x6a6   :  { %v3837_v42 = vpop.f32.mrf.mxu0 }
 0x6a8   :  { %4066 = vmatpush3.bf16.msra.mxu1 %v4301_v52  ;;  %v3838_v37 = vpop.f32.mrf.mxu0 }
 0x6a9   :  { %4071 = vmatprep.subr.bf16.mxu1 %v4302_v31  ;;  %v3839_v44 = vadd.f32 %v3838_v37, %v3837_v42 }
 0x6ab   :  { %v2194_v63 = vadd.f32 %v5193_v16, %v3839_v44 }
 0x752   :  { %v2533_v57 = vpop.f32.mrf.mxu0 }
 0x753   :  { %v4049_v60 = vpop.f32.mrf.mxu1 }
 0x754   :  { %v5228_v61 = vadd.f32 %v4049_v60, %v5179_v45  ;;  %v2191_v45 = vadd.f32 %v5193_v16, %v3836_v39  ;;  %v4097_v59 = vpop.f32.mrf.mxu0 }
 0x755   :  { %v2084_v62 = vpop.f32.mrf.mxu1 }
 0x756   :  { %v5231_v58 = vadd.f32 %v2084_v62, %v5182_v47  ;;  %v2183_v47 = vadd.f32 %v5193_v16, %v3830_v43  ;;  %v4304_v16 = vld [vmem:[%s5434_s5 + $0x28] sm:$0xff]   ;;  %v2536_v60 = vpop.f32.mrf.mxu0 }
 0x757   :  { %v4050_v36 = vpop.f32.mrf.mxu1 }
 0x758   :  { %v5234_v38 = vadd.f32 %v4050_v36, %v5185_v49  ;;  %v4098_v42 = vpop.f32.mrf.mxu0 }
 0x759   :  { %v2087_v40 = vpop.f32.mrf.mxu1 }
 0x75a   :  { %v5237_v41 = vadd.f32 %v2087_v40, %v5188_v54 }
 0x75b   :  { %v4057_v46 = vpop.f32.mrf.mxu1 }
 0x75c   :  { %v2240_v2 = vadd.f32 %v4057_v46, %v2191_v45 }
 0x75d   :  { %v2231_v50 = vpop.f32.mrf.mxu1 }
 0x75e   :  { %v2232_v8 = vadd.f32 %v2231_v50, %v2183_v47  ;;  %v2248_v1 = vmax.f32 %v2240_v2, 0.0 }
 0x75f   :  { %v4058_v6 = vpop.f32.mrf.mxu1 }
 0x760   :  { %v2243_v49 = vadd.f32 %v4058_v6, %v2194_v63  ;;  %v2246_v54 = vmax.f32 %v2232_v8, 0.0 }
 0x761   :  { %v2234_v9 = vpop.f32.mrf.mxu1 }
 0x762   :  { %v2235_v12 = vadd.f32 %v2234_v9, %v2186_v17  ;;  %v2249_v19 = vmax.f32 %v2243_v49, 0.0 }
 0x764   :  { %v2247_v18 = vmax.f32 %v2235_v12, 0.0  ;;  %v2251_v22 = vpack.c.bf16 %v2249_v19, %v2248_v1 }
 0x766   :  { %v2250_v13 = vpack.c.bf16 %v2247_v18, %v2246_v54 }
 0x768   :  { %4067 = vmatprep.mubr.msk.bf16.mxu1 %vm528_vm1, %v2250_v13 }
 0x769   :  { %4068 = vmatmul.mubr.msk.bf16.vlgmr.msra.gmra.mxu1 %vm528_vm1, %v2251_v22 }
 0x76a   :  { %4072 = vmatpush3.bf16.msra.mxu1 %v4302_v31 }
 0x76b   :  { %4073 = vmatprep.subr.bf16.mxu1 %v4303_v3 }
 0x76e   :  { %4074 = vmatpush3.bf16.msra.mxu1 %v4303_v3 }
 0x76f   :  { %4075 = vmatprep.subr.bf16.mxu1 %v4304_v16 }
 0x772   :  { %4076 = vmatpush3.bf16.msra.mxu1 %v4304_v16 }
 0x773   :  { %4077 = vmatprep.subr.bf16.mxu1 %v4305_v15 }
 0x776   :  { %4078 = vmatpush3.bf16.msra.mxu1 %v4305_v15 }
 0x777   :  { %4079 = vmatprep.subr.bf16.mxu1 %v4306_v24 }
 0x77a   :  { %4080 = vmatpush3.bf16.msra.mxu1 %v4306_v24 }
 0x77b   :  { %4081 = vmatprep.subr.bf16.mxu1 %v4307_v7 }
 0x77e   :  { %4082 = vmatpush3.bf16.msra.mxu1 %v4307_v7 }
 0x77f   :  { %4083 = vmatprep.subr.bf16.mxu1 %v4309_v4 }
 0x782   :  { %4084 = vmatpush3.bf16.msra.mxu1 %v4309_v4 }
 0x783   :  { %4085 = vmatprep.subr.bf16.mxu1 %v4311_v27 }
 0x786   :  { %4086 = vmatpush3.bf16.msra.mxu1 %v4311_v27 }
 0x787   :  { %4115 = vmatprep.subr.bf16.mxu1 %v4385_v23 }
 0x829   :  { %v4069_v21 = vpop.f32.mrf.mxu1 }
 0x82a   :  { %v2341_v26 = vadd.f32 %v4069_v21, %v5228_v61  ;;  %v3459_v61 = vld [vmem:[%s5437_s8] ss:$0 sm:$0xff] }
 0x82b   :  { %v2324_v30 = vpop.f32.mrf.mxu1 }
 0x82c   :  { %v2339_v5 = vadd.f32 %v2324_v30, %v5231_v58  ;;  %v2352_v20 = vadd.f32 %v3458_v0, %v2341_v26 }
 0x82d   :  { %v4070_v32 = vpop.f32.mrf.mxu1 }
 0x82e   :  { %v2342_v33 = vadd.f32 %v4070_v32, %v5234_v38  ;;  %v2350_v28 = vadd.f32 %v3458_v0, %v2339_v5  ;;  %v2356_v35 = vmax.f32 %v2352_v20, 0.0 }
 0x82f   :  { %v2327_v10 = vpop.f32.mrf.mxu1 }
 0x830   :  { %v2353_v34 = vadd.f32 %v3458_v0, %v2342_v33  ;;  %v2340_v51 = vadd.f32 %v2327_v10, %v5237_v41  ;;  %v2354_v53 = vmax.f32 %v2350_v28, 0.0 }
 0x832   :  { %v2357_v52 = vmax.f32 %v2353_v34, 0.0  ;;  %v2351_v31 = vadd.f32 %v3458_v0, %v2340_v51 }
 0x834   :  { %v2359_v14 = vpack.c.bf16 %v2357_v52, %v2356_v35  ;;  %v2355_v55 = vmax.f32 %v2351_v31, 0.0 }
 0x836   :  { %v2358_v56 = vpack.c.bf16 %v2355_v55, %v2354_v53 }
 0x838   :  { %4087 = vmatprep.mubr.bf16.mxu1 %v2358_v56 }
 0x839   :  { %4088 = vmatmul.mubr.bf16.vlgmr.msra.gmra.mxu1 %v2359_v14 }
 0x83a   :  { %4116 = vmatpush3.bf16.msra.mxu1 %v5263_v25  ;;  %4119 = vmatprep.mubr.msk.bf16.mxu1 %vm4386_vm2, %v4385_v23 }
 0x83b   :  { %4117 = vmatprep.subr.bf16.mxu1 %v4385_v23 }
 0x83e   :  { %4118 = vmatpush3.bf16.msra.mxu1 %v5274_v11 }
 0x83f   :  { %4131 = vmatprep.subr.bf16.mxu1 %v4385_v23 }
 0x8f9   :  { %v4089_v62 = vpop.f32.mrf.mxu1 }
 0x8fa   :  { %v5307_v58 = vadd.f32 %v4089_v62, %v3459_v61 }
 0x8fb   :  { %v2469_v36 = vpop.f32.mrf.mxu1 }
 0x8fc   :  { %v2470_v37 = vadd.f32 %v3459_v61, %v2469_v36 }
 0x8fd   :  { %v4090_v38 = vpop.f32.mrf.mxu1 }
 0x8fe   :  { %v2539_v39 = vadd.f32 %v2533_v57, %v2470_v37  ;;  %v5309_v40 = vadd.f32 %v4090_v38, %v3459_v61 }
 0x8ff   :  { %v2472_v19 = vpop.f32.mrf.mxu1 }
 0x900   :  { %v3470_v43 = vmul.f32 -1.442695, %v2539_v39  ;;  %v2473_v54 = vadd.f32 %v3459_v61, %v2472_v19 }
 0x902   :  { %4318 = vpow2.f32 %v3470_v43 }
 0x90f   :  { %v4319_v44 = vpop.eup %4318 }
 0x910   :  { %v2543_v41 = vadd.f32 1.0, %v4319_v44 }
 0x912   :  { %4320 = vrcp.f32 %v2543_v41 }
 0x91f   :  { %v4321_v46 = vpop.eup %4320 }
 0x920   :  { %v2546_v48 = vmul.f32 2.0, %v4321_v46  ;;  %v2548_v63 = vmul.f32 0.0, %v4321_v46 }
 0x922   :  { %v3471_v45 = vadd.f32 -1.0, %v2546_v48 }
 0x924   :  { %2550 = vrot.lane.b32.xlu0 %v3471_v45, %s4388_s19 }
 0x996   :  { %v2551_v50 = vpop.permute.xlu0 %2550 }
 0x997   :  { %v2553_v47 = vmul.f32 %v4321_v46, %v2551_v50 }
 0x999   :  { %2555 = vrot.lane.b32.xlu0 %v2553_v47, %s4389_s20 }
 0xa0b   :  { %v2556_v6 = vpop.permute.xlu0 %2555 }
 0xa0c   :  { %v2558_v8 = vadd.f32 %v2556_v6, %v2548_v63 }
 0xa0e   :  { %4322 = vtanh.f32 %v2558_v8 }
 0xa1b   :  { %v4323_v49 = vpop.eup %4322 }
 0xa1c   :  { %2561 = vrot.lane.b32.xlu1 %v4323_v49, %s4388_s19 }
 0xa8e   :  { %v2562_v17 = vpop.permute.xlu1 %2561 }
 0xa8f   :  { %v5314_v2 = vmul.f32 %v4321_v46, %v2562_v17 }
 0xa91   :  { %v2565_v9 = vpack.c.bf16 %v5314_v2, %v5314_v2 }
 0xa93   :  { %2567 = vrot.lane.b32.xlu1 %v2565_v9, %s4389_s20 }
 0xb05   :  { %v2568_v12 = vpop.permute.xlu1 %2567 }
 0xb06   :  { %4104 = vmatmul.mubr.msk.bf16.vlgmr.msra.gmra.mxu0 %vm228_vm0, %v2568_v12 }
 0xb07   :  { %4108 = vmatpush3.bf16.msra.mxu0 %v5263_v25  ;;  %4111 = vmatprep.mubr.msk.bf16.mxu0 %vm4386_vm2, %v4385_v23 }
 0xb08   :  { %4109 = vmatprep.subr.bf16.mxu0 %v4385_v23 }
 0xb0b   :  { %4110 = vmatpush3.bf16.msra.mxu0 %v5274_v11 }
 0xbc6   :  { %v2606_v18 = vpop.f32.mrf.mxu0 }
 0xbc7   :  { %v2612_v1 = vadd.f32 %v2606_v18, %v2473_v54  ;;  %v5347_v54 = vld [vmem:[%s5435_s7 + $0x18] sm:$0xff]   ;;  %v5352_v18 = vld [vmem:[%s5435_s7 + $0x10] sm:$0xff]  }
 0xbc8   :  { %v4105_v13 = vpop.f32.mrf.mxu0 }
 0xbc9   :  { %v3473_v22 = vmul.f32 -1.442695, %v2612_v1  ;;  %v4314_v1 = vld [vmem:[%s5438_s6] sm:$0xff]  }
 0xbca   :  { %v2609_v3 = vpop.f32.mrf.mxu0 }
 0xbcb   :  { %4324 = vpow2.f32 %v3473_v22 }
 0xbcc   :  { %v4106_v16 = vpop.f32.mrf.mxu0 }
 0xbd8   :  { %v4325_v15 = vpop.eup %4324 }
 0xbd9   :  { %v2616_v24 = vadd.f32 1.0, %v4325_v15 }
 0xbdb   :  { %4326 = vrcp.f32 %v2616_v24 }
 0xbe8   :  { %v4327_v7 = vpop.eup %4326 }
 0xbe9   :  { %v2619_v25 = vmul.f32 2.0, %v4327_v7  ;;  %v2621_v11 = vmul.f32 %v4327_v7, %v2558_v8 }
 0xbeb   :  { %v3474_v4 = vadd.f32 -1.0, %v2619_v25 }
 0xbed   :  { %2623 = vrot.lane.b32.xlu0 %v3474_v4, %s4388_s19  ;;  %v3486_v4 = vld [vmem:[%s5437_s8 + $0x1] ss:$0 sm:$0xff] }
 0xc5f   :  { %v2624_v27 = vpop.permute.xlu0 %2623 }
 0xc60   :  { %v2626_v21 = vmul.f32 %v4327_v7, %v2624_v27 }
 0xc62   :  { %2628 = vrot.lane.b32.xlu1 %v2626_v21, %s4389_s20 }
 0xcd4   :  { %v2629_v26 = vpop.permute.xlu1 %2628 }
 0xcd5   :  { %v2631_v0 = vadd.f32 %v2629_v26, %v2621_v11 }
 0xcd7   :  { %4328 = vtanh.f32 %v2631_v0 }
 0xce4   :  { %v4329_v30 = vpop.eup %4328 }
 0xce5   :  { %2634 = vrot.lane.b32.xlu0 %v4329_v30, %s4388_s19 }
 0xd57   :  { %v2635_v5 = vpop.permute.xlu0 %2634 }
 0xd58   :  { %v2637_v32 = vmul.f32 %v4327_v7, %v2635_v5 }
 0xd5a   :  { %v2638_v20 = vpack.c.bf16 %v2637_v32, %v2637_v32  ;;  %v2784_v17 = vpack.c.bf16 %v2637_v32, %v5314_v2  ;;  %v4312_v2 = vld [vmem:[%s5438_s6 + $0x8] sm:$0xff]  }
 0xd5b   :  { %4123 = vmatprep.subr.bf16.mxu0 %v4312_v2 }
 0xd5c   :  { %2640 = vrot.lane.b32.xlu1 %v2638_v20, %s4389_s20 }
 0xdce   :  { %v2641_v33 = vpop.permute.xlu1 %2640 }
 0xdcf   :  { %4112 = vmatmul.mubr.msk.bf16.vlgmr.msra.gmra.mxu0 %vm228_vm0, %v2641_v33 }
 0xdd0   :  { %4124 = vmatpush3.bf16.msra.mxu0 %v4312_v2 }
 0xdd1   :  { %4125 = vmatprep.subr.bf16.mxu0 %v4314_v1 }
 0xdd4   :  { %4126 = vmatpush3.bf16.msra.mxu0 %v4314_v1 }
 0xdd5   :  { %4139 = vmatprep.subr.bf16.mxu0 %v4385_v23 }
 0xe8f   :  { %v2679_v10 = vpop.f32.mrf.mxu0 }
 0xe90   :  { %v2685_v28 = vadd.f32 %v2679_v10, %v5307_v58 }
 0xe91   :  { %v4113_v34 = vpop.f32.mrf.mxu0 }
 0xe92   :  { %v3476_v51 = vmul.f32 -1.442695, %v2685_v28 }
 0xe93   :  { %v2682_v35 = vpop.f32.mrf.mxu0 }
 0xe94   :  { %4330 = vpow2.f32 %v3476_v51 }
 0xe95   :  { %v4114_v52 = vpop.f32.mrf.mxu0 }
 0xea1   :  { %v4331_v31 = vpop.eup %4330 }
 0xea2   :  { %v2689_v53 = vadd.f32 1.0, %v4331_v31 }
 0xea4   :  { %4332 = vrcp.f32 %v2689_v53 }
 0xeb1   :  { %v4333_v14 = vpop.eup %4332 }
 0xeb2   :  { %v2692_v55 = vmul.f32 2.0, %v4333_v14  ;;  %v2694_v60 = vmul.f32 %v4333_v14, %v2631_v0 }
 0xeb4   :  { %v3477_v56 = vadd.f32 -1.0, %v2692_v55 }
 0xeb6   :  { %2696 = vrot.lane.b32.xlu0 %v3477_v56, %s4388_s19 }
 0xf28   :  { %v2697_v57 = vpop.permute.xlu0 %2696 }
 0xf29   :  { %v2699_v59 = vmul.f32 %v4333_v14, %v2697_v57 }
 0xf2b   :  { %2701 = vrot.lane.b32.xlu1 %v2699_v59, %s4389_s20 }
 0xf9d   :  { %v2702_v42 = vpop.permute.xlu1 %2701 }
 0xf9e   :  { %v2704_v61 = vadd.f32 %v2702_v42, %v2694_v60 }
 0xfa0   :  { %4334 = vtanh.f32 %v2704_v61 }
 0xfad   :  { %v4335_v62 = vpop.eup %4334 }
 0xfae   :  { %2707 = vrot.lane.b32.xlu0 %v4335_v62, %s4388_s19 }
0x1020   :  { %v2708_v58 = vpop.permute.xlu0 %2707 }
0x1021   :  { %v2710_v36 = vmul.f32 %v4333_v14, %v2708_v58 }
0x1023   :  { %v2711_v37 = vpack.c.bf16 %v2710_v36, %v2710_v36 }
0x1025   :  { %2713 = vrot.lane.b32.xlu1 %v2711_v37, %s4389_s20 }
0x1097   :  { %v2714_v38 = vpop.permute.xlu1 %2713 }
0x1098   :  { %4120 = vmatmul.mubr.msk.bf16.vlgmr.msra.gmra.mxu1 %vm228_vm0, %v2714_v38 }
0x1099   :  { %4135 = vmatprep.mubr.msk.bf16.mxu1 %vm4386_vm2, %v4385_v23  ;;  %4132 = vmatpush3.bf16.msra.mxu1 %v5347_v54 }
0x109a   :  { %4133 = vmatprep.subr.bf16.mxu1 %v4385_v23 }
0x109d   :  { %4134 = vmatpush3.bf16.msra.mxu1 %v5352_v18 }
0x109e   :  { %4147 = vmatprep.subr.bf16.mxu1 %v4385_v23 }
0x10a0   :  { %4136 = vmatmul.mubr.bf16.vlgmr.msra.gmra.mxu1 %v4387_v29 }
0x10a1   :  { %4148 = vmatpush3.bf16.msra.mxu1 %v5347_v54  ;;  %4151 = vmatprep.mubr.msk.bf16.mxu1 %vm4386_vm2, %v4385_v23 }
0x10a2   :  { %4149 = vmatprep.subr.bf16.mxu1 %v4385_v23 }
0x10a5   :  { %4150 = vmatpush3.bf16.msra.mxu1 %v5352_v18 }
0x10a6   :  { %4163 = vmatprep.subr.bf16.mxu1 %v4385_v23 }
0x1158   :  { %v2752_v39 = vpop.f32.mrf.mxu1 }
0x1159   :  { %v2758_v43 = vadd.f32 %v2752_v39, %v5309_v40 }
0x115a   :  { %v4121_v44 = vpop.f32.mrf.mxu1 }
0x115b   :  { %v3479_v41 = vmul.f32 -1.442695, %v2758_v43 }
0x115c   :  { %v2755_v46 = vpop.f32.mrf.mxu1 }
0x115d   :  { %4336 = vpow2.f32 %v3479_v41 }
0x115e   :  { %v4122_v48 = vpop.f32.mrf.mxu1 }
0x1160   :  { %v2922_v15 = vpop.f32.mrf.mxu1 }
0x1162   :  { %v4137_v29 = vpop.f32.mrf.mxu1 }
0x1164   :  { %v2925_v24 = vpop.f32.mrf.mxu1 }
0x1166   :  { %v4138_v7 = vpop.f32.mrf.mxu1 }
0x116a   :  { %v4337_v45 = vpop.eup %4336 }
0x116b   :  { %v2762_v50 = vadd.f32 1.0, %v4337_v45 }
0x116d   :  { %4338 = vrcp.f32 %v2762_v50 }
0x117a   :  { %v4339_v47 = vpop.eup %4338 }
0x117b   :  { %v2765_v63 = vmul.f32 2.0, %v4339_v47  ;;  %v2767_v40 = vmul.f32 %v4339_v47, %v2704_v61 }
0x117d   :  { %v3480_v6 = vadd.f32 -1.0, %v2765_v63 }
0x117f   :  { %2769 = vrot.lane.b32.xlu0 %v3480_v6, %s4388_s19 }
0x11f1   :  { %v2770_v8 = vpop.permute.xlu0 %2769 }
0x11f2   :  { %v2772_v49 = vmul.f32 %v4339_v47, %v2770_v8 }
0x11f4   :  { %2774 = vrot.lane.b32.xlu1 %v2772_v49, %s4389_s20 }
0x11f8   :  { %2805 = vrot.lane.b32.xlu1 %v2784_v17, %s4389_s20 }
0x1266   :  { %v2775_v9 = vpop.permute.xlu1 %2774 }
0x1267   :  { %v2777_v12 = vadd.f32 %v2775_v9, %v2767_v40 }
0x1269   :  { %4340 = vtanh.f32 %v2777_v12 }
0x126a   :  { %v2806_v19 = vpop.permute.xlu1 %2805 }
0x126b   :  { %4127 = vmatprep.mubr.msk.bf16.mxu0 %vm228_vm0, %v2806_v19 }
0x1276   :  { %v4341_v13 = vpop.eup %4340 }
0x1277   :  { %2780 = vrot.lane.b32.xlu0 %v4341_v13, %s4388_s19 }
0x12e9   :  { %v2781_v22 = vpop.permute.xlu0 %2780 }
0x12ea   :  { %v2783_v3 = vmul.f32 %v4339_v47, %v2781_v22 }
0x12ec   :  { %v2785_v16 = vpack.c.bf16 %v2783_v3, %v2710_v36 }
0x12ee   :  { %2807 = vrot.lane.b32.xlu0 %v2785_v16, %s4389_s20 }
0x1360   :  { %v2808_v25 = vpop.permute.xlu0 %2807 }
0x1361   :  { %4128 = vmatmul.mubr.msk.bf16.vlgmr.msra.gmra.mxu0 %vm228_vm0, %v2808_v25 }
0x1362   :  { %4140 = vmatpush3.bf16.msra.mxu0 %v5347_v54  ;;  %4143 = vmatprep.mubr.msk.bf16.mxu0 %vm4386_vm2, %v4385_v23 }
0x1363   :  { %4141 = vmatprep.subr.bf16.mxu0 %v4385_v23 }
0x1366   :  { %4142 = vmatpush3.bf16.msra.mxu0 %v5352_v18 }
0x1367   :  { %4155 = vmatprep.subr.bf16.mxu0 %v4385_v23 }
0x1421   :  { %v4129_v27 = vpop.f32.mrf.mxu0 }
0x1422   :  { %v5384_v21 = vadd.f32 %v4129_v27, %v3486_v4 }
0x1423   :  { %v2861_v11 = vpop.f32.mrf.mxu0 }
0x1424   :  { %v2862_v26 = vadd.f32 %v3486_v4, %v2861_v11 }
0x1425   :  { %v4130_v0 = vpop.f32.mrf.mxu0 }
0x1426   :  { %v2928_v30 = vadd.f32 %v2922_v15, %v2862_v26  ;;  %v5386_v5 = vadd.f32 %v4130_v0, %v3486_v4 }
0x1427   :  { %v2864_v60 = vpop.f32.mrf.mxu0 }
0x1428   :  { %v3493_v32 = vmul.f32 -1.442695, %v2928_v30  ;;  %v2865_v42 = vadd.f32 %v3486_v4, %v2864_v60 }
0x142a   :  { %4342 = vpow2.f32 %v3493_v32 }
0x1437   :  { %v4343_v20 = vpop.eup %4342 }
0x1438   :  { %v2932_v33 = vadd.f32 1.0, %v4343_v20 }
0x143a   :  { %4344 = vrcp.f32 %v2932_v33 }
0x1447   :  { %v4345_v10 = vpop.eup %4344 }
0x1448   :  { %v2935_v28 = vmul.f32 2.0, %v4345_v10  ;;  %v2937_v52 = vmul.f32 0.0, %v4345_v10 }
0x144a   :  { %v3494_v34 = vadd.f32 -1.0, %v2935_v28 }
0x144c   :  { %2939 = vrot.lane.b32.xlu1 %v3494_v34, %s4388_s19 }
0x14be   :  { %v2940_v51 = vpop.permute.xlu1 %2939 }
0x14bf   :  { %v2942_v35 = vmul.f32 %v4345_v10, %v2940_v51 }
0x14c1   :  { %2944 = vrot.lane.b32.xlu0 %v2942_v35, %s4389_s20 }
0x1533   :  { %v2945_v31 = vpop.permute.xlu0 %2944 }
0x1534   :  { %v2947_v53 = vadd.f32 %v2945_v31, %v2937_v52 }
0x1536   :  { %4346 = vtanh.f32 %v2947_v53 }
0x1543   :  { %v4347_v14 = vpop.eup %4346 }
0x1544   :  { %2950 = vrot.lane.b32.xlu1 %v4347_v14, %s4388_s19 }
0x15b6   :  { %v2951_v55 = vpop.permute.xlu1 %2950 }
0x15b7   :  { %v2953_v56 = vmul.f32 %v4345_v10, %v2951_v55 }
0x15b9   :  { %v2954_v57 = vpack.c.bf16 %v2953_v56, %v2953_v56  ;;  %v4316_v56 = vld [vmem:[%s5439_s9 + $0x8] sm:$0xff]  }
0x15bb   :  { %2956 = vrot.lane.b32.xlu0 %v2954_v57, %s4389_s20  ;;  %v4317_v57 = vld [vmem:[%s5439_s9] sm:$0xff]  }
0x162d   :  { %v2957_v59 = vpop.permute.xlu0 %2956 }
0x162e   :  { %4144 = vmatmul.mubr.msk.bf16.vlgmr.msra.gmra.mxu0 %vm228_vm0, %v2957_v59 }
0x162f   :  { %4156 = vmatpush3.bf16.msra.mxu0 %v5347_v54  ;;  %4159 = vmatprep.mubr.msk.bf16.mxu0 %vm4386_vm2, %v4385_v23 }
0x1630   :  { %4157 = vmatprep.subr.bf16.mxu0 %v4385_v23 }
0x1633   :  { %4158 = vmatpush3.bf16.msra.mxu0 %v5352_v18 }
0x16ee   :  { %v2995_v61 = vpop.f32.mrf.mxu0 }
0x16ef   :  { %v3001_v62 = vadd.f32 %v2995_v61, %v2865_v42 }
0x16f0   :  { %v4145_v58 = vpop.f32.mrf.mxu0 }
0x16f1   :  { %v3496_v36 = vmul.f32 -1.442695, %v3001_v62  ;;  %v3504_v58 = vld [vmem:[%s5440_s10] ss:$0 sm:$0xff] }
0x16f2   :  { %v2998_v37 = vpop.f32.mrf.mxu0 }
0x16f3   :  { %4348 = vpow2.f32 %v3496_v36 }
0x16f4   :  { %v4146_v38 = vpop.f32.mrf.mxu0 }
0x1700   :  { %v4349_v39 = vpop.eup %4348 }
0x1701   :  { %v3005_v43 = vadd.f32 1.0, %v4349_v39 }
0x1703   :  { %4350 = vrcp.f32 %v3005_v43 }
0x1710   :  { %v4351_v44 = vpop.eup %4350 }
0x1711   :  { %v3008_v41 = vmul.f32 2.0, %v4351_v44  ;;  %v3010_v50 = vmul.f32 %v4351_v44, %v2947_v53 }
0x1713   :  { %v3497_v46 = vadd.f32 -1.0, %v3008_v41 }
0x1715   :  { %3012 = vrot.lane.b32.xlu1 %v3497_v46, %s4388_s19 }
0x1787   :  { %v3013_v48 = vpop.permute.xlu1 %3012 }
0x1788   :  { %v3015_v45 = vmul.f32 %v4351_v44, %v3013_v48 }
0x178a   :  { %3017 = vrot.lane.b32.xlu0 %v3015_v45, %s4389_s20 }
0x17fc   :  { %v3018_v47 = vpop.permute.xlu0 %3017 }
0x17fd   :  { %v3020_v63 = vadd.f32 %v3018_v47, %v3010_v50 }
0x17ff   :  { %4352 = vtanh.f32 %v3020_v63 }
0x180c   :  { %v4353_v6 = vpop.eup %4352 }
0x180d   :  { %3023 = vrot.lane.b32.xlu1 %v4353_v6, %s4388_s19 }
0x187f   :  { %v3024_v8 = vpop.permute.xlu1 %3023 }
0x1880   :  { %v3026_v49 = vmul.f32 %v4351_v44, %v3024_v8 }
0x1882   :  { %v3027_v17 = vpack.c.bf16 %v3026_v49, %v3026_v49 }
0x1884   :  { %3029 = vrot.lane.b32.xlu0 %v3027_v17, %s4389_s20 }
0x18f6   :  { %v3030_v40 = vpop.permute.xlu0 %3029 }
0x18f7   :  { %4152 = vmatmul.mubr.msk.bf16.vlgmr.msra.gmra.mxu1 %vm228_vm0, %v3030_v40 }
0x18f8   :  { %4167 = vmatprep.mubr.msk.bf16.mxu1 %vm4386_vm2, %v4385_v23  ;;  %4164 = vmatpush3.bf16.msra.mxu1 %v4316_v56 }
0x18f9   :  { %4165 = vmatprep.subr.bf16.mxu1 %v4385_v23 }
0x18fc   :  { %4166 = vmatpush3.bf16.msra.mxu1 %v4317_v57 }
0x19b7   :  { %v3068_v9 = vpop.f32.mrf.mxu1 }
0x19b8   :  { %v3074_v12 = vadd.f32 %v3068_v9, %v5384_v21 }
0x19b9   :  { %v4153_v19 = vpop.f32.mrf.mxu1 }
0x19ba   :  { %v3499_v54 = vmul.f32 -1.442695, %v3074_v12 }
0x19bb   :  { %v3071_v18 = vpop.f32.mrf.mxu1 }
0x19bc   :  { %4354 = vpow2.f32 %v3499_v54 }
0x19bd   :  { %v4154_v2 = vpop.f32.mrf.mxu1 }
0x19c9   :  { %v4355_v1 = vpop.eup %4354 }
0x19ca   :  { %v3078_v13 = vadd.f32 1.0, %v4355_v1 }
0x19cc   :  { %4356 = vrcp.f32 %v3078_v13 }
0x19d9   :  { %v4357_v22 = vpop.eup %4356 }
0x19da   :  { %v3081_v3 = vmul.f32 2.0, %v4357_v22  ;;  %v3083_v24 = vmul.f32 %v4357_v22, %v3020_v63 }
0x19dc   :  { %v3500_v16 = vadd.f32 -1.0, %v3081_v3 }
0x19de   :  { %3085 = vrot.lane.b32.xlu1 %v3500_v16, %s4388_s19 }
0x1a50   :  { %v3086_v15 = vpop.permute.xlu1 %3085 }
0x1a51   :  { %v3088_v29 = vmul.f32 %v4357_v22, %v3086_v15 }
0x1a53   :  { %3090 = vrot.lane.b32.xlu0 %v3088_v29, %s4389_s20 }
0x1ac5   :  { %v3091_v7 = vpop.permute.xlu0 %3090 }
0x1ac6   :  { %v3093_v25 = vadd.f32 %v3091_v7, %v3083_v24 }
0x1ac8   :  { %4358 = vtanh.f32 %v3093_v25 }
0x1ad5   :  { %v4359_v4 = vpop.eup %4358 }
0x1ad6   :  { %3096 = vrot.lane.b32.xlu1 %v4359_v4, %s4388_s19 }
0x1b48   :  { %v3097_v27 = vpop.permute.xlu1 %3096 }
0x1b49   :  { %v3099_v21 = vmul.f32 %v4357_v22, %v3097_v27 }
0x1b4b   :  { %v3100_v11 = vpack.c.bf16 %v3099_v21, %v3099_v21 }
0x1b4d   :  { %3102 = vrot.lane.b32.xlu0 %v3100_v11, %s4389_s20 }
0x1bbf   :  { %v3103_v26 = vpop.permute.xlu0 %3102 }
0x1bc0   :  { %4160 = vmatmul.mubr.msk.bf16.vlgmr.msra.gmra.mxu0 %vm228_vm0, %v3103_v26 }
0x1c80   :  { %v3141_v0 = vpop.f32.mrf.mxu0 }
0x1c81   :  { %v3147_v30 = vadd.f32 %v3141_v0, %v5386_v5 }
0x1c82   :  { %v4161_v32 = vpop.f32.mrf.mxu0 }
0x1c83   :  { %v3502_v20 = vmul.f32 -1.442695, %v3147_v30 }
0x1c84   :  { %v3144_v33 = vpop.f32.mrf.mxu0 }
0x1c85   :  { %4360 = vpow2.f32 %v3502_v20 }
0x1c86   :  { %v4162_v10 = vpop.f32.mrf.mxu0 }
0x1c92   :  { %v4361_v28 = vpop.eup %4360 }
0x1c93   :  { %v3151_v34 = vadd.f32 1.0, %v4361_v28 }
0x1c95   :  { %4362 = vrcp.f32 %v3151_v34 }
0x1ca2   :  { %v4363_v51 = vpop.eup %4362 }
0x1ca3   :  { %v3154_v35 = vmul.f32 2.0, %v4363_v51  ;;  %v3156_v14 = vmul.f32 %v4363_v51, %v3093_v25 }
0x1ca5   :  { %v3503_v52 = vadd.f32 -1.0, %v3154_v35 }
0x1ca7   :  { %3158 = vrot.lane.b32.xlu1 %v3503_v52, %s4388_s19 }
0x1d19   :  { %v3159_v31 = vpop.permute.xlu1 %3158 }
0x1d1a   :  { %v3161_v53 = vmul.f32 %v4363_v51, %v3159_v31 }
0x1d1c   :  { %3163 = vrot.lane.b32.xlu0 %v3161_v53, %s4389_s20 }
0x1d8e   :  { %v3164_v55 = vpop.permute.xlu0 %3163 }
0x1d8f   :  { %v3166_v5 = vadd.f32 %v3164_v55, %v3156_v14 }
0x1d91   :  { %4364 = vtanh.f32 %v3166_v5 }
0x1d9e   :  { %v4365_v59 = vpop.eup %4364 }
0x1d9f   :  { %3169 = vrot.lane.b32.xlu1 %v4365_v59, %s4388_s19 }
0x1e11   :  { %v3170_v60 = vpop.permute.xlu1 %3169 }
0x1e12   :  { %v3172_v42 = vmul.f32 %v4363_v51, %v3170_v60 }
0x1e14   :  { %v3173_v61 = vpack.c.bf16 %v3172_v42, %v3172_v42 }
0x1e16   :  { %3186 = vrot.lane.b32.xlu0 %v3173_v61, %s4389_s20 }
0x1e88   :  { %v3187_v62 = vpop.permute.xlu0 %3186 }
0x1e89   :  { %4168 = vmatmul.mubr.msk.bf16.vlgmr.msra.gmra.mxu1 %vm228_vm0, %v3187_v62 }
0x1f49   :  { %v3237_v36 = vpop.f32.mrf.mxu1 }
0x1f4a   :  { %v3238_v37 = vadd.f32 %v3504_v58, %v3237_v36 }
0x1f4b   :  { %v4169_v23 = vpop.f32.mrf.mxu1 }
0x1f4c   :  { %3244 = vst.msk [vmem:[%s5441_s11] sm:$0xff] %vm3243_vm3, %v3238_v37 }
0x1f4d   :  { %v3240_v38 = vpop.f32.mrf.mxu1 }
0x1f4f   :  { %v4170_v39 = vpop.f32.mrf.mxu1 }

</bundles_post_ra>
